<compile_context>
chip_gen: v7x
topology: tpu7x:2x2x1
jax: 0.10.0
libtpu: 0.0.40
codegen_flags: <defaults>
</compile_context>

<pallas_src>
import functools

import jax
import jax.numpy as jnp
from jax.experimental import pallas as pl
from jax.experimental.pallas import tpu as pltpu


# ----------------------------------------------------------------------------
# Fused attention sub-layer kernel
#   QKV proj + multi-head attention + output proj + residual + LayerNorm
# ----------------------------------------------------------------------------

def _fused_mha_kernel(xq_ref, xkv_ref, mask_ref, wqkv_ref, bqkv_ref,
                      wo_ref, bo_ref, g_ref, beta_ref, o_ref,
                      *, n_heads, causal, self_attn):
    xq = xq_ref[0]                       # (Sq, D) f32 (also the residual input)
    Sq, D = xq.shape
    dh = D // n_heads
    xq16 = xq.astype(jnp.bfloat16)

    # --- fused QKV projection (single [D,3D] matmul for self-attention) ------
    if self_attn:
        qkv = jnp.dot(xq16, wqkv_ref[...],
                      preferred_element_type=jnp.float32) + bqkv_ref[...]
        q, k, v = qkv[:, :D], qkv[:, D:2 * D], qkv[:, 2 * D:]
        Sk = Sq
    else:
        xkv16 = xkv_ref[0].astype(jnp.bfloat16)          # (Sk, D)
        Sk = xkv16.shape[0]
        q = jnp.dot(xq16, wqkv_ref[:, :D],
                    preferred_element_type=jnp.float32) + bqkv_ref[:, :D]
        k = jnp.dot(xkv16, wqkv_ref[:, D:2 * D],
                    preferred_element_type=jnp.float32) + bqkv_ref[:, D:2 * D]
        v = jnp.dot(xkv16, wqkv_ref[:, 2 * D:],
                    preferred_element_type=jnp.float32) + bqkv_ref[:, 2 * D:]

    # --- in-kernel mask construction (no O(S^2) bias streamed from HBM) ------
    key_masked = mask_ref[0] > 0.5                       # (1, Sk) bool, True@PAD
    if causal:
        qi = jax.lax.broadcasted_iota(jnp.int32, (Sq, Sk), 0)
        ki = jax.lax.broadcasted_iota(jnp.int32, (Sq, Sk), 1)
        key_masked = jnp.logical_or(key_masked, ki > qi)  # (Sq, Sk)

    # --- per-head attention on in-register data (no HBM transposes) ----------
    scale = 1.0 / (dh ** 0.5)
    q16 = q.astype(jnp.bfloat16)
    k16 = k.astype(jnp.bfloat16)
    v16 = v.astype(jnp.bfloat16)
    heads = []
    for h in range(n_heads):                              # static unrolled loop
        lo = h * dh
        s = jnp.einsum('qd,kd->qk', q16[:, lo:lo + dh], k16[:, lo:lo + dh],
                       preferred_element_type=jnp.float32) * scale   # (Sq, Sk)
        s = jnp.where(key_masked, -1e9, s)
        m = jnp.max(s, axis=-1, keepdims=True)
        p = jnp.exp(s - m)
        p = p * pl.reciprocal(jnp.sum(p, axis=-1, keepdims=True), approx=True)
        heads.append(jnp.dot(p.astype(jnp.bfloat16), v16[:, lo:lo + dh],
                             preferred_element_type=jnp.float32))
    attn = jnp.concatenate(heads, axis=-1)                # (Sq, D) f32

    # --- output projection + residual + LayerNorm (fused epilogue) -----------
    proj = jnp.dot(attn.astype(jnp.bfloat16), wo_ref[...],
                   preferred_element_type=jnp.float32) + bo_ref[...]
    r = xq + proj
    mu = jnp.mean(r, axis=-1, keepdims=True)
    var = jnp.mean((r - mu) ** 2, axis=-1, keepdims=True)
    o_ref[0] = (r - mu) * jax.lax.rsqrt(var + 1e-5) * g_ref[...] + beta_ref[...]


def fused_mha_block(x_q, x_kv, key_pad_mask, p, n_heads, *, causal, self_attn):
    """x_q: (B,Sq,D) f32; x_kv: (B,Sk,D) f32; key_pad_mask: (B,1,Sk) f32 (1@PAD)."""
    B, Sq, D = x_q.shape
    Sk = x_kv.shape[1]
    kernel = functools.partial(_fused_mha_kernel, n_heads=n_heads,
                               causal=causal, self_attn=self_attn)
    # TODO(synk): for long sequences convert the inner attention to a tiled
    # online-softmax (flash) loop over Sk and set vmem_limit_bytes per chip.
    return pl.pallas_call(
        kernel,
        out_shape=jax.ShapeDtypeStruct((B, Sq, D), jnp.float32),
        grid=(B,),
        in_specs=[
            pl.BlockSpec((1, Sq, D), lambda b: (b, 0, 0)),       # x_q
            pl.BlockSpec((1, Sk, D), lambda b: (b, 0, 0)),       # x_kv
            pl.BlockSpec((1, 1, Sk), lambda b: (b, 0, 0)),       # key pad mask
            pl.BlockSpec((D, 3 * D), lambda b: (0, 0)),          # Wqkv (resident)
            pl.BlockSpec((1, 3 * D), lambda b: (0, 0)),          # bqkv
            pl.BlockSpec((D, D), lambda b: (0, 0)),              # Wo
            pl.BlockSpec((1, D), lambda b: (0, 0)),              # bo
            pl.BlockSpec((1, D), lambda b: (0, 0)),              # LN gamma
            pl.BlockSpec((1, D), lambda b: (0, 0)),              # LN beta
        ],
        out_specs=pl.BlockSpec((1, Sq, D), lambda b: (b, 0, 0)),
        compiler_params=pltpu.CompilerParams(
            dimension_semantics=("parallel",)),
    )(x_q, x_kv, key_pad_mask, p["wqkv"], p["bqkv"], p["wo"], p["bo"],
      p["ln_g"], p["ln_b"])


# ----------------------------------------------------------------------------
# Fused FFN sub-layer kernel: Linear -> ReLU -> Linear -> residual -> LayerNorm
# ----------------------------------------------------------------------------

def _ffn_ln_kernel(x_ref, w1_ref, b1_ref, w2_ref, b2_ref, g_ref, beta_ref, o_ref):
    x = x_ref[...]                                        # (tm, D) f32
    h = jnp.dot(x.astype(jnp.bfloat16), w1_ref[...],
                preferred_element_type=jnp.float32) + b1_ref[...]
    h = jnp.maximum(h, 0.0)
    y = jnp.dot(h.astype(jnp.bfloat16), w2_ref[...],
                preferred_element_type=jnp.float32) + b2_ref[...]
    r = x + y
    mu = jnp.mean(r, axis=-1, keepdims=True)
    var = jnp.mean((r - mu) ** 2, axis=-1, keepdims=True)
    o_ref[...] = (r - mu) * jax.lax.rsqrt(var + 1e-5) * g_ref[...] + beta_ref[...]


def fused_ffn_ln(x, p):
    """x: (M, D) f32 -> LayerNorm(x + FFN(x)), row-tiled with resident weights."""
    M, D = x.shape
    H = p["w1"].shape[1]
    tm = min(256, M)                                       # row tile (pipelined)
    return pl.pallas_call(
        _ffn_ln_kernel,
        out_shape=jax.ShapeDtypeStruct((M, D), jnp.float32),
        grid=(pl.cdiv(M, tm),),
        in_specs=[pl.BlockSpec((tm, D), lambda i: (i, 0)),
                  pl.BlockSpec((D, H), lambda i: (0, 0)),
                  pl.BlockSpec((1, H), lambda i: (0, 0)),
                  pl.BlockSpec((H, D), lambda i: (0, 0)),
                  pl.BlockSpec((1, D), lambda i: (0, 0)),
                  pl.BlockSpec((1, D), lambda i: (0, 0)),
                  pl.BlockSpec((1, D), lambda i: (0, 0))],
        out_specs=pl.BlockSpec((tm, D), lambda i: (i, 0)),
        compiler_params=pltpu.CompilerParams(
            dimension_semantics=("parallel",)),
    )(x, p["w1"], p["b1"], p["w2"], p["b2"], p["ln_g"], p["ln_b"])


# ----------------------------------------------------------------------------
# Row-tiled final linear (lane-dense padded vocab)
# ----------------------------------------------------------------------------

def _linear_kernel(x_ref, w_ref, b_ref, o_ref):
    o_ref[...] = jnp.dot(x_ref[...].astype(jnp.bfloat16), w_ref[...],
                         preferred_element_type=jnp.float32) + b_ref[...]


def row_tiled_linear(x, w, b):
    """x: (M, K) f32, w: (K, N) bf16 (N multiple of 128), b: (N,) f32."""
    M, K = x.shape
    N = w.shape[1]
    tm = min(256, M)
    # TODO(synk): for production vocab sizes also tile N and add a K-reduction
    # axis marked 'arbitrary' with an explicit vmem_limit_bytes per chip.
    return pl.pallas_call(
        _linear_kernel,
        out_shape=jax.ShapeDtypeStruct((M, N), jnp.float32),
        grid=(pl.cdiv(M, tm),),
        in_specs=[pl.BlockSpec((tm, K), lambda i: (i, 0)),
                  pl.BlockSpec((K, N), lambda i: (0, 0)),
                  pl.BlockSpec((1, N), lambda i: (0, 0))],
        out_specs=pl.BlockSpec((tm, N), lambda i: (i, 0)),
        compiler_params=pltpu.CompilerParams(
            dimension_semantics=("parallel",)),
    )(x, w, b.reshape(1, N))


# ----------------------------------------------------------------------------
# Model glue (embedding gather / positional encoding / layer loop in plain JAX)
# ----------------------------------------------------------------------------

def positional_encoding(seq_len, d_model):
    pos = jnp.arange(seq_len, dtype=jnp.float32)[:, None]
    i = jnp.arange(d_model)[None, :]
    angle = pos / (10000.0 ** (2 * (i // 2) / d_model))
    return jnp.where(i % 2 == 0, jnp.sin(angle), jnp.cos(angle)).astype(jnp.float32)


def encoder_layer(x, p, src_key_mask, n_heads):
    B, S, D = x.shape
    x = fused_mha_block(x, x, src_key_mask, p["attn"], n_heads,
                        causal=False, self_attn=True)
    x = fused_ffn_ln(x.reshape(B * S, D), p["ffn"]).reshape(B, S, D)
    return x


def decoder_layer(y, enc_out, p, tgt_key_mask, src_key_mask, n_heads):
    B, S, D = y.shape
    y = fused_mha_block(y, y, tgt_key_mask, p["self_attn"], n_heads,
                        causal=True, self_attn=True)
    y = fused_mha_block(y, enc_out, src_key_mask, p["cross_attn"], n_heads,
                        causal=False, self_attn=False)
    y = fused_ffn_ln(y.reshape(B * S, D), p["ffn"]).reshape(B, S, D)
    return y


def transformer_forward(params, src_ids, tgt_ids, *, n_heads, v_fr, pad_id=0):
    B, Ss = src_ids.shape
    _, St = tgt_ids.shape
    d = params["eng_emb"].shape[1]

    # Key-padding masks: O(B*S) vectors (masks expanded/causal'd inside kernels).
    src_key_mask = (src_ids == pad_id).astype(jnp.float32)[:, None, :]  # (B,1,Ss)
    tgt_key_mask = (tgt_ids == pad_id).astype(jnp.float32)[:, None, :]  # (B,1,St)

    # TODO(synk): embedding gather + positional encoding kept as plain JAX glue.
    src = params["eng_emb"][src_ids] + positional_encoding(Ss, d)
    tgt = params["fr_emb"][tgt_ids] + positional_encoding(St, d)

    # TODO(synk): dropout_rate unused (inference mode -> identity dropout).
    x = src
    for p in params["enc_layers"]:
        x = encoder_layer(x, p, src_key_mask, n_heads)
    enc_out = x

    y = tgt
    for p in params["dec_layers"]:
        y = decoder_layer(y, enc_out, p, tgt_key_mask, src_key_mask, n_heads)

    logits = row_tiled_linear(y.reshape(B * St, d),
                              params["out_w"], params["out_b"])
    logits = logits[:, :v_fr].reshape(B, St, v_fr)   # strip lane padding
    return logits.transpose(0, 2, 1)                 # (B, V_fr, St) == .transpose(1,2)


# ----------------------------------------------------------------------------
# Deterministic parameter init (matmul weights stored bf16, f32 accumulation)
# ----------------------------------------------------------------------------

def _dense(key, fan_in, fan_out, scale=0.05):
    kw, kb = jax.random.split(key)
    w = (scale * jax.random.normal(kw, (fan_in, fan_out))).astype(jnp.bfloat16)
    b = (0.01 * jax.random.normal(kb, (fan_out,))).astype(jnp.float32)
    return w, b


def _attn_block_params(key, d):
    kq, kk, kv, ko = jax.random.split(key, 4)
    wq, bq = _dense(kq, d, d)
    wk, bk = _dense(kk, d, d)
    wv, bv = _dense(kv, d, d)
    wo, bo = _dense(ko, d, d)
    return dict(
        wqkv=jnp.concatenate([wq, wk, wv], axis=1),            # (d, 3d) bf16
        bqkv=jnp.concatenate([bq, bk, bv])[None, :],           # (1, 3d) f32
        wo=wo, bo=bo[None, :],
        ln_g=jnp.ones((1, d), jnp.float32),
        ln_b=jnp.zeros((1, d), jnp.float32))


def _ffn_params(key, d, h):
    k1, k2 = jax.random.split(key)
    w1, b1 = _dense(k1, d, h)
    w2, b2 = _dense(k2, h, d)
    return dict(w1=w1, b1=b1[None, :], w2=w2, b2=b2[None, :],
                ln_g=jnp.ones((1, d), jnp.float32),
                ln_b=jnp.zeros((1, d), jnp.float32))


def init_transformer_params(key, d_model, n_layers, v_eng, v_fr, ffn_hidden,
                            pad_id=0):
    keys = jax.random.split(key, 2 * n_layers + 3)
    eng_emb = (0.05 * jax.random.normal(keys[0], (v_eng, d_model))).astype(jnp.float32)
    fr_emb = (0.05 * jax.random.normal(keys[1], (v_fr, d_model))).astype(jnp.float32)
    # nn.Embedding padding_idx row is zero.
    eng_emb = eng_emb.at[pad_id].set(0.0)
    fr_emb = fr_emb.at[pad_id].set(0.0)

    # Final projection: pad vocab dim to a lane-dense multiple of 128 with zeros.
    v_pad = ((v_fr + 127) // 128) * 128
    out_w, out_b = _dense(keys[2], d_model, v_fr)
    out_w = jnp.pad(out_w, ((0, 0), (0, v_pad - v_fr)))
    out_b = jnp.pad(out_b, (0, v_pad - v_fr))

    enc_layers = []
    for i in range(n_layers):
        ka, kf = jax.random.split(keys[3 + i])
        enc_layers.append(dict(attn=_attn_block_params(ka, d_model),
                               ffn=_ffn_params(kf, d_model, ffn_hidden)))
    dec_layers = []
    for i in range(n_layers):
        ks_, kc, kf = jax.random.split(keys[3 + n_layers + i], 3)
        dec_layers.append(dict(self_attn=_attn_block_params(ks_, d_model),
                               cross_attn=_attn_block_params(kc, d_model),
                               ffn=_ffn_params(kf, d_model, ffn_hidden)))
    return dict(eng_emb=eng_emb, fr_emb=fr_emb, out_w=out_w, out_b=out_b,
                enc_layers=enc_layers, dec_layers=dec_layers)


# ----------------------------------------------------------------------------
# Main
# ----------------------------------------------------------------------------

if __name__ == "__main__":
    d_model, n_heads, n_layers, ffn_hidden = 32, 4, 2, 64
    v_eng, v_fr, pad_id = 13, 17, 0
    B, S_src, S_tgt = 2, 8, 8

    key = jax.random.PRNGKey(0)
    kp, ks, kt = jax.random.split(key, 3)
    params = init_transformer_params(kp, d_model, n_layers, v_eng, v_fr,
                                     ffn_hidden, pad_id)

    src = jax.random.randint(ks, (B, S_src), 1, v_eng, dtype=jnp.int32)
    tgt = jax.random.randint(kt, (B, S_tgt), 1, v_fr, dtype=jnp.int32)
    # Add some PAD tokens so the masks are exercised.
    src = src.at[:, -2:].set(pad_id)
    tgt = tgt.at[:, -1:].set(pad_id)

    fwd = jax.jit(functools.partial(transformer_forward, n_heads=n_heads,
                                    v_fr=v_fr, pad_id=pad_id))
    out = jax.block_until_ready(fwd(params, src, tgt))
    assert out.shape == (B, v_fr, S_tgt), out.shape
    assert bool(jnp.all(jnp.isfinite(out)))
    print("KERNEL_OK")
</pallas_src>

<mosaic_0001>
module attributes {stable_mosaic.version = 11 : i64} {
  func.func @_fused_mha_kernel(%arg0: i32, %arg1: memref<1x8x32xf32, #tpu.memory_space<vmem>>, %arg2: memref<1x8x32xf32, #tpu.memory_space<vmem>>, %arg3: memref<1x1x8xf32, #tpu.memory_space<vmem>>, %arg4: memref<32x96xbf16, #tpu.memory_space<vmem>>, %arg5: memref<1x96xf32, #tpu.memory_space<vmem>>, %arg6: memref<32x32xbf16, #tpu.memory_space<vmem>>, %arg7: memref<1x32xf32, #tpu.memory_space<vmem>>, %arg8: memref<1x32xf32, #tpu.memory_space<vmem>>, %arg9: memref<1x32xf32, #tpu.memory_space<vmem>>, %arg10: memref<1x8x32xf32, #tpu.memory_space<vmem>>) attributes {dimension_semantics = [#tpu.dimension_semantics<parallel>], iteration_bounds = array<i64: 2>, scalar_prefetch = 0 : i64, scratch_operands = 0 : i64, tpu.core_type = #tpu.core_type<tc>, window_params = [{transform_indices = @transform_0, window_bounds = array<i64: 1, 8, 32>}, {transform_indices = @transform_1, window_bounds = array<i64: 1, 8, 32>}, {transform_indices = @transform_2, window_bounds = array<i64: 1, 1, 8>}, {pipeline_mode = #tpu.pipeline_mode<synchronous>, transform_indices = @transform_3, window_bounds = array<i64: 32, 96>}, {pipeline_mode = #tpu.pipeline_mode<synchronous>, transform_indices = @transform_4, window_bounds = array<i64: 1, 96>}, {pipeline_mode = #tpu.pipeline_mode<synchronous>, transform_indices = @transform_5, window_bounds = array<i64: 32, 32>}, {pipeline_mode = #tpu.pipeline_mode<synchronous>, transform_indices = @transform_6, window_bounds = array<i64: 1, 32>}, {pipeline_mode = #tpu.pipeline_mode<synchronous>, transform_indices = @transform_7, window_bounds = array<i64: 1, 32>}, {pipeline_mode = #tpu.pipeline_mode<synchronous>, transform_indices = @transform_8, window_bounds = array<i64: 1, 32>}, {transform_indices = @transform_9, window_bounds = array<i64: 1, 8, 32>}]} {
    %c0 = arith.constant 0 : index
    %c0_0 = arith.constant 0 : index
    %c0_1 = arith.constant 0 : index
    %0 = vector.load %arg1[%c0, %c0_0, %c0_1] : memref<1x8x32xf32, #tpu.memory_space<vmem>>, vector<1x8x32xf32>
    %1 = vector.shape_cast %0 : vector<1x8x32xf32> to vector<8x32xf32>
    %2 = arith.truncf %1 : vector<8x32xf32> to vector<8x32xbf16>
    %c0_2 = arith.constant 0 : index
    %c0_3 = arith.constant 0 : index
    %3 = vector.load %arg4[%c0_2, %c0_3] : memref<32x96xbf16, #tpu.memory_space<vmem>>, vector<32x96xbf16>
    %cst = arith.constant dense<0.000000e+00> : vector<8x96xf32>
    %4 = tpu.matmul %2, %3, %cst {dimension_numbers = #tpu.dot_dimension_numbers<[1], [0], [0], [1], [0, 0, 1, 1], [], []>} : vector<8x32xbf16>, vector<32x96xbf16>, vector<8x96xf32> -> vector<8x96xf32>
    %c0_4 = arith.constant 0 : index
    %c0_5 = arith.constant 0 : index
    %5 = vector.load %arg5[%c0_4, %c0_5] : memref<1x96xf32, #tpu.memory_space<vmem>>, vector<1x96xf32>
    %6 = vector.broadcast %5 : vector<1x96xf32> to vector<8x96xf32>
    %7 = arith.addf %4, %6 : vector<8x96xf32>
    %8 = vector.extract_strided_slice %7 {offsets = [0, 0], sizes = [8, 32], strides = [1, 1]} : vector<8x96xf32> to vector<8x32xf32>
    %9 = vector.extract_strided_slice %7 {offsets = [0, 32], sizes = [8, 32], strides = [1, 1]} : vector<8x96xf32> to vector<8x32xf32>
    %10 = vector.extract_strided_slice %7 {offsets = [0, 64], sizes = [8, 32], strides = [1, 1]} : vector<8x96xf32> to vector<8x32xf32>
    %c0_6 = arith.constant 0 : index
    %c0_7 = arith.constant 0 : index
    %c0_8 = arith.constant 0 : index
    %11 = vector.load %arg3[%c0_6, %c0_7, %c0_8] : memref<1x1x8xf32, #tpu.memory_space<vmem>>, vector<1x1x8xf32>
    %12 = vector.shape_cast %11 : vector<1x1x8xf32> to vector<1x8xf32>
    %cst_9 = arith.constant 5.000000e-01 : f32
    %13 = vector.broadcast %cst_9 : f32 to vector<1x8xf32>
    %14 = arith.cmpf ogt, %12, %13 : vector<1x8xf32>
    %15 = tpu.iota {dimensions = array<i32: 0>} : vector<8x8xi32>
    %16 = tpu.iota {dimensions = array<i32: 1>} : vector<8x8xi32>
    %17 = arith.cmpi sgt, %16, %15 : vector<8x8xi32>
    %18 = vector.broadcast %14 : vector<1x8xi1> to vector<8x8xi1>
    %19 = arith.ori %18, %17 : vector<8x8xi1>
    %20 = arith.truncf %8 : vector<8x32xf32> to vector<8x32xbf16>
    %21 = arith.truncf %9 : vector<8x32xf32> to vector<8x32xbf16>
    %22 = arith.truncf %10 : vector<8x32xf32> to vector<8x32xbf16>
    %23 = vector.extract_strided_slice %20 {offsets = [0, 0], sizes = [8, 8], strides = [1, 1]} : vector<8x32xbf16> to vector<8x8xbf16>
    %24 = vector.extract_strided_slice %21 {offsets = [0, 0], sizes = [8, 8], strides = [1, 1]} : vector<8x32xbf16> to vector<8x8xbf16>
    "tpu.trace_start"() <{level = 10 : i32, message = "qd,kd->qk"}> : () -> ()
    %cst_10 = arith.constant dense<0.000000e+00> : vector<8x8xf32>
    %25 = tpu.matmul %23, %24, %cst_10 {dimension_numbers = #tpu.dot_dimension_numbers<[1], [1], [0], [0], [0, 0, 1, 0], [], []>} : vector<8x8xbf16>, vector<8x8xbf16>, vector<8x8xf32> -> vector<8x8xf32>
    "tpu.trace_stop"() : () -> ()
    %cst_11 = arith.constant 0.353553385 : f32
    %26 = vector.broadcast %cst_11 : f32 to vector<8x8xf32>
    %27 = arith.mulf %25, %26 : vector<8x8xf32>
    %cst_12 = arith.constant -1.000000e+09 : f32
    %28 = vector.broadcast %cst_12 : f32 to vector<8x8xf32>
    %29 = arith.select %19, %28, %27 : vector<8x8xi1>, vector<8x8xf32>
    %cst_13 = arith.constant dense<0xFF800000> : vector<8xf32>
    %30 = vector.multi_reduction <maximumf>, %29, %cst_13 [1] : vector<8x8xf32> to vector<8xf32>
    %31 = vector.shape_cast %30 : vector<8xf32> to vector<8x1xf32>
    %32 = vector.broadcast %31 : vector<8x1xf32> to vector<8x8xf32>
    %33 = arith.subf %29, %32 : vector<8x8xf32>
    %34 = math.exp %33 : vector<8x8xf32>
    %cst_14 = arith.constant dense<0.000000e+00> : vector<8xf32>
    %35 = vector.multi_reduction <add>, %34, %cst_14 [1] : vector<8x8xf32> to vector<8xf32>
    %36 = vector.shape_cast %35 : vector<8xf32> to vector<8x1xf32>
    %37 = tpu.reciprocal %36 {approx = true} : vector<8x1xf32> -> vector<8x1xf32>
    %38 = vector.broadcast %37 : vector<8x1xf32> to vector<8x8xf32>
    %39 = arith.mulf %34, %38 : vector<8x8xf32>
    %40 = arith.truncf %39 : vector<8x8xf32> to vector<8x8xbf16>
    %41 = vector.extract_strided_slice %22 {offsets = [0, 0], sizes = [8, 8], strides = [1, 1]} : vector<8x32xbf16> to vector<8x8xbf16>
    %cst_15 = arith.constant dense<0.000000e+00> : vector<8x8xf32>
    %42 = tpu.matmul %40, %41, %cst_15 {dimension_numbers = #tpu.dot_dimension_numbers<[1], [0], [0], [1], [0, 0, 1, 1], [], []>} : vector<8x8xbf16>, vector<8x8xbf16>, vector<8x8xf32> -> vector<8x8xf32>
    %43 = vector.extract_strided_slice %20 {offsets = [0, 8], sizes = [8, 8], strides = [1, 1]} : vector<8x32xbf16> to vector<8x8xbf16>
    %44 = vector.extract_strided_slice %21 {offsets = [0, 8], sizes = [8, 8], strides = [1, 1]} : vector<8x32xbf16> to vector<8x8xbf16>
    "tpu.trace_start"() <{level = 10 : i32, message = "qd,kd->qk"}> : () -> ()
    %cst_16 = arith.constant dense<0.000000e+00> : vector<8x8xf32>
    %45 = tpu.matmul %43, %44, %cst_16 {dimension_numbers = #tpu.dot_dimension_numbers<[1], [1], [0], [0], [0, 0, 1, 0], [], []>} : vector<8x8xbf16>, vector<8x8xbf16>, vector<8x8xf32> -> vector<8x8xf32>
    "tpu.trace_stop"() : () -> ()
    %cst_17 = arith.constant 0.353553385 : f32
    %46 = vector.broadcast %cst_17 : f32 to vector<8x8xf32>
    %47 = arith.mulf %45, %46 : vector<8x8xf32>
    %cst_18 = arith.constant -1.000000e+09 : f32
    %48 = vector.broadcast %cst_18 : f32 to vector<8x8xf32>
    %49 = arith.select %19, %48, %47 : vector<8x8xi1>, vector<8x8xf32>
    %cst_19 = arith.constant dense<0xFF800000> : vector<8xf32>
    %50 = vector.multi_reduction <maximumf>, %49, %cst_19 [1] : vector<8x8xf32> to vector<8xf32>
    %51 = vector.shape_cast %50 : vector<8xf32> to vector<8x1xf32>
    %52 = vector.broadcast %51 : vector<8x1xf32> to vector<8x8xf32>
    %53 = arith.subf %49, %52 : vector<8x8xf32>
    %54 = math.exp %53 : vector<8x8xf32>
    %cst_20 = arith.constant dense<0.000000e+00> : vector<8xf32>
    %55 = vector.multi_reduction <add>, %54, %cst_20 [1] : vector<8x8xf32> to vector<8xf32>
    %56 = vector.shape_cast %55 : vector<8xf32> to vector<8x1xf32>
    %57 = tpu.reciprocal %56 {approx = true} : vector<8x1xf32> -> vector<8x1xf32>
    %58 = vector.broadcast %57 : vector<8x1xf32> to vector<8x8xf32>
    %59 = arith.mulf %54, %58 : vector<8x8xf32>
    %60 = arith.truncf %59 : vector<8x8xf32> to vector<8x8xbf16>
    %61 = vector.extract_strided_slice %22 {offsets = [0, 8], sizes = [8, 8], strides = [1, 1]} : vector<8x32xbf16> to vector<8x8xbf16>
    %cst_21 = arith.constant dense<0.000000e+00> : vector<8x8xf32>
    %62 = tpu.matmul %60, %61, %cst_21 {dimension_numbers = #tpu.dot_dimension_numbers<[1], [0], [0], [1], [0, 0, 1, 1], [], []>} : vector<8x8xbf16>, vector<8x8xbf16>, vector<8x8xf32> -> vector<8x8xf32>
    %63 = vector.extract_strided_slice %20 {offsets = [0, 16], sizes = [8, 8], strides = [1, 1]} : vector<8x32xbf16> to vector<8x8xbf16>
    %64 = vector.extract_strided_slice %21 {offsets = [0, 16], sizes = [8, 8], strides = [1, 1]} : vector<8x32xbf16> to vector<8x8xbf16>
    "tpu.trace_start"() <{level = 10 : i32, message = "qd,kd->qk"}> : () -> ()
    %cst_22 = arith.constant dense<0.000000e+00> : vector<8x8xf32>
    %65 = tpu.matmul %63, %64, %cst_22 {dimension_numbers = #tpu.dot_dimension_numbers<[1], [1], [0], [0], [0, 0, 1, 0], [], []>} : vector<8x8xbf16>, vector<8x8xbf16>, vector<8x8xf32> -> vector<8x8xf32>
    "tpu.trace_stop"() : () -> ()
    %cst_23 = arith.constant 0.353553385 : f32
    %66 = vector.broadcast %cst_23 : f32 to vector<8x8xf32>
    %67 = arith.mulf %65, %66 : vector<8x8xf32>
    %cst_24 = arith.constant -1.000000e+09 : f32
    %68 = vector.broadcast %cst_24 : f32 to vector<8x8xf32>
    %69 = arith.select %19, %68, %67 : vector<8x8xi1>, vector<8x8xf32>
    %cst_25 = arith.constant dense<0xFF800000> : vector<8xf32>
    %70 = vector.multi_reduction <maximumf>, %69, %cst_25 [1] : vector<8x8xf32> to vector<8xf32>
    %71 = vector.shape_cast %70 : vector<8xf32> to vector<8x1xf32>
    %72 = vector.broadcast %71 : vector<8x1xf32> to vector<8x8xf32>
    %73 = arith.subf %69, %72 : vector<8x8xf32>
    %74 = math.exp %73 : vector<8x8xf32>
    %cst_26 = arith.constant dense<0.000000e+00> : vector<8xf32>
    %75 = vector.multi_reduction <add>, %74, %cst_26 [1] : vector<8x8xf32> to vector<8xf32>
    %76 = vector.shape_cast %75 : vector<8xf32> to vector<8x1xf32>
    %77 = tpu.reciprocal %76 {approx = true} : vector<8x1xf32> -> vector<8x1xf32>
    %78 = vector.broadcast %77 : vector<8x1xf32> to vector<8x8xf32>
    %79 = arith.mulf %74, %78 : vector<8x8xf32>
    %80 = arith.truncf %79 : vector<8x8xf32> to vector<8x8xbf16>
    %81 = vector.extract_strided_slice %22 {offsets = [0, 16], sizes = [8, 8], strides = [1, 1]} : vector<8x32xbf16> to vector<8x8xbf16>
    %cst_27 = arith.constant dense<0.000000e+00> : vector<8x8xf32>
    %82 = tpu.matmul %80, %81, %cst_27 {dimension_numbers = #tpu.dot_dimension_numbers<[1], [0], [0], [1], [0, 0, 1, 1], [], []>} : vector<8x8xbf16>, vector<8x8xbf16>, vector<8x8xf32> -> vector<8x8xf32>
    %83 = vector.extract_strided_slice %20 {offsets = [0, 24], sizes = [8, 8], strides = [1, 1]} : vector<8x32xbf16> to vector<8x8xbf16>
    %84 = vector.extract_strided_slice %21 {offsets = [0, 24], sizes = [8, 8], strides = [1, 1]} : vector<8x32xbf16> to vector<8x8xbf16>
    "tpu.trace_start"() <{level = 10 : i32, message = "qd,kd->qk"}> : () -> ()
    %cst_28 = arith.constant dense<0.000000e+00> : vector<8x8xf32>
    %85 = tpu.matmul %83, %84, %cst_28 {dimension_numbers = #tpu.dot_dimension_numbers<[1], [1], [0], [0], [0, 0, 1, 0], [], []>} : vector<8x8xbf16>, vector<8x8xbf16>, vector<8x8xf32> -> vector<8x8xf32>
    "tpu.trace_stop"() : () -> ()
    %cst_29 = arith.constant 0.353553385 : f32
    %86 = vector.broadcast %cst_29 : f32 to vector<8x8xf32>
    %87 = arith.mulf %85, %86 : vector<8x8xf32>
    %cst_30 = arith.constant -1.000000e+09 : f32
    %88 = vector.broadcast %cst_30 : f32 to vector<8x8xf32>
    %89 = arith.select %19, %88, %87 : vector<8x8xi1>, vector<8x8xf32>
    %cst_31 = arith.constant dense<0xFF800000> : vector<8xf32>
    %90 = vector.multi_reduction <maximumf>, %89, %cst_31 [1] : vector<8x8xf32> to vector<8xf32>
    %91 = vector.shape_cast %90 : vector<8xf32> to vector<8x1xf32>
    %92 = vector.broadcast %91 : vector<8x1xf32> to vector<8x8xf32>
    %93 = arith.subf %89, %92 : vector<8x8xf32>
    %94 = math.exp %93 : vector<8x8xf32>
    %cst_32 = arith.constant dense<0.000000e+00> : vector<8xf32>
    %95 = vector.multi_reduction <add>, %94, %cst_32 [1] : vector<8x8xf32> to vector<8xf32>
    %96 = vector.shape_cast %95 : vector<8xf32> to vector<8x1xf32>
    %97 = tpu.reciprocal %96 {approx = true} : vector<8x1xf32> -> vector<8x1xf32>
    %98 = vector.broadcast %97 : vector<8x1xf32> to vector<8x8xf32>
    %99 = arith.mulf %94, %98 : vector<8x8xf32>
    %100 = arith.truncf %99 : vector<8x8xf32> to vector<8x8xbf16>
    %101 = vector.extract_strided_slice %22 {offsets = [0, 24], sizes = [8, 8], strides = [1, 1]} : vector<8x32xbf16> to vector<8x8xbf16>
    %cst_33 = arith.constant dense<0.000000e+00> : vector<8x8xf32>
    %102 = tpu.matmul %100, %101, %cst_33 {dimension_numbers = #tpu.dot_dimension_numbers<[1], [0], [0], [1], [0, 0, 1, 1], [], []>} : vector<8x8xbf16>, vector<8x8xbf16>, vector<8x8xf32> -> vector<8x8xf32>
    %103 = tpu.concatenate %42, %62, %82, %102 in 1 : vector<8x8xf32>, vector<8x8xf32>, vector<8x8xf32>, vector<8x8xf32> -> vector<8x32xf32>
    %104 = arith.truncf %103 : vector<8x32xf32> to vector<8x32xbf16>
    %c0_34 = arith.constant 0 : index
    %c0_35 = arith.constant 0 : index
    %105 = vector.load %arg6[%c0_34, %c0_35] : memref<32x32xbf16, #tpu.memory_space<vmem>>, vector<32x32xbf16>
    %cst_36 = arith.constant dense<0.000000e+00> : vector<8x32xf32>
    %106 = tpu.matmul %104, %105, %cst_36 {dimension_numbers = #tpu.dot_dimension_numbers<[1], [0], [0], [1], [0, 0, 1, 1], [], []>} : vector<8x32xbf16>, vector<32x32xbf16>, vector<8x32xf32> -> vector<8x32xf32>
    %c0_37 = arith.constant 0 : index
    %c0_38 = arith.constant 0 : index
    %107 = vector.load %arg7[%c0_37, %c0_38] : memref<1x32xf32, #tpu.memory_space<vmem>>, vector<1x32xf32>
    %108 = vector.broadcast %107 : vector<1x32xf32> to vector<8x32xf32>
    %109 = arith.addf %106, %108 : vector<8x32xf32>
    %110 = arith.addf %1, %109 : vector<8x32xf32>
    %cst_39 = arith.constant dense<0.000000e+00> : vector<8xf32>
    %111 = vector.multi_reduction <add>, %110, %cst_39 [1] : vector<8x32xf32> to vector<8xf32>
    %112 = vector.shape_cast %111 : vector<8xf32> to vector<8x1xf32>
    %cst_40 = arith.constant 3.200000e+01 : f32
    %113 = vector.broadcast %cst_40 : f32 to vector<8x1xf32>
    %114 = arith.divf %112, %113 : vector<8x1xf32>
    %115 = vector.broadcast %114 : vector<8x1xf32> to vector<8x32xf32>
    %116 = arith.subf %110, %115 : vector<8x32xf32>
    %117 = arith.mulf %116, %116 : vector<8x32xf32>
    %cst_41 = arith.constant dense<0.000000e+00> : vector<8xf32>
    %118 = vector.multi_reduction <add>, %117, %cst_41 [1] : vector<8x32xf32> to vector<8xf32>
    %119 = vector.shape_cast %118 : vector<8xf32> to vector<8x1xf32>
    %cst_42 = arith.constant 3.200000e+01 : f32
    %120 = vector.broadcast %cst_42 : f32 to vector<8x1xf32>
    %121 = arith.divf %119, %120 : vector<8x1xf32>
    %122 = vector.broadcast %114 : vector<8x1xf32> to vector<8x32xf32>
    %123 = arith.subf %110, %122 : vector<8x32xf32>
    %cst_43 = arith.constant 9.99999974E-6 : f32
    %124 = vector.broadcast %cst_43 : f32 to vector<8x1xf32>
    %125 = arith.addf %121, %124 : vector<8x1xf32>
    %126 = math.rsqrt %125 : vector<8x1xf32>
    %127 = vector.broadcast %126 : vector<8x1xf32> to vector<8x32xf32>
    %128 = arith.mulf %123, %127 : vector<8x32xf32>
    %c0_44 = arith.constant 0 : index
    %c0_45 = arith.constant 0 : index
    %129 = vector.load %arg8[%c0_44, %c0_45] : memref<1x32xf32, #tpu.memory_space<vmem>>, vector<1x32xf32>
    %130 = vector.broadcast %129 : vector<1x32xf32> to vector<8x32xf32>
    %131 = arith.mulf %128, %130 : vector<8x32xf32>
    %c0_46 = arith.constant 0 : index
    %c0_47 = arith.constant 0 : index
    %132 = vector.load %arg9[%c0_46, %c0_47] : memref<1x32xf32, #tpu.memory_space<vmem>>, vector<1x32xf32>
    %133 = vector.broadcast %132 : vector<1x32xf32> to vector<8x32xf32>
    %134 = arith.addf %131, %133 : vector<8x32xf32>
    %c0_48 = arith.constant 0 : index
    %c0_49 = arith.constant 0 : index
    %c0_50 = arith.constant 0 : index
    %135 = vector.load %arg10[%c0_48, %c0_49, %c0_50] : memref<1x8x32xf32, #tpu.memory_space<vmem>>, vector<1x8x32xf32>
    %136 = vector.shape_cast %135 : vector<1x8x32xf32> to vector<8x32xf32>
    %137 = vector.shape_cast %134 : vector<8x32xf32> to vector<1x8x32xf32>
    tpu.vector_store %arg10[%c0_48, %c0_49, %c0_50], %137 {strides = array<i32>} : memref<1x8x32xf32, #tpu.memory_space<vmem>>, vector<1x8x32xf32>,
    return
  }
  func.func @transform_0(%arg0: i32) -> (i32, i32, i32) {
    %c0_i32 = arith.constant 0 : i32
    %c0_i32_0 = arith.constant 0 : i32
    %c0_i32_1 = arith.constant 0 : i32
    return %arg0, %c0_i32, %c0_i32_0 : i32, i32, i32
  }
  func.func @transform_1(%arg0: i32) -> (i32, i32, i32) {
    %c0_i32 = arith.constant 0 : i32
    %c0_i32_0 = arith.constant 0 : i32
    %c0_i32_1 = arith.constant 0 : i32
    return %arg0, %c0_i32, %c0_i32_0 : i32, i32, i32
  }
  func.func @transform_2(%arg0: i32) -> (i32, i32, i32) {
    %c0_i32 = arith.constant 0 : i32
    %c0_i32_0 = arith.constant 0 : i32
    %c0_i32_1 = arith.constant 0 : i32
    return %arg0, %c0_i32, %c0_i32_0 : i32, i32, i32
  }
  func.func @transform_3(%arg0: i32) -> (i32, i32) {
    %c0_i32 = arith.constant 0 : i32
    %c0_i32_0 = arith.constant 0 : i32
    %c0_i32_1 = arith.constant 0 : i32
    return %c0_i32, %c0_i32_0 : i32, i32
  }
  func.func @transform_4(%arg0: i32) -> (i32, i32) {
    %c0_i32 = arith.constant 0 : i32
    %c0_i32_0 = arith.constant 0 : i32
    %c0_i32_1 = arith.constant 0 : i32
    return %c0_i32, %c0_i32_0 : i32, i32
  }
  func.func @transform_5(%arg0: i32) -> (i32, i32) {
    %c0_i32 = arith.constant 0 : i32
    %c0_i32_0 = arith.constant 0 : i32
    %c0_i32_1 = arith.constant 0 : i32
    return %c0_i32, %c0_i32_0 : i32, i32
  }
  func.func @transform_6(%arg0: i32) -> (i32, i32) {
    %c0_i32 = arith.constant 0 : i32
    %c0_i32_0 = arith.constant 0 : i32
    %c0_i32_1 = arith.constant 0 : i32
    return %c0_i32, %c0_i32_0 : i32, i32
  }
  func.func @transform_7(%arg0: i32) -> (i32, i32) {
    %c0_i32 = arith.constant 0 : i32
    %c0_i32_0 = arith.constant 0 : i32
    %c0_i32_1 = arith.constant 0 : i32
    return %c0_i32, %c0_i32_0 : i32, i32
  }
  func.func @transform_8(%arg0: i32) -> (i32, i32) {
    %c0_i32 = arith.constant 0 : i32
    %c0_i32_0 = arith.constant 0 : i32
    %c0_i32_1 = arith.constant 0 : i32
    return %c0_i32, %c0_i32_0 : i32, i32
  }
  func.func @transform_9(%arg0: i32) -> (i32, i32, i32) {
    %c0_i32 = arith.constant 0 : i32
    %c0_i32_0 = arith.constant 0 : i32
    %c0_i32_1 = arith.constant 0 : i32
    return %arg0, %c0_i32, %c0_i32_0 : i32, i32, i32
  }
}

module attributes {stable_mosaic.version = 11 : i64} {
  func.func @_ffn_ln_kernel(%arg0: i32, %arg1: memref<16x32xf32, #tpu.memory_space<vmem>>, %arg2: memref<32x64xbf16, #tpu.memory_space<vmem>>, %arg3: memref<1x64xf32, #tpu.memory_space<vmem>>, %arg4: memref<64x32xbf16, #tpu.memory_space<vmem>>, %arg5: memref<1x32xf32, #tpu.memory_space<vmem>>, %arg6: memref<1x32xf32, #tpu.memory_space<vmem>>, %arg7: memref<1x32xf32, #tpu.memory_space<vmem>>, %arg8: memref<16x32xf32, #tpu.memory_space<vmem>>) attributes {dimension_semantics = [#tpu.dimension_semantics<parallel>], iteration_bounds = array<i64: 1>, scalar_prefetch = 0 : i64, scratch_operands = 0 : i64, tpu.core_type = #tpu.core_type<tc>, window_params = [{transform_indices = @transform_0, window_bounds = array<i64: 16, 32>}, {pipeline_mode = #tpu.pipeline_mode<synchronous>, transform_indices = @transform_1, window_bounds = array<i64: 32, 64>}, {pipeline_mode = #tpu.pipeline_mode<synchronous>, transform_indices = @transform_2, window_bounds = array<i64: 1, 64>}, {pipeline_mode = #tpu.pipeline_mode<synchronous>, transform_indices = @transform_3, window_bounds = array<i64: 64, 32>}, {pipeline_mode = #tpu.pipeline_mode<synchronous>, transform_indices = @transform_4, window_bounds = array<i64: 1, 32>}, {pipeline_mode = #tpu.pipeline_mode<synchronous>, transform_indices = @transform_5, window_bounds = array<i64: 1, 32>}, {pipeline_mode = #tpu.pipeline_mode<synchronous>, transform_indices = @transform_6, window_bounds = array<i64: 1, 32>}, {transform_indices = @transform_7, window_bounds = array<i64: 16, 32>}]} {
    %c0 = arith.constant 0 : index
    %c0_0 = arith.constant 0 : index
    %0 = vector.load %arg1[%c0, %c0_0] : memref<16x32xf32, #tpu.memory_space<vmem>>, vector<16x32xf32>
    %1 = arith.truncf %0 : vector<16x32xf32> to vector<16x32xbf16>
    %c0_1 = arith.constant 0 : index
    %c0_2 = arith.constant 0 : index
    %2 = vector.load %arg2[%c0_1, %c0_2] : memref<32x64xbf16, #tpu.memory_space<vmem>>, vector<32x64xbf16>
    %cst = arith.constant dense<0.000000e+00> : vector<16x64xf32>
    %3 = tpu.matmul %1, %2, %cst {dimension_numbers = #tpu.dot_dimension_numbers<[1], [0], [0], [1], [0, 0, 1, 1], [], []>} : vector<16x32xbf16>, vector<32x64xbf16>, vector<16x64xf32> -> vector<16x64xf32>
    %c0_3 = arith.constant 0 : index
    %c0_4 = arith.constant 0 : index
    %4 = vector.load %arg3[%c0_3, %c0_4] : memref<1x64xf32, #tpu.memory_space<vmem>>, vector<1x64xf32>
    %5 = vector.broadcast %4 : vector<1x64xf32> to vector<16x64xf32>
    %6 = arith.addf %3, %5 : vector<16x64xf32>
    %cst_5 = arith.constant 0.000000e+00 : f32
    %7 = vector.broadcast %cst_5 : f32 to vector<16x64xf32>
    %8 = arith.maximumf %6, %7 : vector<16x64xf32>
    %9 = arith.truncf %8 : vector<16x64xf32> to vector<16x64xbf16>
    %c0_6 = arith.constant 0 : index
    %c0_7 = arith.constant 0 : index
    %10 = vector.load %arg4[%c0_6, %c0_7] : memref<64x32xbf16, #tpu.memory_space<vmem>>, vector<64x32xbf16>
    %cst_8 = arith.constant dense<0.000000e+00> : vector<16x32xf32>
    %11 = tpu.matmul %9, %10, %cst_8 {dimension_numbers = #tpu.dot_dimension_numbers<[1], [0], [0], [1], [0, 0, 1, 1], [], []>} : vector<16x64xbf16>, vector<64x32xbf16>, vector<16x32xf32> -> vector<16x32xf32>
    %c0_9 = arith.constant 0 : index
    %c0_10 = arith.constant 0 : index
    %12 = vector.load %arg5[%c0_9, %c0_10] : memref<1x32xf32, #tpu.memory_space<vmem>>, vector<1x32xf32>
    %13 = vector.broadcast %12 : vector<1x32xf32> to vector<16x32xf32>
    %14 = arith.addf %11, %13 : vector<16x32xf32>
    %15 = arith.addf %0, %14 : vector<16x32xf32>
    %cst_11 = arith.constant dense<0.000000e+00> : vector<16xf32>
    %16 = vector.multi_reduction <add>, %15, %cst_11 [1] : vector<16x32xf32> to vector<16xf32>
    %17 = vector.shape_cast %16 : vector<16xf32> to vector<16x1xf32>
    %cst_12 = arith.constant 3.200000e+01 : f32
    %18 = vector.broadcast %cst_12 : f32 to vector<16x1xf32>
    %19 = arith.divf %17, %18 : vector<16x1xf32>
    %20 = vector.broadcast %19 : vector<16x1xf32> to vector<16x32xf32>
    %21 = arith.subf %15, %20 : vector<16x32xf32>
    %22 = arith.mulf %21, %21 : vector<16x32xf32>
    %cst_13 = arith.constant dense<0.000000e+00> : vector<16xf32>
    %23 = vector.multi_reduction <add>, %22, %cst_13 [1] : vector<16x32xf32> to vector<16xf32>
    %24 = vector.shape_cast %23 : vector<16xf32> to vector<16x1xf32>
    %cst_14 = arith.constant 3.200000e+01 : f32
    %25 = vector.broadcast %cst_14 : f32 to vector<16x1xf32>
    %26 = arith.divf %24, %25 : vector<16x1xf32>
    %27 = vector.broadcast %19 : vector<16x1xf32> to vector<16x32xf32>
    %28 = arith.subf %15, %27 : vector<16x32xf32>
    %cst_15 = arith.constant 9.99999974E-6 : f32
    %29 = vector.broadcast %cst_15 : f32 to vector<16x1xf32>
    %30 = arith.addf %26, %29 : vector<16x1xf32>
    %31 = math.rsqrt %30 : vector<16x1xf32>
    %32 = vector.broadcast %31 : vector<16x1xf32> to vector<16x32xf32>
    %33 = arith.mulf %28, %32 : vector<16x32xf32>
    %c0_16 = arith.constant 0 : index
    %c0_17 = arith.constant 0 : index
    %34 = vector.load %arg6[%c0_16, %c0_17] : memref<1x32xf32, #tpu.memory_space<vmem>>, vector<1x32xf32>
    %35 = vector.broadcast %34 : vector<1x32xf32> to vector<16x32xf32>
    %36 = arith.mulf %33, %35 : vector<16x32xf32>
    %c0_18 = arith.constant 0 : index
    %c0_19 = arith.constant 0 : index
    %37 = vector.load %arg7[%c0_18, %c0_19] : memref<1x32xf32, #tpu.memory_space<vmem>>, vector<1x32xf32>
    %38 = vector.broadcast %37 : vector<1x32xf32> to vector<16x32xf32>
    %39 = arith.addf %36, %38 : vector<16x32xf32>
    %c0_20 = arith.constant 0 : index
    %c0_21 = arith.constant 0 : index
    %40 = vector.load %arg8[%c0_20, %c0_21] : memref<16x32xf32, #tpu.memory_space<vmem>>, vector<16x32xf32>
    tpu.vector_store %arg8[%c0_20, %c0_21], %39 {strides = array<i32>} : memref<16x32xf32, #tpu.memory_space<vmem>>, vector<16x32xf32>,
    return
  }
  func.func @transform_0(%arg0: i32) -> (i32, i32) {
    %c0_i32 = arith.constant 0 : i32
    %c0_i32_0 = arith.constant 0 : i32
    return %arg0, %c0_i32 : i32, i32
  }
  func.func @transform_1(%arg0: i32) -> (i32, i32) {
    %c0_i32 = arith.constant 0 : i32
    %c0_i32_0 = arith.constant 0 : i32
    %c0_i32_1 = arith.constant 0 : i32
    return %c0_i32, %c0_i32_0 : i32, i32
  }
  func.func @transform_2(%arg0: i32) -> (i32, i32) {
    %c0_i32 = arith.constant 0 : i32
    %c0_i32_0 = arith.constant 0 : i32
    %c0_i32_1 = arith.constant 0 : i32
    return %c0_i32, %c0_i32_0 : i32, i32
  }
  func.func @transform_3(%arg0: i32) -> (i32, i32) {
    %c0_i32 = arith.constant 0 : i32
    %c0_i32_0 = arith.constant 0 : i32
    %c0_i32_1 = arith.constant 0 : i32
    return %c0_i32, %c0_i32_0 : i32, i32
  }
  func.func @transform_4(%arg0: i32) -> (i32, i32) {
    %c0_i32 = arith.constant 0 : i32
    %c0_i32_0 = arith.constant 0 : i32
    %c0_i32_1 = arith.constant 0 : i32
    return %c0_i32, %c0_i32_0 : i32, i32
  }
  func.func @transform_5(%arg0: i32) -> (i32, i32) {
    %c0_i32 = arith.constant 0 : i32
    %c0_i32_0 = arith.constant 0 : i32
    %c0_i32_1 = arith.constant 0 : i32
    return %c0_i32, %c0_i32_0 : i32, i32
  }
  func.func @transform_6(%arg0: i32) -> (i32, i32) {
    %c0_i32 = arith.constant 0 : i32
    %c0_i32_0 = arith.constant 0 : i32
    %c0_i32_1 = arith.constant 0 : i32
    return %c0_i32, %c0_i32_0 : i32, i32
  }
  func.func @transform_7(%arg0: i32) -> (i32, i32) {
    %c0_i32 = arith.constant 0 : i32
    %c0_i32_0 = arith.constant 0 : i32
    return %arg0, %c0_i32 : i32, i32
  }
}

module attributes {stable_mosaic.version = 11 : i64} {
  func.func @_fused_mha_kernel(%arg0: i32, %arg1: memref<1x8x32xf32, #tpu.memory_space<vmem>>, %arg2: memref<1x8x32xf32, #tpu.memory_space<vmem>>, %arg3: memref<1x1x8xf32, #tpu.memory_space<vmem>>, %arg4: memref<32x96xbf16, #tpu.memory_space<vmem>>, %arg5: memref<1x96xf32, #tpu.memory_space<vmem>>, %arg6: memref<32x32xbf16, #tpu.memory_space<vmem>>, %arg7: memref<1x32xf32, #tpu.memory_space<vmem>>, %arg8: memref<1x32xf32, #tpu.memory_space<vmem>>, %arg9: memref<1x32xf32, #tpu.memory_space<vmem>>, %arg10: memref<1x8x32xf32, #tpu.memory_space<vmem>>) attributes {dimension_semantics = [#tpu.dimension_semantics<parallel>], iteration_bounds = array<i64: 2>, scalar_prefetch = 0 : i64, scratch_operands = 0 : i64, tpu.core_type = #tpu.core_type<tc>, window_params = [{transform_indices = @transform_0, window_bounds = array<i64: 1, 8, 32>}, {transform_indices = @transform_1, window_bounds = array<i64: 1, 8, 32>}, {transform_indices = @transform_2, window_bounds = array<i64: 1, 1, 8>}, {pipeline_mode = #tpu.pipeline_mode<synchronous>, transform_indices = @transform_3, window_bounds = array<i64: 32, 96>}, {pipeline_mode = #tpu.pipeline_mode<synchronous>, transform_indices = @transform_4, window_bounds = array<i64: 1, 96>}, {pipeline_mode = #tpu.pipeline_mode<synchronous>, transform_indices = @transform_5, window_bounds = array<i64: 32, 32>}, {pipeline_mode = #tpu.pipeline_mode<synchronous>, transform_indices = @transform_6, window_bounds = array<i64: 1, 32>}, {pipeline_mode = #tpu.pipeline_mode<synchronous>, transform_indices = @transform_7, window_bounds = array<i64: 1, 32>}, {pipeline_mode = #tpu.pipeline_mode<synchronous>, transform_indices = @transform_8, window_bounds = array<i64: 1, 32>}, {transform_indices = @transform_9, window_bounds = array<i64: 1, 8, 32>}]} {
    %c0 = arith.constant 0 : index
    %c0_0 = arith.constant 0 : index
    %c0_1 = arith.constant 0 : index
    %0 = vector.load %arg1[%c0, %c0_0, %c0_1] : memref<1x8x32xf32, #tpu.memory_space<vmem>>, vector<1x8x32xf32>
    %1 = vector.shape_cast %0 : vector<1x8x32xf32> to vector<8x32xf32>
    %2 = arith.truncf %1 : vector<8x32xf32> to vector<8x32xbf16>
    %c0_2 = arith.constant 0 : index
    %c0_3 = arith.constant 0 : index
    %c0_4 = arith.constant 0 : index
    %3 = vector.load %arg2[%c0_2, %c0_3, %c0_4] : memref<1x8x32xf32, #tpu.memory_space<vmem>>, vector<1x8x32xf32>
    %4 = vector.shape_cast %3 : vector<1x8x32xf32> to vector<8x32xf32>
    %5 = arith.truncf %4 : vector<8x32xf32> to vector<8x32xbf16>
    %c0_5 = arith.constant 0 : index
    %c0_6 = arith.constant 0 : index
    %6 = vector.load %arg4[%c0_5, %c0_6] : memref<32x96xbf16, #tpu.memory_space<vmem>>, vector<32x32xbf16>
    %cst = arith.constant dense<0.000000e+00> : vector<8x32xf32>
    %7 = tpu.matmul %2, %6, %cst {dimension_numbers = #tpu.dot_dimension_numbers<[1], [0], [0], [1], [0, 0, 1, 1], [], []>} : vector<8x32xbf16>, vector<32x32xbf16>, vector<8x32xf32> -> vector<8x32xf32>
    %c0_7 = arith.constant 0 : index
    %c0_8 = arith.constant 0 : index
    %8 = vector.load %arg5[%c0_7, %c0_8] : memref<1x96xf32, #tpu.memory_space<vmem>>, vector<1x32xf32>
    %9 = vector.broadcast %8 : vector<1x32xf32> to vector<8x32xf32>
    %10 = arith.addf %7, %9 : vector<8x32xf32>
    %c0_9 = arith.constant 0 : index
    %c32 = arith.constant 32 : index
    %11 = vector.load %arg4[%c0_9, %c32] : memref<32x96xbf16, #tpu.memory_space<vmem>>, vector<32x32xbf16>
    %cst_10 = arith.constant dense<0.000000e+00> : vector<8x32xf32>
    %12 = tpu.matmul %5, %11, %cst_10 {dimension_numbers = #tpu.dot_dimension_numbers<[1], [0], [0], [1], [0, 0, 1, 1], [], []>} : vector<8x32xbf16>, vector<32x32xbf16>, vector<8x32xf32> -> vector<8x32xf32>
    %c0_11 = arith.constant 0 : index
    %c32_12 = arith.constant 32 : index
    %13 = vector.load %arg5[%c0_11, %c32_12] : memref<1x96xf32, #tpu.memory_space<vmem>>, vector<1x32xf32>
    %14 = vector.broadcast %13 : vector<1x32xf32> to vector<8x32xf32>
    %15 = arith.addf %12, %14 : vector<8x32xf32>
    %c0_13 = arith.constant 0 : index
    %c64 = arith.constant 64 : index
    %16 = vector.load %arg4[%c0_13, %c64] : memref<32x96xbf16, #tpu.memory_space<vmem>>, vector<32x32xbf16>
    %cst_14 = arith.constant dense<0.000000e+00> : vector<8x32xf32>
    %17 = tpu.matmul %5, %16, %cst_14 {dimension_numbers = #tpu.dot_dimension_numbers<[1], [0], [0], [1], [0, 0, 1, 1], [], []>} : vector<8x32xbf16>, vector<32x32xbf16>, vector<8x32xf32> -> vector<8x32xf32>
    %c0_15 = arith.constant 0 : index
    %c64_16 = arith.constant 64 : index
    %18 = vector.load %arg5[%c0_15, %c64_16] : memref<1x96xf32, #tpu.memory_space<vmem>>, vector<1x32xf32>
    %19 = vector.broadcast %18 : vector<1x32xf32> to vector<8x32xf32>
    %20 = arith.addf %17, %19 : vector<8x32xf32>
    %c0_17 = arith.constant 0 : index
    %c0_18 = arith.constant 0 : index
    %c0_19 = arith.constant 0 : index
    %21 = vector.load %arg3[%c0_17, %c0_18, %c0_19] : memref<1x1x8xf32, #tpu.memory_space<vmem>>, vector<1x1x8xf32>
    %22 = vector.shape_cast %21 : vector<1x1x8xf32> to vector<1x8xf32>
    %cst_20 = arith.constant 5.000000e-01 : f32
    %23 = vector.broadcast %cst_20 : f32 to vector<1x8xf32>
    %24 = arith.cmpf ogt, %22, %23 : vector<1x8xf32>
    %25 = arith.truncf %10 : vector<8x32xf32> to vector<8x32xbf16>
    %26 = arith.truncf %15 : vector<8x32xf32> to vector<8x32xbf16>
    %27 = arith.truncf %20 : vector<8x32xf32> to vector<8x32xbf16>
    %28 = vector.extract_strided_slice %25 {offsets = [0, 0], sizes = [8, 8], strides = [1, 1]} : vector<8x32xbf16> to vector<8x8xbf16>
    %29 = vector.extract_strided_slice %26 {offsets = [0, 0], sizes = [8, 8], strides = [1, 1]} : vector<8x32xbf16> to vector<8x8xbf16>
    "tpu.trace_start"() <{level = 10 : i32, message = "qd,kd->qk"}> : () -> ()
    %cst_21 = arith.constant dense<0.000000e+00> : vector<8x8xf32>
    %30 = tpu.matmul %28, %29, %cst_21 {dimension_numbers = #tpu.dot_dimension_numbers<[1], [1], [0], [0], [0, 0, 1, 0], [], []>} : vector<8x8xbf16>, vector<8x8xbf16>, vector<8x8xf32> -> vector<8x8xf32>
    "tpu.trace_stop"() : () -> ()
    %cst_22 = arith.constant 0.353553385 : f32
    %31 = vector.broadcast %cst_22 : f32 to vector<8x8xf32>
    %32 = arith.mulf %30, %31 : vector<8x8xf32>
    %cst_23 = arith.constant -1.000000e+09 : f32
    %33 = vector.shape_cast %24 : vector<1x8xi1> to vector<1x8xi1>
    %34 = vector.broadcast %33 : vector<1x8xi1> to vector<8x8xi1>
    %35 = vector.broadcast %cst_23 : f32 to vector<8x8xf32>
    %36 = arith.select %34, %35, %32 : vector<8x8xi1>, vector<8x8xf32>
    %cst_24 = arith.constant dense<0xFF800000> : vector<8xf32>
    %37 = vector.multi_reduction <maximumf>, %36, %cst_24 [1] : vector<8x8xf32> to vector<8xf32>
    %38 = vector.shape_cast %37 : vector<8xf32> to vector<8x1xf32>
    %39 = vector.broadcast %38 : vector<8x1xf32> to vector<8x8xf32>
    %40 = arith.subf %36, %39 : vector<8x8xf32>
    %41 = math.exp %40 : vector<8x8xf32>
    %cst_25 = arith.constant dense<0.000000e+00> : vector<8xf32>
    %42 = vector.multi_reduction <add>, %41, %cst_25 [1] : vector<8x8xf32> to vector<8xf32>
    %43 = vector.shape_cast %42 : vector<8xf32> to vector<8x1xf32>
    %44 = tpu.reciprocal %43 {approx = true} : vector<8x1xf32> -> vector<8x1xf32>
    %45 = vector.broadcast %44 : vector<8x1xf32> to vector<8x8xf32>
    %46 = arith.mulf %41, %45 : vector<8x8xf32>
    %47 = arith.truncf %46 : vector<8x8xf32> to vector<8x8xbf16>
    %48 = vector.extract_strided_slice %27 {offsets = [0, 0], sizes = [8, 8], strides = [1, 1]} : vector<8x32xbf16> to vector<8x8xbf16>
    %cst_26 = arith.constant dense<0.000000e+00> : vector<8x8xf32>
    %49 = tpu.matmul %47, %48, %cst_26 {dimension_numbers = #tpu.dot_dimension_numbers<[1], [0], [0], [1], [0, 0, 1, 1], [], []>} : vector<8x8xbf16>, vector<8x8xbf16>, vector<8x8xf32> -> vector<8x8xf32>
    %50 = vector.extract_strided_slice %25 {offsets = [0, 8], sizes = [8, 8], strides = [1, 1]} : vector<8x32xbf16> to vector<8x8xbf16>
    %51 = vector.extract_strided_slice %26 {offsets = [0, 8], sizes = [8, 8], strides = [1, 1]} : vector<8x32xbf16> to vector<8x8xbf16>
    "tpu.trace_start"() <{level = 10 : i32, message = "qd,kd->qk"}> : () -> ()
    %cst_27 = arith.constant dense<0.000000e+00> : vector<8x8xf32>
    %52 = tpu.matmul %50, %51, %cst_27 {dimension_numbers = #tpu.dot_dimension_numbers<[1], [1], [0], [0], [0, 0, 1, 0], [], []>} : vector<8x8xbf16>, vector<8x8xbf16>, vector<8x8xf32> -> vector<8x8xf32>
    "tpu.trace_stop"() : () -> ()
    %cst_28 = arith.constant 0.353553385 : f32
    %53 = vector.broadcast %cst_28 : f32 to vector<8x8xf32>
    %54 = arith.mulf %52, %53 : vector<8x8xf32>
    %cst_29 = arith.constant -1.000000e+09 : f32
    %55 = vector.shape_cast %24 : vector<1x8xi1> to vector<1x8xi1>
    %56 = vector.broadcast %55 : vector<1x8xi1> to vector<8x8xi1>
    %57 = vector.broadcast %cst_29 : f32 to vector<8x8xf32>
    %58 = arith.select %56, %57, %54 : vector<8x8xi1>, vector<8x8xf32>
    %cst_30 = arith.constant dense<0xFF800000> : vector<8xf32>
    %59 = vector.multi_reduction <maximumf>, %58, %cst_30 [1] : vector<8x8xf32> to vector<8xf32>
    %60 = vector.shape_cast %59 : vector<8xf32> to vector<8x1xf32>
    %61 = vector.broadcast %60 : vector<8x1xf32> to vector<8x8xf32>
    %62 = arith.subf %58, %61 : vector<8x8xf32>
    %63 = math.exp %62 : vector<8x8xf32>
    %cst_31 = arith.constant dense<0.000000e+00> : vector<8xf32>
    %64 = vector.multi_reduction <add>, %63, %cst_31 [1] : vector<8x8xf32> to vector<8xf32>
    %65 = vector.shape_cast %64 : vector<8xf32> to vector<8x1xf32>
    %66 = tpu.reciprocal %65 {approx = true} : vector<8x1xf32> -> vector<8x1xf32>
    %67 = vector.broadcast %66 : vector<8x1xf32> to vector<8x8xf32>
    %68 = arith.mulf %63, %67 : vector<8x8xf32>
    %69 = arith.truncf %68 : vector<8x8xf32> to vector<8x8xbf16>
    %70 = vector.extract_strided_slice %27 {offsets = [0, 8], sizes = [8, 8], strides = [1, 1]} : vector<8x32xbf16> to vector<8x8xbf16>
    %cst_32 = arith.constant dense<0.000000e+00> : vector<8x8xf32>
    %71 = tpu.matmul %69, %70, %cst_32 {dimension_numbers = #tpu.dot_dimension_numbers<[1], [0], [0], [1], [0, 0, 1, 1], [], []>} : vector<8x8xbf16>, vector<8x8xbf16>, vector<8x8xf32> -> vector<8x8xf32>
    %72 = vector.extract_strided_slice %25 {offsets = [0, 16], sizes = [8, 8], strides = [1, 1]} : vector<8x32xbf16> to vector<8x8xbf16>
    %73 = vector.extract_strided_slice %26 {offsets = [0, 16], sizes = [8, 8], strides = [1, 1]} : vector<8x32xbf16> to vector<8x8xbf16>
    "tpu.trace_start"() <{level = 10 : i32, message = "qd,kd->qk"}> : () -> ()
    %cst_33 = arith.constant dense<0.000000e+00> : vector<8x8xf32>
    %74 = tpu.matmul %72, %73, %cst_33 {dimension_numbers = #tpu.dot_dimension_numbers<[1], [1], [0], [0], [0, 0, 1, 0], [], []>} : vector<8x8xbf16>, vector<8x8xbf16>, vector<8x8xf32> -> vector<8x8xf32>
    "tpu.trace_stop"() : () -> ()
    %cst_34 = arith.constant 0.353553385 : f32
    %75 = vector.broadcast %cst_34 : f32 to vector<8x8xf32>
    %76 = arith.mulf %74, %75 : vector<8x8xf32>
    %cst_35 = arith.constant -1.000000e+09 : f32
    %77 = vector.shape_cast %24 : vector<1x8xi1> to vector<1x8xi1>
    %78 = vector.broadcast %77 : vector<1x8xi1> to vector<8x8xi1>
    %79 = vector.broadcast %cst_35 : f32 to vector<8x8xf32>
    %80 = arith.select %78, %79, %76 : vector<8x8xi1>, vector<8x8xf32>
    %cst_36 = arith.constant dense<0xFF800000> : vector<8xf32>
    %81 = vector.multi_reduction <maximumf>, %80, %cst_36 [1] : vector<8x8xf32> to vector<8xf32>
    %82 = vector.shape_cast %81 : vector<8xf32> to vector<8x1xf32>
    %83 = vector.broadcast %82 : vector<8x1xf32> to vector<8x8xf32>
    %84 = arith.subf %80, %83 : vector<8x8xf32>
    %85 = math.exp %84 : vector<8x8xf32>
    %cst_37 = arith.constant dense<0.000000e+00> : vector<8xf32>
    %86 = vector.multi_reduction <add>, %85, %cst_37 [1] : vector<8x8xf32> to vector<8xf32>
    %87 = vector.shape_cast %86 : vector<8xf32> to vector<8x1xf32>
    %88 = tpu.reciprocal %87 {approx = true} : vector<8x1xf32> -> vector<8x1xf32>
    %89 = vector.broadcast %88 : vector<8x1xf32> to vector<8x8xf32>
    %90 = arith.mulf %85, %89 : vector<8x8xf32>
    %91 = arith.truncf %90 : vector<8x8xf32> to vector<8x8xbf16>
    %92 = vector.extract_strided_slice %27 {offsets = [0, 16], sizes = [8, 8], strides = [1, 1]} : vector<8x32xbf16> to vector<8x8xbf16>
    %cst_38 = arith.constant dense<0.000000e+00> : vector<8x8xf32>
    %93 = tpu.matmul %91, %92, %cst_38 {dimension_numbers = #tpu.dot_dimension_numbers<[1], [0], [0], [1], [0, 0, 1, 1], [], []>} : vector<8x8xbf16>, vector<8x8xbf16>, vector<8x8xf32> -> vector<8x8xf32>
    %94 = vector.extract_strided_slice %25 {offsets = [0, 24], sizes = [8, 8], strides = [1, 1]} : vector<8x32xbf16> to vector<8x8xbf16>
    %95 = vector.extract_strided_slice %26 {offsets = [0, 24], sizes = [8, 8], strides = [1, 1]} : vector<8x32xbf16> to vector<8x8xbf16>
    "tpu.trace_start"() <{level = 10 : i32, message = "qd,kd->qk"}> : () -> ()
    %cst_39 = arith.constant dense<0.000000e+00> : vector<8x8xf32>
    %96 = tpu.matmul %94, %95, %cst_39 {dimension_numbers = #tpu.dot_dimension_numbers<[1], [1], [0], [0], [0, 0, 1, 0], [], []>} : vector<8x8xbf16>, vector<8x8xbf16>, vector<8x8xf32> -> vector<8x8xf32>
    "tpu.trace_stop"() : () -> ()
    %cst_40 = arith.constant 0.353553385 : f32
    %97 = vector.broadcast %cst_40 : f32 to vector<8x8xf32>
    %98 = arith.mulf %96, %97 : vector<8x8xf32>
    %cst_41 = arith.constant -1.000000e+09 : f32
    %99 = vector.shape_cast %24 : vector<1x8xi1> to vector<1x8xi1>
    %100 = vector.broadcast %99 : vector<1x8xi1> to vector<8x8xi1>
    %101 = vector.broadcast %cst_41 : f32 to vector<8x8xf32>
    %102 = arith.select %100, %101, %98 : vector<8x8xi1>, vector<8x8xf32>
    %cst_42 = arith.constant dense<0xFF800000> : vector<8xf32>
    %103 = vector.multi_reduction <maximumf>, %102, %cst_42 [1] : vector<8x8xf32> to vector<8xf32>
    %104 = vector.shape_cast %103 : vector<8xf32> to vector<8x1xf32>
    %105 = vector.broadcast %104 : vector<8x1xf32> to vector<8x8xf32>
    %106 = arith.subf %102, %105 : vector<8x8xf32>
    %107 = math.exp %106 : vector<8x8xf32>
    %cst_43 = arith.constant dense<0.000000e+00> : vector<8xf32>
    %108 = vector.multi_reduction <add>, %107, %cst_43 [1] : vector<8x8xf32> to vector<8xf32>
    %109 = vector.shape_cast %108 : vector<8xf32> to vector<8x1xf32>
    %110 = tpu.reciprocal %109 {approx = true} : vector<8x1xf32> -> vector<8x1xf32>
    %111 = vector.broadcast %110 : vector<8x1xf32> to vector<8x8xf32>
    %112 = arith.mulf %107, %111 : vector<8x8xf32>
    %113 = arith.truncf %112 : vector<8x8xf32> to vector<8x8xbf16>
    %114 = vector.extract_strided_slice %27 {offsets = [0, 24], sizes = [8, 8], strides = [1, 1]} : vector<8x32xbf16> to vector<8x8xbf16>
    %cst_44 = arith.constant dense<0.000000e+00> : vector<8x8xf32>
    %115 = tpu.matmul %113, %114, %cst_44 {dimension_numbers = #tpu.dot_dimension_numbers<[1], [0], [0], [1], [0, 0, 1, 1], [], []>} : vector<8x8xbf16>, vector<8x8xbf16>, vector<8x8xf32> -> vector<8x8xf32>
    %116 = tpu.concatenate %49, %71, %93, %115 in 1 : vector<8x8xf32>, vector<8x8xf32>, vector<8x8xf32>, vector<8x8xf32> -> vector<8x32xf32>
    %117 = arith.truncf %116 : vector<8x32xf32> to vector<8x32xbf16>
    %c0_45 = arith.constant 0 : index
    %c0_46 = arith.constant 0 : index
    %118 = vector.load %arg6[%c0_45, %c0_46] : memref<32x32xbf16, #tpu.memory_space<vmem>>, vector<32x32xbf16>
    %cst_47 = arith.constant dense<0.000000e+00> : vector<8x32xf32>
    %119 = tpu.matmul %117, %118, %cst_47 {dimension_numbers = #tpu.dot_dimension_numbers<[1], [0], [0], [1], [0, 0, 1, 1], [], []>} : vector<8x32xbf16>, vector<32x32xbf16>, vector<8x32xf32> -> vector<8x32xf32>
    %c0_48 = arith.constant 0 : index
    %c0_49 = arith.constant 0 : index
    %120 = vector.load %arg7[%c0_48, %c0_49] : memref<1x32xf32, #tpu.memory_space<vmem>>, vector<1x32xf32>
    %121 = vector.broadcast %120 : vector<1x32xf32> to vector<8x32xf32>
    %122 = arith.addf %119, %121 : vector<8x32xf32>
    %123 = arith.addf %1, %122 : vector<8x32xf32>
    %cst_50 = arith.constant dense<0.000000e+00> : vector<8xf32>
    %124 = vector.multi_reduction <add>, %123, %cst_50 [1] : vector<8x32xf32> to vector<8xf32>
    %125 = vector.shape_cast %124 : vector<8xf32> to vector<8x1xf32>
    %cst_51 = arith.constant 3.200000e+01 : f32
    %126 = vector.broadcast %cst_51 : f32 to vector<8x1xf32>
    %127 = arith.divf %125, %126 : vector<8x1xf32>
    %128 = vector.broadcast %127 : vector<8x1xf32> to vector<8x32xf32>
    %129 = arith.subf %123, %128 : vector<8x32xf32>
    %130 = arith.mulf %129, %129 : vector<8x32xf32>
    %cst_52 = arith.constant dense<0.000000e+00> : vector<8xf32>
    %131 = vector.multi_reduction <add>, %130, %cst_52 [1] : vector<8x32xf32> to vector<8xf32>
    %132 = vector.shape_cast %131 : vector<8xf32> to vector<8x1xf32>
    %cst_53 = arith.constant 3.200000e+01 : f32
    %133 = vector.broadcast %cst_53 : f32 to vector<8x1xf32>
    %134 = arith.divf %132, %133 : vector<8x1xf32>
    %135 = vector.broadcast %127 : vector<8x1xf32> to vector<8x32xf32>
    %136 = arith.subf %123, %135 : vector<8x32xf32>
    %cst_54 = arith.constant 9.99999974E-6 : f32
    %137 = vector.broadcast %cst_54 : f32 to vector<8x1xf32>
    %138 = arith.addf %134, %137 : vector<8x1xf32>
    %139 = math.rsqrt %138 : vector<8x1xf32>
    %140 = vector.broadcast %139 : vector<8x1xf32> to vector<8x32xf32>
    %141 = arith.mulf %136, %140 : vector<8x32xf32>
    %c0_55 = arith.constant 0 : index
    %c0_56 = arith.constant 0 : index
    %142 = vector.load %arg8[%c0_55, %c0_56] : memref<1x32xf32, #tpu.memory_space<vmem>>, vector<1x32xf32>
    %143 = vector.broadcast %142 : vector<1x32xf32> to vector<8x32xf32>
    %144 = arith.mulf %141, %143 : vector<8x32xf32>
    %c0_57 = arith.constant 0 : index
    %c0_58 = arith.constant 0 : index
    %145 = vector.load %arg9[%c0_57, %c0_58] : memref<1x32xf32, #tpu.memory_space<vmem>>, vector<1x32xf32>
    %146 = vector.broadcast %145 : vector<1x32xf32> to vector<8x32xf32>
    %147 = arith.addf %144, %146 : vector<8x32xf32>
    %c0_59 = arith.constant 0 : index
    %c0_60 = arith.constant 0 : index
    %c0_61 = arith.constant 0 : index
    %148 = vector.load %arg10[%c0_59, %c0_60, %c0_61] : memref<1x8x32xf32, #tpu.memory_space<vmem>>, vector<1x8x32xf32>
    %149 = vector.shape_cast %148 : vector<1x8x32xf32> to vector<8x32xf32>
    %150 = vector.shape_cast %147 : vector<8x32xf32> to vector<1x8x32xf32>
    tpu.vector_store %arg10[%c0_59, %c0_60, %c0_61], %150 {strides = array<i32>} : memref<1x8x32xf32, #tpu.memory_space<vmem>>, vector<1x8x32xf32>,
    return
  }
  func.func @transform_0(%arg0: i32) -> (i32, i32, i32) {
    %c0_i32 = arith.constant 0 : i32
    %c0_i32_0 = arith.constant 0 : i32
    %c0_i32_1 = arith.constant 0 : i32
    return %arg0, %c0_i32, %c0_i32_0 : i32, i32, i32
  }
  func.func @transform_1(%arg0: i32) -> (i32, i32, i32) {
    %c0_i32 = arith.constant 0 : i32
    %c0_i32_0 = arith.constant 0 : i32
    %c0_i32_1 = arith.constant 0 : i32
    return %arg0, %c0_i32, %c0_i32_0 : i32, i32, i32
  }
  func.func @transform_2(%arg0: i32) -> (i32, i32, i32) {
    %c0_i32 = arith.constant 0 : i32
    %c0_i32_0 = arith.constant 0 : i32
    %c0_i32_1 = arith.constant 0 : i32
    return %arg0, %c0_i32, %c0_i32_0 : i32, i32, i32
  }
  func.func @transform_3(%arg0: i32) -> (i32, i32) {
    %c0_i32 = arith.constant 0 : i32
    %c0_i32_0 = arith.constant 0 : i32
    %c0_i32_1 = arith.constant 0 : i32
    return %c0_i32, %c0_i32_0 : i32, i32
  }
  func.func @transform_4(%arg0: i32) -> (i32, i32) {
    %c0_i32 = arith.constant 0 : i32
    %c0_i32_0 = arith.constant 0 : i32
    %c0_i32_1 = arith.constant 0 : i32
    return %c0_i32, %c0_i32_0 : i32, i32
  }
  func.func @transform_5(%arg0: i32) -> (i32, i32) {
    %c0_i32 = arith.constant 0 : i32
    %c0_i32_0 = arith.constant 0 : i32
    %c0_i32_1 = arith.constant 0 : i32
    return %c0_i32, %c0_i32_0 : i32, i32
  }
  func.func @transform_6(%arg0: i32) -> (i32, i32) {
    %c0_i32 = arith.constant 0 : i32
    %c0_i32_0 = arith.constant 0 : i32
    %c0_i32_1 = arith.constant 0 : i32
    return %c0_i32, %c0_i32_0 : i32, i32
  }
  func.func @transform_7(%arg0: i32) -> (i32, i32) {
    %c0_i32 = arith.constant 0 : i32
    %c0_i32_0 = arith.constant 0 : i32
    %c0_i32_1 = arith.constant 0 : i32
    return %c0_i32, %c0_i32_0 : i32, i32
  }
  func.func @transform_8(%arg0: i32) -> (i32, i32) {
    %c0_i32 = arith.constant 0 : i32
    %c0_i32_0 = arith.constant 0 : i32
    %c0_i32_1 = arith.constant 0 : i32
    return %c0_i32, %c0_i32_0 : i32, i32
  }
  func.func @transform_9(%arg0: i32) -> (i32, i32, i32) {
    %c0_i32 = arith.constant 0 : i32
    %c0_i32_0 = arith.constant 0 : i32
    %c0_i32_1 = arith.constant 0 : i32
    return %arg0, %c0_i32, %c0_i32_0 : i32, i32, i32
  }
}

module attributes {stable_mosaic.version = 11 : i64} {
  func.func @_fused_mha_kernel(%arg0: i32, %arg1: memref<1x8x32xf32, #tpu.memory_space<vmem>>, %arg2: memref<1x8x32xf32, #tpu.memory_space<vmem>>, %arg3: memref<1x1x8xf32, #tpu.memory_space<vmem>>, %arg4: memref<32x96xbf16, #tpu.memory_space<vmem>>, %arg5: memref<1x96xf32, #tpu.memory_space<vmem>>, %arg6: memref<32x32xbf16, #tpu.memory_space<vmem>>, %arg7: memref<1x32xf32, #tpu.memory_space<vmem>>, %arg8: memref<1x32xf32, #tpu.memory_space<vmem>>, %arg9: memref<1x32xf32, #tpu.memory_space<vmem>>, %arg10: memref<1x8x32xf32, #tpu.memory_space<vmem>>) attributes {dimension_semantics = [#tpu.dimension_semantics<parallel>], iteration_bounds = array<i64: 2>, scalar_prefetch = 0 : i64, scratch_operands = 0 : i64, tpu.core_type = #tpu.core_type<tc>, window_params = [{transform_indices = @transform_0, window_bounds = array<i64: 1, 8, 32>}, {transform_indices = @transform_1, window_bounds = array<i64: 1, 8, 32>}, {transform_indices = @transform_2, window_bounds = array<i64: 1, 1, 8>}, {pipeline_mode = #tpu.pipeline_mode<synchronous>, transform_indices = @transform_3, window_bounds = array<i64: 32, 96>}, {pipeline_mode = #tpu.pipeline_mode<synchronous>, transform_indices = @transform_4, window_bounds = array<i64: 1, 96>}, {pipeline_mode = #tpu.pipeline_mode<synchronous>, transform_indices = @transform_5, window_bounds = array<i64: 32, 32>}, {pipeline_mode = #tpu.pipeline_mode<synchronous>, transform_indices = @transform_6, window_bounds = array<i64: 1, 32>}, {pipeline_mode = #tpu.pipeline_mode<synchronous>, transform_indices = @transform_7, window_bounds = array<i64: 1, 32>}, {pipeline_mode = #tpu.pipeline_mode<synchronous>, transform_indices = @transform_8, window_bounds = array<i64: 1, 32>}, {transform_indices = @transform_9, window_bounds = array<i64: 1, 8, 32>}]} {
    %c0 = arith.constant 0 : index
    %c0_0 = arith.constant 0 : index
    %c0_1 = arith.constant 0 : index
    %0 = vector.load %arg1[%c0, %c0_0, %c0_1] : memref<1x8x32xf32, #tpu.memory_space<vmem>>, vector<1x8x32xf32>
    %1 = vector.shape_cast %0 : vector<1x8x32xf32> to vector<8x32xf32>
    %2 = arith.truncf %1 : vector<8x32xf32> to vector<8x32xbf16>
    %c0_2 = arith.constant 0 : index
    %c0_3 = arith.constant 0 : index
    %3 = vector.load %arg4[%c0_2, %c0_3] : memref<32x96xbf16, #tpu.memory_space<vmem>>, vector<32x96xbf16>
    %cst = arith.constant dense<0.000000e+00> : vector<8x96xf32>
    %4 = tpu.matmul %2, %3, %cst {dimension_numbers = #tpu.dot_dimension_numbers<[1], [0], [0], [1], [0, 0, 1, 1], [], []>} : vector<8x32xbf16>, vector<32x96xbf16>, vector<8x96xf32> -> vector<8x96xf32>
    %c0_4 = arith.constant 0 : index
    %c0_5 = arith.constant 0 : index
    %5 = vector.load %arg5[%c0_4, %c0_5] : memref<1x96xf32, #tpu.memory_space<vmem>>, vector<1x96xf32>
    %6 = vector.broadcast %5 : vector<1x96xf32> to vector<8x96xf32>
    %7 = arith.addf %4, %6 : vector<8x96xf32>
    %8 = vector.extract_strided_slice %7 {offsets = [0, 0], sizes = [8, 32], strides = [1, 1]} : vector<8x96xf32> to vector<8x32xf32>
    %9 = vector.extract_strided_slice %7 {offsets = [0, 32], sizes = [8, 32], strides = [1, 1]} : vector<8x96xf32> to vector<8x32xf32>
    %10 = vector.extract_strided_slice %7 {offsets = [0, 64], sizes = [8, 32], strides = [1, 1]} : vector<8x96xf32> to vector<8x32xf32>
    %c0_6 = arith.constant 0 : index
    %c0_7 = arith.constant 0 : index
    %c0_8 = arith.constant 0 : index
    %11 = vector.load %arg3[%c0_6, %c0_7, %c0_8] : memref<1x1x8xf32, #tpu.memory_space<vmem>>, vector<1x1x8xf32>
    %12 = vector.shape_cast %11 : vector<1x1x8xf32> to vector<1x8xf32>
    %cst_9 = arith.constant 5.000000e-01 : f32
    %13 = vector.broadcast %cst_9 : f32 to vector<1x8xf32>
    %14 = arith.cmpf ogt, %12, %13 : vector<1x8xf32>
    %15 = arith.truncf %8 : vector<8x32xf32> to vector<8x32xbf16>
    %16 = arith.truncf %9 : vector<8x32xf32> to vector<8x32xbf16>
    %17 = arith.truncf %10 : vector<8x32xf32> to vector<8x32xbf16>
    %18 = vector.extract_strided_slice %15 {offsets = [0, 0], sizes = [8, 8], strides = [1, 1]} : vector<8x32xbf16> to vector<8x8xbf16>
    %19 = vector.extract_strided_slice %16 {offsets = [0, 0], sizes = [8, 8], strides = [1, 1]} : vector<8x32xbf16> to vector<8x8xbf16>
    "tpu.trace_start"() <{level = 10 : i32, message = "qd,kd->qk"}> : () -> ()
    %cst_10 = arith.constant dense<0.000000e+00> : vector<8x8xf32>
    %20 = tpu.matmul %18, %19, %cst_10 {dimension_numbers = #tpu.dot_dimension_numbers<[1], [1], [0], [0], [0, 0, 1, 0], [], []>} : vector<8x8xbf16>, vector<8x8xbf16>, vector<8x8xf32> -> vector<8x8xf32>
    "tpu.trace_stop"() : () -> ()
    %cst_11 = arith.constant 0.353553385 : f32
    %21 = vector.broadcast %cst_11 : f32 to vector<8x8xf32>
    %22 = arith.mulf %20, %21 : vector<8x8xf32>
    %cst_12 = arith.constant -1.000000e+09 : f32
    %23 = vector.shape_cast %14 : vector<1x8xi1> to vector<1x8xi1>
    %24 = vector.broadcast %23 : vector<1x8xi1> to vector<8x8xi1>
    %25 = vector.broadcast %cst_12 : f32 to vector<8x8xf32>
    %26 = arith.select %24, %25, %22 : vector<8x8xi1>, vector<8x8xf32>
    %cst_13 = arith.constant dense<0xFF800000> : vector<8xf32>
    %27 = vector.multi_reduction <maximumf>, %26, %cst_13 [1] : vector<8x8xf32> to vector<8xf32>
    %28 = vector.shape_cast %27 : vector<8xf32> to vector<8x1xf32>
    %29 = vector.broadcast %28 : vector<8x1xf32> to vector<8x8xf32>
    %30 = arith.subf %26, %29 : vector<8x8xf32>
    %31 = math.exp %30 : vector<8x8xf32>
    %cst_14 = arith.constant dense<0.000000e+00> : vector<8xf32>
    %32 = vector.multi_reduction <add>, %31, %cst_14 [1] : vector<8x8xf32> to vector<8xf32>
    %33 = vector.shape_cast %32 : vector<8xf32> to vector<8x1xf32>
    %34 = tpu.reciprocal %33 {approx = true} : vector<8x1xf32> -> vector<8x1xf32>
    %35 = vector.broadcast %34 : vector<8x1xf32> to vector<8x8xf32>
    %36 = arith.mulf %31, %35 : vector<8x8xf32>
    %37 = arith.truncf %36 : vector<8x8xf32> to vector<8x8xbf16>
    %38 = vector.extract_strided_slice %17 {offsets = [0, 0], sizes = [8, 8], strides = [1, 1]} : vector<8x32xbf16> to vector<8x8xbf16>
    %cst_15 = arith.constant dense<0.000000e+00> : vector<8x8xf32>
    %39 = tpu.matmul %37, %38, %cst_15 {dimension_numbers = #tpu.dot_dimension_numbers<[1], [0], [0], [1], [0, 0, 1, 1], [], []>} : vector<8x8xbf16>, vector<8x8xbf16>, vector<8x8xf32> -> vector<8x8xf32>
    %40 = vector.extract_strided_slice %15 {offsets = [0, 8], sizes = [8, 8], strides = [1, 1]} : vector<8x32xbf16> to vector<8x8xbf16>
    %41 = vector.extract_strided_slice %16 {offsets = [0, 8], sizes = [8, 8], strides = [1, 1]} : vector<8x32xbf16> to vector<8x8xbf16>
    "tpu.trace_start"() <{level = 10 : i32, message = "qd,kd->qk"}> : () -> ()
    %cst_16 = arith.constant dense<0.000000e+00> : vector<8x8xf32>
    %42 = tpu.matmul %40, %41, %cst_16 {dimension_numbers = #tpu.dot_dimension_numbers<[1], [1], [0], [0], [0, 0, 1, 0], [], []>} : vector<8x8xbf16>, vector<8x8xbf16>, vector<8x8xf32> -> vector<8x8xf32>
    "tpu.trace_stop"() : () -> ()
    %cst_17 = arith.constant 0.353553385 : f32
    %43 = vector.broadcast %cst_17 : f32 to vector<8x8xf32>
    %44 = arith.mulf %42, %43 : vector<8x8xf32>
    %cst_18 = arith.constant -1.000000e+09 : f32
    %45 = vector.shape_cast %14 : vector<1x8xi1> to vector<1x8xi1>
    %46 = vector.broadcast %45 : vector<1x8xi1> to vector<8x8xi1>
    %47 = vector.broadcast %cst_18 : f32 to vector<8x8xf32>
    %48 = arith.select %46, %47, %44 : vector<8x8xi1>, vector<8x8xf32>
    %cst_19 = arith.constant dense<0xFF800000> : vector<8xf32>
    %49 = vector.multi_reduction <maximumf>, %48, %cst_19 [1] : vector<8x8xf32> to vector<8xf32>
    %50 = vector.shape_cast %49 : vector<8xf32> to vector<8x1xf32>
    %51 = vector.broadcast %50 : vector<8x1xf32> to vector<8x8xf32>
    %52 = arith.subf %48, %51 : vector<8x8xf32>
    %53 = math.exp %52 : vector<8x8xf32>
    %cst_20 = arith.constant dense<0.000000e+00> : vector<8xf32>
    %54 = vector.multi_reduction <add>, %53, %cst_20 [1] : vector<8x8xf32> to vector<8xf32>
    %55 = vector.shape_cast %54 : vector<8xf32> to vector<8x1xf32>
    %56 = tpu.reciprocal %55 {approx = true} : vector<8x1xf32> -> vector<8x1xf32>
    %57 = vector.broadcast %56 : vector<8x1xf32> to vector<8x8xf32>
    %58 = arith.mulf %53, %57 : vector<8x8xf32>
    %59 = arith.truncf %58 : vector<8x8xf32> to vector<8x8xbf16>
    %60 = vector.extract_strided_slice %17 {offsets = [0, 8], sizes = [8, 8], strides = [1, 1]} : vector<8x32xbf16> to vector<8x8xbf16>
    %cst_21 = arith.constant dense<0.000000e+00> : vector<8x8xf32>
    %61 = tpu.matmul %59, %60, %cst_21 {dimension_numbers = #tpu.dot_dimension_numbers<[1], [0], [0], [1], [0, 0, 1, 1], [], []>} : vector<8x8xbf16>, vector<8x8xbf16>, vector<8x8xf32> -> vector<8x8xf32>
    %62 = vector.extract_strided_slice %15 {offsets = [0, 16], sizes = [8, 8], strides = [1, 1]} : vector<8x32xbf16> to vector<8x8xbf16>
    %63 = vector.extract_strided_slice %16 {offsets = [0, 16], sizes = [8, 8], strides = [1, 1]} : vector<8x32xbf16> to vector<8x8xbf16>
    "tpu.trace_start"() <{level = 10 : i32, message = "qd,kd->qk"}> : () -> ()
    %cst_22 = arith.constant dense<0.000000e+00> : vector<8x8xf32>
    %64 = tpu.matmul %62, %63, %cst_22 {dimension_numbers = #tpu.dot_dimension_numbers<[1], [1], [0], [0], [0, 0, 1, 0], [], []>} : vector<8x8xbf16>, vector<8x8xbf16>, vector<8x8xf32> -> vector<8x8xf32>
    "tpu.trace_stop"() : () -> ()
    %cst_23 = arith.constant 0.353553385 : f32
    %65 = vector.broadcast %cst_23 : f32 to vector<8x8xf32>
    %66 = arith.mulf %64, %65 : vector<8x8xf32>
    %cst_24 = arith.constant -1.000000e+09 : f32
    %67 = vector.shape_cast %14 : vector<1x8xi1> to vector<1x8xi1>
    %68 = vector.broadcast %67 : vector<1x8xi1> to vector<8x8xi1>
    %69 = vector.broadcast %cst_24 : f32 to vector<8x8xf32>
    %70 = arith.select %68, %69, %66 : vector<8x8xi1>, vector<8x8xf32>
    %cst_25 = arith.constant dense<0xFF800000> : vector<8xf32>
    %71 = vector.multi_reduction <maximumf>, %70, %cst_25 [1] : vector<8x8xf32> to vector<8xf32>
    %72 = vector.shape_cast %71 : vector<8xf32> to vector<8x1xf32>
    %73 = vector.broadcast %72 : vector<8x1xf32> to vector<8x8xf32>
    %74 = arith.subf %70, %73 : vector<8x8xf32>
    %75 = math.exp %74 : vector<8x8xf32>
    %cst_26 = arith.constant dense<0.000000e+00> : vector<8xf32>
    %76 = vector.multi_reduction <add>, %75, %cst_26 [1] : vector<8x8xf32> to vector<8xf32>
    %77 = vector.shape_cast %76 : vector<8xf32> to vector<8x1xf32>
    %78 = tpu.reciprocal %77 {approx = true} : vector<8x1xf32> -> vector<8x1xf32>
    %79 = vector.broadcast %78 : vector<8x1xf32> to vector<8x8xf32>
    %80 = arith.mulf %75, %79 : vector<8x8xf32>
    %81 = arith.truncf %80 : vector<8x8xf32> to vector<8x8xbf16>
    %82 = vector.extract_strided_slice %17 {offsets = [0, 16], sizes = [8, 8], strides = [1, 1]} : vector<8x32xbf16> to vector<8x8xbf16>
    %cst_27 = arith.constant dense<0.000000e+00> : vector<8x8xf32>
    %83 = tpu.matmul %81, %82, %cst_27 {dimension_numbers = #tpu.dot_dimension_numbers<[1], [0], [0], [1], [0, 0, 1, 1], [], []>} : vector<8x8xbf16>, vector<8x8xbf16>, vector<8x8xf32> -> vector<8x8xf32>
    %84 = vector.extract_strided_slice %15 {offsets = [0, 24], sizes = [8, 8], strides = [1, 1]} : vector<8x32xbf16> to vector<8x8xbf16>
    %85 = vector.extract_strided_slice %16 {offsets = [0, 24], sizes = [8, 8], strides = [1, 1]} : vector<8x32xbf16> to vector<8x8xbf16>
    "tpu.trace_start"() <{level = 10 : i32, message = "qd,kd->qk"}> : () -> ()
    %cst_28 = arith.constant dense<0.000000e+00> : vector<8x8xf32>
    %86 = tpu.matmul %84, %85, %cst_28 {dimension_numbers = #tpu.dot_dimension_numbers<[1], [1], [0], [0], [0, 0, 1, 0], [], []>} : vector<8x8xbf16>, vector<8x8xbf16>, vector<8x8xf32> -> vector<8x8xf32>
    "tpu.trace_stop"() : () -> ()
    %cst_29 = arith.constant 0.353553385 : f32
    %87 = vector.broadcast %cst_29 : f32 to vector<8x8xf32>
    %88 = arith.mulf %86, %87 : vector<8x8xf32>
    %cst_30 = arith.constant -1.000000e+09 : f32
    %89 = vector.shape_cast %14 : vector<1x8xi1> to vector<1x8xi1>
    %90 = vector.broadcast %89 : vector<1x8xi1> to vector<8x8xi1>
    %91 = vector.broadcast %cst_30 : f32 to vector<8x8xf32>
    %92 = arith.select %90, %91, %88 : vector<8x8xi1>, vector<8x8xf32>
    %cst_31 = arith.constant dense<0xFF800000> : vector<8xf32>
    %93 = vector.multi_reduction <maximumf>, %92, %cst_31 [1] : vector<8x8xf32> to vector<8xf32>
    %94 = vector.shape_cast %93 : vector<8xf32> to vector<8x1xf32>
    %95 = vector.broadcast %94 : vector<8x1xf32> to vector<8x8xf32>
    %96 = arith.subf %92, %95 : vector<8x8xf32>
    %97 = math.exp %96 : vector<8x8xf32>
    %cst_32 = arith.constant dense<0.000000e+00> : vector<8xf32>
    %98 = vector.multi_reduction <add>, %97, %cst_32 [1] : vector<8x8xf32> to vector<8xf32>
    %99 = vector.shape_cast %98 : vector<8xf32> to vector<8x1xf32>
    %100 = tpu.reciprocal %99 {approx = true} : vector<8x1xf32> -> vector<8x1xf32>
    %101 = vector.broadcast %100 : vector<8x1xf32> to vector<8x8xf32>
    %102 = arith.mulf %97, %101 : vector<8x8xf32>
    %103 = arith.truncf %102 : vector<8x8xf32> to vector<8x8xbf16>
    %104 = vector.extract_strided_slice %17 {offsets = [0, 24], sizes = [8, 8], strides = [1, 1]} : vector<8x32xbf16> to vector<8x8xbf16>
    %cst_33 = arith.constant dense<0.000000e+00> : vector<8x8xf32>
    %105 = tpu.matmul %103, %104, %cst_33 {dimension_numbers = #tpu.dot_dimension_numbers<[1], [0], [0], [1], [0, 0, 1, 1], [], []>} : vector<8x8xbf16>, vector<8x8xbf16>, vector<8x8xf32> -> vector<8x8xf32>
    %106 = tpu.concatenate %39, %61, %83, %105 in 1 : vector<8x8xf32>, vector<8x8xf32>, vector<8x8xf32>, vector<8x8xf32> -> vector<8x32xf32>
    %107 = arith.truncf %106 : vector<8x32xf32> to vector<8x32xbf16>
    %c0_34 = arith.constant 0 : index
    %c0_35 = arith.constant 0 : index
    %108 = vector.load %arg6[%c0_34, %c0_35] : memref<32x32xbf16, #tpu.memory_space<vmem>>, vector<32x32xbf16>
    %cst_36 = arith.constant dense<0.000000e+00> : vector<8x32xf32>
    %109 = tpu.matmul %107, %108, %cst_36 {dimension_numbers = #tpu.dot_dimension_numbers<[1], [0], [0], [1], [0, 0, 1, 1], [], []>} : vector<8x32xbf16>, vector<32x32xbf16>, vector<8x32xf32> -> vector<8x32xf32>
    %c0_37 = arith.constant 0 : index
    %c0_38 = arith.constant 0 : index
    %110 = vector.load %arg7[%c0_37, %c0_38] : memref<1x32xf32, #tpu.memory_space<vmem>>, vector<1x32xf32>
    %111 = vector.broadcast %110 : vector<1x32xf32> to vector<8x32xf32>
    %112 = arith.addf %109, %111 : vector<8x32xf32>
    %113 = arith.addf %1, %112 : vector<8x32xf32>
    %cst_39 = arith.constant dense<0.000000e+00> : vector<8xf32>
    %114 = vector.multi_reduction <add>, %113, %cst_39 [1] : vector<8x32xf32> to vector<8xf32>
    %115 = vector.shape_cast %114 : vector<8xf32> to vector<8x1xf32>
    %cst_40 = arith.constant 3.200000e+01 : f32
    %116 = vector.broadcast %cst_40 : f32 to vector<8x1xf32>
    %117 = arith.divf %115, %116 : vector<8x1xf32>
    %118 = vector.broadcast %117 : vector<8x1xf32> to vector<8x32xf32>
    %119 = arith.subf %113, %118 : vector<8x32xf32>
    %120 = arith.mulf %119, %119 : vector<8x32xf32>
    %cst_41 = arith.constant dense<0.000000e+00> : vector<8xf32>
    %121 = vector.multi_reduction <add>, %120, %cst_41 [1] : vector<8x32xf32> to vector<8xf32>
    %122 = vector.shape_cast %121 : vector<8xf32> to vector<8x1xf32>
    %cst_42 = arith.constant 3.200000e+01 : f32
    %123 = vector.broadcast %cst_42 : f32 to vector<8x1xf32>
    %124 = arith.divf %122, %123 : vector<8x1xf32>
    %125 = vector.broadcast %117 : vector<8x1xf32> to vector<8x32xf32>
    %126 = arith.subf %113, %125 : vector<8x32xf32>
    %cst_43 = arith.constant 9.99999974E-6 : f32
    %127 = vector.broadcast %cst_43 : f32 to vector<8x1xf32>
    %128 = arith.addf %124, %127 : vector<8x1xf32>
    %129 = math.rsqrt %128 : vector<8x1xf32>
    %130 = vector.broadcast %129 : vector<8x1xf32> to vector<8x32xf32>
    %131 = arith.mulf %126, %130 : vector<8x32xf32>
    %c0_44 = arith.constant 0 : index
    %c0_45 = arith.constant 0 : index
    %132 = vector.load %arg8[%c0_44, %c0_45] : memref<1x32xf32, #tpu.memory_space<vmem>>, vector<1x32xf32>
    %133 = vector.broadcast %132 : vector<1x32xf32> to vector<8x32xf32>
    %134 = arith.mulf %131, %133 : vector<8x32xf32>
    %c0_46 = arith.constant 0 : index
    %c0_47 = arith.constant 0 : index
    %135 = vector.load %arg9[%c0_46, %c0_47] : memref<1x32xf32, #tpu.memory_space<vmem>>, vector<1x32xf32>
    %136 = vector.broadcast %135 : vector<1x32xf32> to vector<8x32xf32>
    %137 = arith.addf %134, %136 : vector<8x32xf32>
    %c0_48 = arith.constant 0 : index
    %c0_49 = arith.constant 0 : index
    %c0_50 = arith.constant 0 : index
    %138 = vector.load %arg10[%c0_48, %c0_49, %c0_50] : memref<1x8x32xf32, #tpu.memory_space<vmem>>, vector<1x8x32xf32>
    %139 = vector.shape_cast %138 : vector<1x8x32xf32> to vector<8x32xf32>
    %140 = vector.shape_cast %137 : vector<8x32xf32> to vector<1x8x32xf32>
    tpu.vector_store %arg10[%c0_48, %c0_49, %c0_50], %140 {strides = array<i32>} : memref<1x8x32xf32, #tpu.memory_space<vmem>>, vector<1x8x32xf32>,
    return
  }
  func.func @transform_0(%arg0: i32) -> (i32, i32, i32) {
    %c0_i32 = arith.constant 0 : i32
    %c0_i32_0 = arith.constant 0 : i32
    %c0_i32_1 = arith.constant 0 : i32
    return %arg0, %c0_i32, %c0_i32_0 : i32, i32, i32
  }
  func.func @transform_1(%arg0: i32) -> (i32, i32, i32) {
    %c0_i32 = arith.constant 0 : i32
    %c0_i32_0 = arith.constant 0 : i32
    %c0_i32_1 = arith.constant 0 : i32
    return %arg0, %c0_i32, %c0_i32_0 : i32, i32, i32
  }
  func.func @transform_2(%arg0: i32) -> (i32, i32, i32) {
    %c0_i32 = arith.constant 0 : i32
    %c0_i32_0 = arith.constant 0 : i32
    %c0_i32_1 = arith.constant 0 : i32
    return %arg0, %c0_i32, %c0_i32_0 : i32, i32, i32
  }
  func.func @transform_3(%arg0: i32) -> (i32, i32) {
    %c0_i32 = arith.constant 0 : i32
    %c0_i32_0 = arith.constant 0 : i32
    %c0_i32_1 = arith.constant 0 : i32
    return %c0_i32, %c0_i32_0 : i32, i32
  }
  func.func @transform_4(%arg0: i32) -> (i32, i32) {
    %c0_i32 = arith.constant 0 : i32
    %c0_i32_0 = arith.constant 0 : i32
    %c0_i32_1 = arith.constant 0 : i32
    return %c0_i32, %c0_i32_0 : i32, i32
  }
  func.func @transform_5(%arg0: i32) -> (i32, i32) {
    %c0_i32 = arith.constant 0 : i32
    %c0_i32_0 = arith.constant 0 : i32
    %c0_i32_1 = arith.constant 0 : i32
    return %c0_i32, %c0_i32_0 : i32, i32
  }
  func.func @transform_6(%arg0: i32) -> (i32, i32) {
    %c0_i32 = arith.constant 0 : i32
    %c0_i32_0 = arith.constant 0 : i32
    %c0_i32_1 = arith.constant 0 : i32
    return %c0_i32, %c0_i32_0 : i32, i32
  }
  func.func @transform_7(%arg0: i32) -> (i32, i32) {
    %c0_i32 = arith.constant 0 : i32
    %c0_i32_0 = arith.constant 0 : i32
    %c0_i32_1 = arith.constant 0 : i32
    return %c0_i32, %c0_i32_0 : i32, i32
  }
  func.func @transform_8(%arg0: i32) -> (i32, i32) {
    %c0_i32 = arith.constant 0 : i32
    %c0_i32_0 = arith.constant 0 : i32
    %c0_i32_1 = arith.constant 0 : i32
    return %c0_i32, %c0_i32_0 : i32, i32
  }
  func.func @transform_9(%arg0: i32) -> (i32, i32, i32) {
    %c0_i32 = arith.constant 0 : i32
    %c0_i32_0 = arith.constant 0 : i32
    %c0_i32_1 = arith.constant 0 : i32
    return %arg0, %c0_i32, %c0_i32_0 : i32, i32, i32
  }
}

module attributes {stable_mosaic.version = 11 : i64} {
  func.func @_linear_kernel(%arg0: i32, %arg1: memref<16x32xf32, #tpu.memory_space<vmem>>, %arg2: memref<32x128xbf16, #tpu.memory_space<vmem>>, %arg3: memref<1x128xf32, #tpu.memory_space<vmem>>, %arg4: memref<16x128xf32, #tpu.memory_space<vmem>>) attributes {dimension_semantics = [#tpu.dimension_semantics<parallel>], iteration_bounds = array<i64: 1>, scalar_prefetch = 0 : i64, scratch_operands = 0 : i64, tpu.core_type = #tpu.core_type<tc>, window_params = [{transform_indices = @transform_0, window_bounds = array<i64: 16, 32>}, {pipeline_mode = #tpu.pipeline_mode<synchronous>, transform_indices = @transform_1, window_bounds = array<i64: 32, 128>}, {pipeline_mode = #tpu.pipeline_mode<synchronous>, transform_indices = @transform_2, window_bounds = array<i64: 1, 128>}, {transform_indices = @transform_3, window_bounds = array<i64: 16, 128>}]} {
    %c0 = arith.constant 0 : index
    %c0_0 = arith.constant 0 : index
    %0 = vector.load %arg1[%c0, %c0_0] : memref<16x32xf32, #tpu.memory_space<vmem>>, vector<16x32xf32>
    %1 = arith.truncf %0 : vector<16x32xf32> to vector<16x32xbf16>
    %c0_1 = arith.constant 0 : index
    %c0_2 = arith.constant 0 : index
    %2 = vector.load %arg2[%c0_1, %c0_2] : memref<32x128xbf16, #tpu.memory_space<vmem>>, vector<32x128xbf16>
    %cst = arith.constant dense<0.000000e+00> : vector<16x128xf32>
    %3 = tpu.matmul %1, %2, %cst {dimension_numbers = #tpu.dot_dimension_numbers<[1], [0], [0], [1], [0, 0, 1, 1], [], []>} : vector<16x32xbf16>, vector<32x128xbf16>, vector<16x128xf32> -> vector<16x128xf32>
    %c0_3 = arith.constant 0 : index
    %c0_4 = arith.constant 0 : index
    %4 = vector.load %arg3[%c0_3, %c0_4] : memref<1x128xf32, #tpu.memory_space<vmem>>, vector<1x128xf32>
    %5 = vector.broadcast %4 : vector<1x128xf32> to vector<16x128xf32>
    %6 = arith.addf %3, %5 : vector<16x128xf32>
    %c0_5 = arith.constant 0 : index
    %c0_6 = arith.constant 0 : index
    %7 = vector.load %arg4[%c0_5, %c0_6] : memref<16x128xf32, #tpu.memory_space<vmem>>, vector<16x128xf32>
    tpu.vector_store %arg4[%c0_5, %c0_6], %6 {strides = array<i32>} : memref<16x128xf32, #tpu.memory_space<vmem>>, vector<16x128xf32>,
    return
  }
  func.func @transform_0(%arg0: i32) -> (i32, i32) {
    %c0_i32 = arith.constant 0 : i32
    %c0_i32_0 = arith.constant 0 : i32
    return %arg0, %c0_i32 : i32, i32
  }
  func.func @transform_1(%arg0: i32) -> (i32, i32) {
    %c0_i32 = arith.constant 0 : i32
    %c0_i32_0 = arith.constant 0 : i32
    %c0_i32_1 = arith.constant 0 : i32
    return %c0_i32, %c0_i32_0 : i32, i32
  }
  func.func @transform_2(%arg0: i32) -> (i32, i32) {
    %c0_i32 = arith.constant 0 : i32
    %c0_i32_0 = arith.constant 0 : i32
    %c0_i32_1 = arith.constant 0 : i32
    return %c0_i32, %c0_i32_0 : i32, i32
  }
  func.func @transform_3(%arg0: i32) -> (i32, i32) {
    %c0_i32 = arith.constant 0 : i32
    %c0_i32_0 = arith.constant 0 : i32
    return %arg0, %c0_i32 : i32, i32
  }
}

</mosaic_0001>

<bundles_post_ra>
// kernel: transformer_forward.12
= control target key start
LH: loop header
LB: loop body
LE: loop exit
PB: predicated region body
PF: predicated region fallthrough
CT: control target
= control target key end

     0   :  { %v290_v0 = vmov 0.0   ;;  %vm291_vm0 = vmmov 0   ;;  %vm53_vm1 = vcmask 261120   ;;  %vm140_vm2 = vcmask 523264   ;;  %s381_s1 = inlined_call_operand.vmem [shape: bf16[32,64], index: 1, kind: input, shape index: {}]   ;;  %s382_s0 = inlined_call_operand.vmem [shape: f32[16,32], index: 0, kind: input, shape index: {}]   ;;  %s383_s3 = inlined_call_operand.vmem [shape: bf16[64,32], index: 3, kind: input, shape index: {}]   ;;  %s384_s2 = inlined_call_operand.vmem [shape: f32[1,64], index: 2, kind: input, shape index: {}]   ;;  %s385_s4 = inlined_call_operand.vmem [shape: f32[1,32], index: 4, kind: input, shape index: {}]   ;;  %s386_s5 = inlined_call_operand.vmem [shape: f32[1,32], index: 5, kind: input, shape index: {}]   ;;  %s387_s6 = inlined_call_operand.vmem [shape: f32[1,32], index: 6, kind: input, shape index: {}]   ;;  %s388_s7 = inlined_call_operand.vmem [shape: f32[16,32], index: 7, kind: output, shape index: {}]  }
   0x1   :  { %258 = vmatprep.subr.bf16.mxu0 %v290_v0  ;;  %v280_v1 = vld [vmem:[%s381_s1] sm:$0xff]   ;;  %262 = vmatprep.mubr.msk.bf16.mxu0 %vm291_vm0, %v290_v0  ;;  %v281_v2 = vld [vmem:[%s381_s1 + $0x8] sm:$0xff]   ;;  %v284_v8 = vld [vmem:[%s383_s3 + $0x10] sm:$0xff]  }
   0x2   :  { %266 = vmatprep.subr.bf16.mxu1 %v290_v0  ;;  %274 = vmatprep.mubr.msk.bf16.mxu1 %vm291_vm0, %v290_v0  ;;  %v27_v3 = vld [vmem:[%s382_s0] sm:$0xff]  ;;  %v28_v4 = vld [vmem:[%s382_s0 + $0x8] sm:$0xff]  ;;  %v285_v9 = vld [vmem:[%s383_s3 + $0x18] sm:$0xff]  }
   0x3   :  { %259 = vmatpush3.bf16.msra.mxu0 %v280_v1  ;;  %v282_v5 = vld [vmem:[%s383_s3] sm:$0xff]   ;;  %v283_v6 = vld [vmem:[%s383_s3 + $0x8] sm:$0xff]   ;;  %v29_v7 = vpack.c.bf16 %v28_v4, %v27_v3 }
   0x4   :  { %260 = vmatprep.subr.bf16.mxu0 %v290_v0  ;;  %267 = vmatpush3.bf16.msra.mxu1 %v282_v5  ;;  %v238_v10 = vld [vmem:[%s384_s2] ss:$0 sm:$0xff] }
   0x5   :  { %268 = vmatprep.subr.bf16.mxu1 %v290_v0  ;;  %v242_v20 = vld [vmem:[%s385_s4] ss:$0 sm:$0xff] }
   0x6   :  { %v248_v48 = vld [vmem:[%s386_s5] ss:$0 sm:$0xff] }
   0x7   :  { %261 = vmatpush3.bf16.msra.mxu0 %v281_v2  ;;  %v249_v50 = vld [vmem:[%s387_s6] ss:$0 sm:$0xff] }
   0x8   :  { %269 = vmatpush3.bf16.msra.mxu1 %v283_v6 }
   0x9   :  { %270 = vmatprep.subr.bf16.mxu1 %v290_v0 }
   0xa   :  { %263 = vmatmul.mubr.msk.bf16.vlgmr.msra.gmra.mrb[0].mxu0 %vm53_vm1, %v29_v7 }
   0xc   :  { %271 = vmatpush3.bf16.msra.mxu1 %v284_v8 }
   0xd   :  { %272 = vmatprep.subr.bf16.mxu1 %v290_v0 }
  0x10   :  { %273 = vmatpush3.bf16.msra.mxu1 %v285_v9 }
  0xdd   :  { %v91_v11 = vpop.f32.mrb[0].mxu0 }
  0xde   :  { %v92_v12 = vadd.f32 %v238_v10, %v91_v11  ;;  %v264_v13 = vpop.f32.mrb[1].mxu0 }
  0xdf   :  { %v94_v14 = vpop.f32.mrb[2].mxu0 }
  0xe0   :  { %v95_v15 = vadd.f32 %v238_v10, %v94_v14  ;;  %v265_v16 = vpop.f32.mrb[3].mxu0  ;;  %v98_v17 = vmax.f32 %v92_v12, 0.0 }
  0xe2   :  { %v99_v18 = vmax.f32 %v95_v15, 0.0 }
  0xe4   :  { %v100_v19 = vpack.c.bf16 %v99_v18, %v98_v17 }
  0xe6   :  { %275 = vmatmul.mubr.msk.bf16.vlgmr.msra.gmra.mrb[0].mxu1 %vm140_vm2, %v100_v19 }
 0x1b9   :  { %v178_v21 = vpop.f32.mrb[0].mxu1 }
 0x1ba   :  { %v179_v22 = vadd.f32 %v242_v20, %v178_v21  ;;  %v276_v23 = vpop.f32.mrb[1].mxu1 }
 0x1bb   :  { %v181_v24 = vpop.f32.mrb[2].mxu1 }
 0x1bc   :  { %v182_v25 = vadd.f32 %v242_v20, %v181_v24  ;;  %v277_v26 = vpop.f32.mrb[3].mxu1  ;;  %v185_v27 = vadd.f32 %v179_v22, %v27_v3 }
 0x1be   :  { %v187_v28 = vsel %vm53_vm1, %v185_v27, 0.0  ;;  %v186_v29 = vadd.f32 %v182_v25, %v28_v4 }
 0x1bf   :  { %188 = vadd.xlane.f32.xlu0 %v187_v28 }
 0x1c0   :  { %v190_v30 = vsel %vm53_vm1, %v186_v29, 0.0 }
 0x1c3   :  { %191 = vadd.xlane.f32.xlu0 %v190_v30 }
 0x24c   :  { %v189_v31 = vpop.xlane.xlu0 %188 }
 0x24d   :  { %v194_v32 = vmul.f32 0.03125, %v189_v31 }
 0x24f   :  { %v196_v33 = vsub.f32 %v185_v27, %v194_v32 }
 0x250   :  { %v192_v34 = vpop.xlane.xlu0 %191 }
 0x251   :  { %v195_v35 = vmul.f32 0.03125, %v192_v34  ;;  %v198_v36 = vmul.f32 %v196_v33, %v196_v33 }
 0x253   :  { %v197_v37 = vsub.f32 %v186_v29, %v195_v35  ;;  %v200_v38 = vsel %vm53_vm1, %v198_v36, 0.0 }
 0x254   :  { %201 = vadd.xlane.f32.xlu1 %v200_v38 }
 0x255   :  { %v199_v39 = vmul.f32 %v197_v37, %v197_v37 }
 0x257   :  { %v203_v40 = vsel %vm53_vm1, %v199_v39, 0.0 }
 0x258   :  { %204 = vadd.xlane.f32.xlu1 %v203_v40 }
 0x2e1   :  { %v202_v41 = vpop.xlane.xlu1 %201 }
 0x2e2   :  { %v206_v42 = vmul.f32 0.03125, %v202_v41 }
 0x2e4   :  { %v208_v43 = vadd.f32 1e-05, %v206_v42 }
 0x2e5   :  { %v205_v44 = vpop.xlane.xlu1 %204 }
 0x2e6   :  { %286 = vrsqrt.f32 %v208_v43  ;;  %v207_v45 = vmul.f32 0.03125, %v205_v44 }
 0x2e8   :  { %v209_v46 = vadd.f32 1e-05, %v207_v45 }
 0x2ea   :  { %288 = vrsqrt.f32 %v209_v46 }
 0x2f0   :  { %v287_v47 = vpop.eup %286 }
 0x2f1   :  { %v212_v49 = vmul.f32 %v287_v47, %v196_v33 }
 0x2f3   :  { %v221_v51 = vmul.f32 %v248_v48, %v212_v49 }
 0x2f4   :  { %v289_v52 = vpop.eup %288 }
 0x2f5   :  { %v230_v53 = vadd.f32 %v249_v50, %v221_v51  ;;  %v213_v54 = vmul.f32 %v289_v52, %v197_v37 }
 0x2f7   :  { %232 = vst.msk [vmem:[%s388_s7] sm:$0xff] %vm53_vm1, %v230_v53  ;;  %v222_v55 = vmul.f32 %v248_v48, %v213_v54 }
 0x2f9   :  { %v231_v56 = vadd.f32 %v249_v50, %v222_v55 }
 0x2fb   :  { %233 = vst.msk [vmem:[%s388_s7 + $0x8] sm:$0xff] %vm53_vm1, %v231_v56 }

// kernel: transformer_forward.15
= control target key start
LH: loop header
LB: loop body
LE: loop exit
PB: predicated region body
PF: predicated region fallthrough
CT: control target
= control target key end

     0   :  { %s1318_s29 = smov 0   ;;  %s1463_s0 = inlined_call_operand.vmem [shape: f32[2,8,32], index: 0, kind: input, shape index: {}, may-alias: {0,1}]   ;;  %s1464_s1 = inlined_call_operand.vmem [shape: f32[2,8,32], index: 1, kind: input, shape index: {}, may-alias: {0,1}]   ;;  %s1465_s2 = inlined_call_operand.vmem [shape: f32[2,1,8], index: 2, kind: input, shape index: {}]   ;;  %s1466_s3 = inlined_call_operand.vmem [shape: bf16[32,96], index: 3, kind: input, shape index: {}]   ;;  %s1467_s4 = inlined_call_operand.vmem [shape: f32[1,96], index: 4, kind: input, shape index: {}]   ;;  %s1468_s5 = inlined_call_operand.vmem [shape: bf16[32,32], index: 5, kind: input, shape index: {}]   ;;  %s1469_s6 = inlined_call_operand.vmem [shape: f32[1,32], index: 6, kind: input, shape index: {}]   ;;  %s1470_s7 = inlined_call_operand.vmem [shape: f32[1,32], index: 7, kind: input, shape index: {}]   ;;  %s1471_s8 = inlined_call_operand.vmem [shape: f32[1,32], index: 8, kind: input, shape index: {}]   ;;  %s1472_s9 = inlined_call_operand.vmem [shape: f32[2,8,32], index: 9, kind: output, shape index: {}]  }
   0x1 LB: > { %s1083_s30 = sadd.s32 4294967295, %s1249_s29   ;;  %p1087_p0 = scmp.ge.s32.totalorder %s1249_s29, 1  ;;  %s1249_s29 = sphi %s1318_s29, %s19_s29  }
   0x2   : > { %p303_p1 = scmp.lt.s32.totalorder %s1249_s29, 3 }
   0x4   : > { %p304_p2 = pnand %p1087_p0, %p303_p1 }
   0x5   : > { %v1221_v0 = vld [vmem:[%s1466_s3] sm:$0xff] (!%p304_p2)   ;;  %v1251_v1 = vmov (!%p304_p2), 0.0   ;;  %v1222_v2 = vld [vmem:[%s1466_s3 + $0x8] sm:$0xff] (!%p304_p2)   ;;  %vm1252_vm0 = vmmov (!%p304_p2), 0   ;;  %p344_p3 = scmp.lt.s32.totalorder (!%p304_p2), %s1083_s30, 1  ;;  %vm385_vm1 = vcmask (!%p304_p2), 261120   ;;  %v431_v23 = vlaneseq (!%p304_p2) }
   0x6   : > { %307 = sbr.rel (%p304_p2) target bundleno = 1811 (0x713), region = 56  ;;  %1132 = vmatprep.subr.bf16.mxu0 (!%p304_p2), %v1251_v1  ;;  %1140 = vmatprep.subr.bf16.mxu1 (!%p304_p2), %v1251_v1  ;;  %v1090_v5 = vld [vmem:[%s1467_s4] ss:$0 sm:$0xff] (!%p304_p2)  ;;  %s1253_s20 = smov (!%p304_p2), 120   ;;  %vm447_vm2 = vcmask (!%p304_p2), 64512   ;;  %v1260_v27 = vmov (!%p304_p2), 0  }
   0x7   : > { %1133 = vmatpush3.bf16.msra.mxu0 (!%p304_p2), %v1221_v0  ;;  %1136 = vmatprep.mubr.msk.bf16.mxu0 (!%p304_p2), %vm1252_vm0, %v1251_v1  ;;  %s1254_s21 = smov (!%p304_p2), 96   ;;  %s1255_s22 = smov (!%p304_p2), 80   ;;  %v432_v25 = vshrl.u32 (!%p304_p2), %v431_v23, 7  ;;  %v434_v29 = vand.u32 (!%p304_p2), 127, %v431_v23  ;;  %vm513_vm7 = vcmask (!%p304_p2), 1043456   ;;  %vm906_vm8 = vcmask (!%p304_p2), 130048  }
   0x8   : > { %1134 = vmatprep.subr.bf16.mxu0 (!%p304_p2), %v1251_v1  ;;  %1142 = vmatprep.mubr.msk.bf16.mxu1 (!%p304_p2), %vm1252_vm0, %v1251_v1  ;;  %s1256_s23 = smov (!%p304_p2), 88   ;;  %s1257_s24 = smov (!%p304_p2), 72   ;;  %vm908_vm9 = vcmask (!%p304_p2), 195584  }
   0x9   : > { %s1258_s25 = smov (!%p304_p2), 112   ;;  %s1259_s26 = smov (!%p304_p2), 104   ;;  %v439_v26 = vsub.s32 (!%p304_p2), 0, %v432_v25  ;;  %vm435_vm4 = vcmp.gt.s32.totalorder (!%p304_p2), %v434_v29, %v432_v25 }
   0xa   : > { %s1261_s10 = smov (!%p304_p2), 56   ;;  %s1262_s11 = smov (!%p304_p2), 64  }
   0xb   : > { %1135 = vmatpush3.bf16.msra.mxu0 (!%p304_p2), %v1222_v2  ;;  %s1263_s12 = smov (!%p304_p2), 40   ;;  %s1264_s13 = smov (!%p304_p2), 48  }
   0xc   : > { %1146 = vmatprep.subr.bf16.mxu0 (!%p304_p2), %v1251_v1  ;;  %s1265_s15 = smov (!%p304_p2), 8  }
   0xd   : > { %s1476_s30 = smov (!%p344_p3, %s1083_s30), 1 }
   0xe   : > { %s1088_s14 = sshll.u32 %s1476_s30, 3  ;;  %s354_s28 = scalar_lea.vmem %s1465_s2, %s1476_s30 }
   0xf   : > { %s347_s17 = scalar_lea.vmem %s1463_s0, %s1088_s14  ;;  %v429_v24 = vld [vmem:[%s354_s28] sm:$0x1] }
  0x10   : > { %v1348_v3 = vld [vmem:[%s347_s17] sm:$0xff]  ;;  %vm430_vm3 = vcmp.gt.f32.partialorder %v429_v24, 0.5 }
  0x11   : > { %v361_v4 = vpack.c.bf16 %v1348_v3, %v1348_v3  ;;  %v436_v28 = vsel %vm430_vm3, 1, %v1260_v27 }
  0x12   : > { %v440_v30 = vrot.slane %v436_v28, %v439_v26 }
  0x13   : > { %1137 = vmatmul.mubr.msk.bf16.vlgmr.msra.gmra.mrb[0].mxu0 %vm385_vm1, %v361_v4 }
  0x14   : > { %1148 = vmatprep.mubr.msk.bf16.mxu0 %vm1252_vm0, %v1251_v1  ;;  %vm441_vm5 = vcmp.eq.s32.totalorder %v440_v30, 1 }
  0x15   : > { %vm1392_vm6 = vmor %vm441_vm5, %vm435_vm4 }
  0xe6   : > { %v423_v6 = vpop.f32.mrb[0].mxu0 }
  0xe7   : > { %v424_v7 = vadd.f32 %v1090_v5, %v423_v6  ;;  %v1138_v8 = vpop.f32.mrb[1].mxu0 }
  0xe8   : > { %v426_v9 = vpop.f32.mrb[2].mxu0 }
  0xe9   : > { %v1358_v10 = vpack.c.bf16 %v424_v7, %v424_v7  ;;  %v1139_v11 = vpop.f32.mrb[3].mxu0 }
  0xeb   : > { %557 = vrot.lane.b32.xlu1 %v1358_v10, %s1253_s20  ;;  %445 = vrot.lane.b32.xlu0 %v1358_v10, %s1254_s21  ;;  %s1266_s20 = smov 16   ;;  %s1267_s21 = smov 24  }
  0xef   : > { %671 = vrot.lane.b32.xlu1 %v1358_v10, %s1255_s22  ;;  %559 = vrot.lane.b32.xlu0 %v1358_v10, %s1256_s23 }
  0xf3   : > { %783 = vrot.lane.b32.xlu1 %v1358_v10, %s1257_s24  ;;  %669 = vrot.lane.b32.xlu0 %v1358_v10, %s1258_s25 }
  0xf7   : > { %781 = vrot.lane.b32.xlu0 %v1358_v10, %s1259_s26 }
 0x15d   : > { %v446_v12 = vpop.permute.xlu0 %445  ;;  %v558_v15 = vpop.permute.xlu1 %557 }
 0x15e   : > { %v452_v13 = vsel %vm447_vm2, %v446_v12, 0 }
 0x15f   : > { %1141 = vmatpush3.bf16.xpose.msra.mxu1 %v452_v13 }
 0x160   : > { %1152 = vmatprep.subr.bf16.mxu1 %v1251_v1 }
 0x161   : > { %v560_v14 = vpop.permute.xlu0 %559  ;;  %v672_v17 = vpop.permute.xlu1 %671 }
 0x162   : > { %v565_v16 = vsel %vm447_vm2, %v560_v14, 0  ;;  %v677_v18 = vsel %vm447_vm2, %v672_v17, 0 }
 0x165   : > { %v784_v19 = vpop.permute.xlu1 %783  ;;  %v670_v20 = vpop.permute.xlu0 %669 }
 0x166   : > { %1143 = vmatmul.mubr.msk.bf16.vlgmr.msra.gmra.mrb[0].mxu1 %vm447_vm2, %v1358_v10  ;;  %v789_v21 = vsel %vm447_vm2, %v784_v19, 0 }
 0x167   : > { %1153 = vmatpush3.bf16.xpose.msra.mxu1 %v565_v16  ;;  %1154 = vmatprep.mubr.msk.bf16.mxu1 %vm1252_vm0, %v1251_v1 }
 0x168   : > { %1164 = vmatprep.subr.bf16.mxu1 %v1251_v1 }
 0x169   : > { %v782_v22 = vpop.permute.xlu0 %781 }
 0x16e   : > { %1155 = vmatmul.mubr.msk.bf16.vlgmr.msra.gmra.mrb[4].mxu1 %vm447_vm2, %v558_v15 }
 0x16f   : > { %1165 = vmatpush3.bf16.xpose.msra.mxu1 %v677_v18  ;;  %1166 = vmatprep.mubr.msk.bf16.mxu1 %vm1252_vm0, %v1251_v1 }
 0x170   : > { %1176 = vmatprep.subr.bf16.mxu1 %v1251_v1 }
 0x176   : > { %1167 = vmatmul.mubr.msk.bf16.vlgmr.msra.gmra.mrb[8].mxu1 %vm447_vm2, %v670_v20 }
 0x177   : > { %1177 = vmatpush3.bf16.xpose.msra.mxu1 %v789_v21  ;;  %1178 = vmatprep.mubr.msk.bf16.mxu1 %vm1252_vm0, %v1251_v1 }
 0x178   : > { %1188 = vmatprep.subr.bf16.mxu1 %v1251_v1 }
 0x17e   : > { %1179 = vmatmul.mubr.msk.bf16.vlgmr.msra.gmra.mrb[12].mxu1 %vm447_vm2, %v782_v22 }
 0x17f   : > { %1192 = vmatprep.mubr.msk.bf16.mxu1 %vm1252_vm0, %v1251_v1 }
 0x239   : > { %v488_v31 = vpop.f32.mrb[0].mxu1 }
 0x23a   : > { %v494_v33 = vmul.f32 0.35355338, %v488_v31  ;;  %v1144_v34 = vpop.f32.mrb[1].mxu1 }
 0x23b   : > { %v491_v35 = vpop.f32.mrb[2].mxu1 }
 0x23c   : > { %v1145_v36 = vpop.f32.mrb[3].mxu1  ;;  %v495_v37 = vsel %vm1392_vm6, -1e+09, %v494_v33 }
 0x23d   : > { %v496_v38 = vsel %vm447_vm2, %v495_v37, -inf }
 0x23e   : > { %497 = vmax.xlane.f32.xlu1 %v496_v38 }
 0x241   : > { %v601_v39 = vpop.f32.mrb[4].mxu1 }
 0x242   : > { %v607_v40 = vmul.f32 0.35355338, %v601_v39  ;;  %v1156_v41 = vpop.f32.mrb[5].mxu1 }
 0x243   : > { %v604_v42 = vpop.f32.mrb[6].mxu1 }
 0x244   : > { %v1157_v43 = vpop.f32.mrb[7].mxu1  ;;  %v608_v44 = vsel %vm1392_vm6, -1e+09, %v607_v40 }
 0x245   : > { %v609_v45 = vsel %vm447_vm2, %v608_v44, -inf }
 0x246   : > { %610 = vmax.xlane.f32.xlu0 %v609_v45 }
 0x249   : > { %v713_v46 = vpop.f32.mrb[8].mxu1 }
 0x24a   : > { %v719_v47 = vmul.f32 0.35355338, %v713_v46  ;;  %v1168_v48 = vpop.f32.mrb[9].mxu1 }
 0x24b   : > { %v716_v49 = vpop.f32.mrb[10].mxu1 }
 0x24c   : > { %v1169_v50 = vpop.f32.mrb[11].mxu1  ;;  %v720_v51 = vsel %vm1392_vm6, -1e+09, %v719_v47 }
 0x24d   : > { %v721_v52 = vsel %vm447_vm2, %v720_v51, -inf  ;;  %v1223_v50 = vld [vmem:[%s1468_s5] sm:$0xff]  }
 0x24e   : > { %722 = vmax.xlane.f32.xlu0 %v721_v52  ;;  %1189 = vmatpush3.bf16.msra.mxu1 %v1223_v50 }
 0x24f   : > { %1190 = vmatprep.subr.bf16.mxu1 %v1251_v1 }
 0x251   : > { %v825_v53 = vpop.f32.mrb[12].mxu1 }
 0x252   : > { %v831_v54 = vmul.f32 0.35355338, %v825_v53  ;;  %v1180_v55 = vpop.f32.mrb[13].mxu1 }
 0x253   : > { %v828_v56 = vpop.f32.mrb[14].mxu1 }
 0x254   : > { %v1181_v57 = vpop.f32.mrb[15].mxu1  ;;  %v832_v58 = vsel %vm1392_vm6, -1e+09, %v831_v54 }
 0x255   : > { %v833_v59 = vsel %vm447_vm2, %v832_v58, -inf }
 0x256   : > { %834 = vmax.xlane.f32.xlu1 %v833_v59 }
 0x2cb   : > { %v498_v60 = vpop.xlane.xlu1 %497 }
 0x2cc   : > { %v499_v61 = vsub.f32 %v495_v37, %v498_v60 }
 0x2ce   : > { %v500_v62 = vmul.f32 1.442695, %v499_v61 }
 0x2d0   : > { %1225 = vpow2.f32 %v500_v62 }
 0x2d3   : > { %v611_v63 = vpop.xlane.xlu0 %610 }
 0x2d4   : > { %v612_v0 = vsub.f32 %v608_v44, %v611_v63 }
 0x2d6   : > { %v613_v2 = vmul.f32 1.442695, %v612_v0 }
 0x2d8   : > { %1227 = vpow2.f32 %v613_v2 }
 0x2da   : > { %v1226_v4 = vpop.eup %1225 }
 0x2db   : > { %v723_v5 = vpop.xlane.xlu0 %722  ;;  %v502_v6 = vsel %vm447_vm2, %v1226_v4, 0.0 }
 0x2dc   : > { %v724_v7 = vsub.f32 %v720_v51, %v723_v5  ;;  %503 = vadd.xlane.f32.xlu0 %v502_v6  ;;  %v1224_v51 = vld [vmem:[%s1468_s5 + $0x8] sm:$0xff]  }
 0x2dd   : > { %1191 = vmatpush3.bf16.msra.mxu1 %v1224_v51 }
 0x2de   : > { %v725_v8 = vmul.f32 1.442695, %v724_v7 }
 0x2e0   : > { %1229 = vpow2.f32 %v725_v8 }
 0x2e2   : > { %v1228_v9 = vpop.eup %1227 }
 0x2e3   : > { %v615_v11 = vsel %vm447_vm2, %v1228_v9, 0.0  ;;  %v835_v14 = vpop.xlane.xlu1 %834 }
 0x2e4   : > { %616 = vadd.xlane.f32.xlu1 %v615_v11  ;;  %v836_v15 = vsub.f32 %v832_v58, %v835_v14 }
 0x2e6   : > { %v837_v16 = vmul.f32 1.442695, %v836_v15 }
 0x2e8   : > { %1231 = vpow2.f32 %v837_v16 }
 0x2ea   : > { %v1230_v12 = vpop.eup %1229 }
 0x2eb   : > { %v727_v13 = vsel %vm447_vm2, %v1230_v12, 0.0 }
 0x2ec   : > { %728 = vadd.xlane.f32.xlu0 %v727_v13 }
 0x2f2   : > { %v1232_v17 = vpop.eup %1231 }
 0x2f3   : > { %v839_v18 = vsel %vm447_vm2, %v1232_v17, 0.0 }
 0x2f5   : > { %621 = vrot.lane.b32.xlu1 %v1358_v10, %s1261_s10  ;;  %s358_s10 = scalar_lea.vmem %s1472_s9, %s1088_s14 }
 0x302   : > { %508 = vrot.lane.b32.xlu0 %v1358_v10, %s1262_s11 }
 0x306   : > { %845 = vrot.lane.b32.xlu0 %v1358_v10, %s1263_s12 }
 0x319   : > { %840 = vadd.xlane.f32.xlu1 %v839_v18 }
 0x32a   : > { %733 = vrot.lane.b32.xlu1 %v1358_v10, %s1264_s13 }
 0x369   : > { %v504_v19 = vpop.xlane.xlu0 %503 }
 0x36a   : > { %1233 = vrcp.f32 %v504_v19 }
 0x371   : > { %v617_v20 = vpop.xlane.xlu1 %616 }
 0x372   : > { %1235 = vrcp.f32 %v617_v20 }
 0x374   : > { %v1234_v21 = vpop.eup %1233 }
 0x375   : > { %v506_v23 = vmul.f32 %v1234_v21, %v1226_v4  ;;  %v622_v26 = vpop.permute.xlu1 %621  ;;  %v1102_v4 = vld [vmem:[%s1469_s6] ss:$0 sm:$0xff] }
 0x376   : > { %v627_v29 = vsel %vm513_vm7, %v622_v26, 0 }
 0x377   : > { %v507_v27 = vpack.c.bf16 %v506_v23, %v506_v23  ;;  %v1107_v23 = vld [vmem:[%s1471_s8] ss:$0 sm:$0xff] }
 0x379   : > { %v729_v22 = vpop.xlane.xlu0 %728 }
 0x37a   : > { %1237 = vrcp.f32 %v729_v22 }
 0x37c   : > { %v1236_v28 = vpop.eup %1235 }
 0x37d   : > { %v509_v24 = vpop.permute.xlu0 %508  ;;  %v619_v10 = vmul.f32 %v1236_v28, %v1228_v9 }
 0x37e   : > { %v515_v25 = vsel %vm513_vm7, %v509_v24, 0 }
 0x37f   : > { %1147 = vmatpush3.bf16.msra.mxu0 %v515_v25  ;;  %v620_v30 = vpack.c.bf16 %v619_v10, %v619_v10 }
 0x380   : > { %1158 = vmatprep.subr.bf16.mxu0 %v1251_v1 }
 0x381   : > { %v846_v36 = vpop.permute.xlu0 %845 }
 0x382   : > { %1149 = vmatmul.mubr.msk.bf16.vlgmr.msra.gmra.mrb[4].mxu0 %vm447_vm2, %v507_v27  ;;  %v851_v38 = vsel %vm513_vm7, %v846_v36, 0 }
 0x383   : > { %1159 = vmatpush3.bf16.msra.mxu0 %v627_v29  ;;  %1160 = vmatprep.mubr.msk.bf16.mxu0 %vm1252_vm0, %v1251_v1 }
 0x384   : > { %1170 = vmatprep.subr.bf16.mxu0 %v1251_v1  ;;  %v1238_v31 = vpop.eup %1237 }
 0x385   : > { %v731_v33 = vmul.f32 %v1238_v31, %v1230_v12 }
 0x387   : > { %v732_v37 = vpack.c.bf16 %v731_v33, %v731_v33 }
 0x38a   : > { %1161 = vmatmul.mubr.msk.bf16.vlgmr.msra.gmra.mrb[8].mxu0 %vm447_vm2, %v620_v30 }
 0x38b   : > { %1172 = vmatprep.mubr.msk.bf16.mxu0 %vm1252_vm0, %v1251_v1 }
 0x3a6   : > { %v841_v32 = vpop.xlane.xlu1 %840 }
 0x3a7   : > { %1239 = vrcp.f32 %v841_v32 }
 0x3aa   : > { %v734_v34 = vpop.permute.xlu1 %733 }
 0x3ab   : > { %v739_v35 = vsel %vm513_vm7, %v734_v34, 0 }
 0x3ac   : > { %1171 = vmatpush3.bf16.msra.mxu0 %v739_v35 }
 0x3ad   : > { %1182 = vmatprep.subr.bf16.mxu0 %v1251_v1 }
 0x3af   : > { %1173 = vmatmul.mubr.msk.bf16.vlgmr.msra.gmra.mrb[12].mxu0 %vm447_vm2, %v732_v37 }
 0x3b0   : > { %1183 = vmatpush3.bf16.msra.mxu0 %v851_v38  ;;  %1184 = vmatprep.mubr.msk.bf16.mxu0 %vm1252_vm0, %v1251_v1 }
 0x3b1   : > { %v1240_v39 = vpop.eup %1239 }
 0x3b2   : > { %v843_v40 = vmul.f32 %v1240_v39, %v1232_v17 }
 0x3b4   : > { %v844_v41 = vpack.c.bf16 %v843_v40, %v843_v40 }
 0x3b7   : > { %1185 = vmatmul.mubr.msk.bf16.vlgmr.msra.gmra.mrb[16].mxu0 %vm447_vm2, %v844_v41 }
 0x455   : > { %v551_v42 = vpop.f32.mrb[4].mxu0 }
 0x456   : > { %v1150_v43 = vpop.f32.mrb[5].mxu0 }
 0x457   : > { %v554_v44 = vpop.f32.mrb[6].mxu0 }
 0x458   : > { %v1151_v45 = vpop.f32.mrb[7].mxu0 }
 0x45d   : > { %v663_v46 = vpop.f32.mrb[8].mxu0 }
 0x45e   : > { %894 = vrot.lane.b32.xlu1 %v663_v46, %s1265_s15  ;;  %v1162_v47 = vpop.f32.mrb[9].mxu0 }
 0x45f   : > { %v666_v48 = vpop.f32.mrb[10].mxu0 }
 0x460   : > { %v1163_v49 = vpop.f32.mrb[11].mxu0 }
 0x482   : > { %v775_v52 = vpop.f32.mrb[12].mxu0 }
 0x483   : > { %898 = vrot.lane.b32.xlu0 %v775_v52, %s1266_s20  ;;  %v1174_v53 = vpop.f32.mrb[13].mxu0 }
 0x484   : > { %v778_v54 = vpop.f32.mrb[14].mxu0 }
 0x485   : > { %v1175_v55 = vpop.f32.mrb[15].mxu0 }
 0x48a   : > { %v887_v56 = vpop.f32.mrb[16].mxu0 }
 0x48b   : > { %902 = vrot.lane.b32.xlu1 %v887_v56, %s1267_s21  ;;  %v1186_v57 = vpop.f32.mrb[17].mxu0 }
 0x48c   : > { %v890_v58 = vpop.f32.mrb[18].mxu0 }
 0x48d   : > { %v1187_v59 = vpop.f32.mrb[19].mxu0 }
 0x4d0   : > { %v895_v60 = vpop.permute.xlu1 %894 }
 0x4d1   : > { %v905_v61 = vsel %vm447_vm2, %v551_v42, %v895_v60 }
 0x4f5   : > { %v899_v1 = vpop.permute.xlu0 %898 }
 0x4f6   : > { %v907_v62 = vsel %vm906_vm8, %v905_v61, %v899_v1 }
 0x4fd   : > { %v903_v63 = vpop.permute.xlu1 %902 }
 0x4fe   : > { %v909_v0 = vsel %vm908_vm9, %v907_v62, %v903_v63 }
 0x4ff   : > { %v910_v2 = vpack.c.bf16 %v909_v0, %v909_v0 }
 0x501   : > { %1193 = vmatmul.mubr.msk.bf16.vlgmr.msra.gmra.mrb[16].mxu1 %vm385_vm1, %v910_v2 }
 0x5d4   : > { %v971_v5 = vpop.f32.mrb[16].mxu1 }
 0x5d5   : > { %v972_v6 = vadd.f32 %v1102_v4, %v971_v5  ;;  %v1194_v7 = vpop.f32.mrb[17].mxu1 }
 0x5d6   : > { %v974_v8 = vpop.f32.mrb[18].mxu1 }
 0x5d7   : > { %v1195_v9 = vpop.f32.mrb[19].mxu1  ;;  %v977_v11 = vadd.f32 %v972_v6, %v1348_v3  ;;  %v1106_v3 = vld [vmem:[%s1470_s7] ss:$0 sm:$0xff] }
 0x5d9   : > { %v978_v12 = vsel %vm385_vm1, %v977_v11, 0.0 }
 0x5da   : > { %979 = vadd.xlane.f32.xlu0 %v978_v12 }
 0x667   : > { %v980_v13 = vpop.xlane.xlu0 %979 }
 0x668   : > { %v982_v14 = vmul.f32 0.03125, %v980_v13 }
 0x66a   : > { %v983_v15 = vsub.f32 %v977_v11, %v982_v14 }
 0x66c   : > { %v984_v16 = vmul.f32 %v983_v15, %v983_v15 }
 0x66e   : > { %v985_v17 = vsel %vm385_vm1, %v984_v16, 0.0 }
 0x66f   : > { %986 = vadd.xlane.f32.xlu1 %v985_v17 }
 0x6fc   : > { %v987_v18 = vpop.xlane.xlu1 %986 }
 0x6fd   : > { %v988_v19 = vmul.f32 0.03125, %v987_v18 }
 0x6ff   : > { %v989_v20 = vadd.f32 1e-05, %v988_v19 }
 0x701   : > { %1241 = vrsqrt.f32 %v989_v20 }
 0x70b   : > { %v1242_v21 = vpop.eup %1241 }
 0x70c   : > { %v991_v22 = vmul.f32 %v1242_v21, %v983_v15 }
 0x70e   : > { %v999_v24 = vmul.f32 %v1106_v3, %v991_v22 }
 0x710   : > { %v1007_v25 = vadd.f32 %v1107_v23, %v999_v24 }
 0x712   : > { %1008 = vst.msk [vmem:[%s358_s10] sm:$0xff] %vm385_vm1, %v1007_v25 }
 0x713 PF: > { %s19_s29 = sadd.s32 1, %s1249_s29  }
 0x714   : > { %p16_p4 = scmp.ge.s32.totalorder %s19_s29, 4  }
 0x716   :  { %18 = sbr.rel (!%p16_p4) target bundleno = 1 (0x1), region = 92 }

// kernel: transformer_forward.16
= control target key start
LH: loop header
LB: loop body
LE: loop exit
PB: predicated region body
PF: predicated region fallthrough
CT: control target
= control target key end

     0   :  { %s1428_s30 = smov 0   ;;  %s1592_s0 = inlined_call_operand.vmem [shape: f32[2,8,32], index: 0, kind: input, shape index: {}]   ;;  %s1593_s1 = inlined_call_operand.vmem [shape: f32[2,8,32], index: 1, kind: input, shape index: {}]   ;;  %s1594_s2 = inlined_call_operand.vmem [shape: f32[2,1,8], index: 2, kind: input, shape index: {}]   ;;  %s1595_s3 = inlined_call_operand.vmem [shape: bf16[32,96], index: 3, kind: input, shape index: {}]   ;;  %s1596_s4 = inlined_call_operand.vmem [shape: f32[1,96], index: 4, kind: input, shape index: {}]   ;;  %s1597_s5 = inlined_call_operand.vmem [shape: bf16[32,32], index: 5, kind: input, shape index: {}]   ;;  %s1598_s6 = inlined_call_operand.vmem [shape: f32[1,32], index: 6, kind: input, shape index: {}]   ;;  %s1599_s7 = inlined_call_operand.vmem [shape: f32[1,32], index: 7, kind: input, shape index: {}]   ;;  %s1600_s8 = inlined_call_operand.vmem [shape: f32[1,32], index: 8, kind: input, shape index: {}]   ;;  %s1601_s9 = inlined_call_operand.vmem [shape: f32[2,8,32], index: 9, kind: output, shape index: {}]  }
   0x1 LB: > { %s1180_s10 = sadd.s32 4294967295, %s1365_s30   ;;  %p1184_p0 = scmp.ge.s32.totalorder %s1365_s30, 1  ;;  %s1365_s30 = sphi %s1428_s30, %s19_s30  }
   0x2   : > { %p303_p1 = scmp.lt.s32.totalorder %s1365_s30, 3 }
   0x4   : > { %p304_p2 = pnand %p1184_p0, %p303_p1 }
   0x5   : > { %v1439_v0 = vld [vmem:[%s1595_s3] sm:$0xff] (!%p304_p2)   ;;  %s1367_s13 = smov (!%p304_p2), 96   ;;  %v1445_v1 = vld [vmem:[%s1595_s3 + $0x8] sm:$0xff] (!%p304_p2)   ;;  %v1368_v2 = vmov (!%p304_p2), 0.0   ;;  %p344_p3 = scmp.lt.s32.totalorder (!%p304_p2), %s1180_s10, 1  ;;  %vm1369_vm0 = vmmov (!%p304_p2), 0   ;;  %v586_v35 = vlaneseq (!%p304_p2) }
   0x6   : > { %307 = sbr.rel (%p304_p2) target bundleno = 1883 (0x75b), region = 56  ;;  %431 = vrot.lane.b32.xlu0 (!%p304_p2), %v1439_v0, %s1367_s13  ;;  %1238 = vmatprep.subr.bf16.mxu0 (!%p304_p2), %v1368_v2  ;;  %v1451_v3 = vld [vmem:[%s1596_s4] ss:$0 sm:$0xff] (!%p304_p2)  ;;  %vm387_vm1 = vcmask (!%p304_p2), 261120   ;;  %s1370_s25 = smov (!%p304_p2), 120   ;;  %vm537_vm2 = vcmask (!%p304_p2), 64512  }
   0x7   : > { %1246 = vmatprep.subr.bf16.mxu1 (!%p304_p2), %v1368_v2  ;;  %1239 = vmatpush3.bf16.msra.mxu0 (!%p304_p2), %v1439_v0  ;;  %s1371_s26 = smov (!%p304_p2), 112   ;;  %s1372_s27 = smov (!%p304_p2), 104   ;;  %v587_v37 = vshrl.u32 (!%p304_p2), %v586_v35, 7  ;;  %v1374_v39 = vmov (!%p304_p2), 0   ;;  %vm607_vm5 = vcmask (!%p304_p2), 1043456   ;;  %vm1003_vm6 = vcmask (!%p304_p2), 130048  }
   0x8   : > { %1240 = vmatprep.subr.bf16.mxu0 (!%p304_p2), %v1368_v2  ;;  %1242 = vmatprep.mubr.msk.bf16.mxu0 (!%p304_p2), %vm1369_vm0, %v1368_v2  ;;  %s1373_s28 = smov (!%p304_p2), 64   ;;  %s1375_s14 = smov (!%p304_p2), 8   ;;  %vm1005_vm7 = vcmask (!%p304_p2), 195584  }
   0x9   : > { %1250 = vmatprep.mubr.msk.bf16.mxu1 (!%p304_p2), %vm1369_vm0, %v1368_v2  ;;  %437 = vrot.lane.b32.xlu1 (!%p304_p2), %v1451_v3, %s1367_s13  ;;  %v588_v38 = vsub.s32 (!%p304_p2), 0, %v587_v37  ;;  %s1376_s17 = smov (!%p304_p2), 16   ;;  %s1377_s19 = smov (!%p304_p2), 24  }
   0xa   : > { %433 = vrot.lane.b32.xlu0 (!%p304_p2), %v1445_v1, %s1367_s13 }
   0xb   : > { %1241 = vmatpush3.bf16.msra.mxu0 (!%p304_p2), %v1445_v1 }
   0xc   : > { %1254 = vmatprep.subr.bf16.mxu0 (!%p304_p2), %v1368_v2 }
   0xd   : > { %s1603_s10 = smov (!%p344_p3, %s1180_s10), 1 }
   0xe   : > { %s1465_s18 = sshll.u32 %s1603_s10, 3  ;;  %s354_s12 = scalar_lea.vmem %s1594_s2, %s1603_s10 }
   0xf   : > { %s347_s21 = scalar_lea.vmem %s1592_s0, %s1465_s18  ;;  %s351_s24 = scalar_lea.vmem %s1593_s1, %s1465_s18  ;;  %v532_v36 = vld [vmem:[%s354_s12] sm:$0x1] }
  0x10   : > { %v1472_v4 = vld [vmem:[%s347_s21] sm:$0xff]  ;;  %vm533_vm3 = vcmp.gt.f32.partialorder %v532_v36, 0.5 }
  0x11   : > { %v361_v5 = vpack.c.bf16 %v1472_v4, %v1472_v4  ;;  %v362_v7 = vld [vmem:[%s351_s24] sm:$0xff]  ;;  %v585_v40 = vsel %vm533_vm3, 1, %v1374_v39 }
  0x12   : > { %v363_v9 = vpack.c.bf16 %v362_v7, %v362_v7  ;;  %v589_v41 = vrot.slane %v585_v40, %v588_v38 }
  0x13   : > { %1243 = vmatmul.mubr.msk.bf16.vlgmr.msra.gmra.mrb[0].mxu0 %vm387_vm1, %v361_v5 }
  0x14   : > { %1258 = vmatprep.mubr.msk.bf16.mxu0 %vm1369_vm0, %v1368_v2  ;;  %vm590_vm4 = vcmp.eq.s32.totalorder %v589_v41, 1 }
  0x78   : > { %v432_v6 = vpop.permute.xlu0 %431 }
  0x79   : > { %1247 = vmatpush3.bf16.msra.mxu1 %v432_v6 }
  0x7a   : > { %1248 = vmatprep.subr.bf16.mxu1 %v1368_v2 }
  0x7b   : > { %v438_v16 = vpop.permute.xlu1 %437 }
  0x7c   : > { %v434_v8 = vpop.permute.xlu0 %433 }
  0x7d   : > { %1249 = vmatpush3.bf16.msra.mxu1 %v434_v8 }
  0x7e   : > { %1262 = vmatprep.subr.bf16.mxu1 %v1368_v2 }
  0x80   : > { %1251 = vmatmul.mubr.msk.bf16.vlgmr.msra.gmra.mrb[0].mxu1 %vm387_vm1, %v363_v9 }
  0x81   : > { %1264 = vmatprep.mubr.msk.bf16.mxu1 %vm1369_vm0, %v1368_v2 }
  0xe6   : > { %v425_v10 = vpop.f32.mrb[0].mxu0 }
  0xe7   : > { %v426_v11 = vadd.f32 %v1451_v3, %v425_v10  ;;  %v1244_v12 = vpop.f32.mrb[1].mxu0 }
  0xe8   : > { %v428_v13 = vpop.f32.mrb[2].mxu0 }
  0xe9   : > { %v534_v14 = vpack.c.bf16 %v426_v11, %v426_v11  ;;  %v1245_v15 = vpop.f32.mrb[3].mxu0 }
  0xeb   : > { %652 = vrot.lane.b32.xlu0 %v534_v14, %s1370_s25 }
  0xef   : > { %766 = vrot.lane.b32.xlu0 %v534_v14, %s1371_s26 }
  0xf3   : > { %878 = vrot.lane.b32.xlu0 %v534_v14, %s1372_s27 }
  0xf7   : > { %485 = vrot.lane.b32.xlu0 %v1445_v1, %s1373_s28 }
 0x153   : > { %v477_v17 = vpop.f32.mrb[0].mxu1 }
 0x154   : > { %v478_v18 = vadd.f32 %v477_v17, %v438_v16  ;;  %v1252_v19 = vpop.f32.mrb[1].mxu1 }
 0x155   : > { %v480_v20 = vpop.f32.mrb[2].mxu1 }
 0x156   : > { %v535_v21 = vpack.c.bf16 %v478_v18, %v478_v18  ;;  %v1253_v22 = vpop.f32.mrb[3].mxu1 }
 0x158   : > { %655 = vrot.lane.b32.xlu1 %v535_v21, %s1370_s25  ;;  %v542_v23 = vsel %vm537_vm2, %v535_v21, 0 }
 0x159   : > { %1263 = vmatpush3.bf16.xpose.msra.mxu1 %v542_v23 }
 0x15a   : > { %1274 = vmatprep.subr.bf16.mxu1 %v1368_v2 }
 0x15c   : > { %768 = vrot.lane.b32.xlu1 %v535_v21, %s1371_s26 }
 0x15d   : > { %v653_v24 = vpop.permute.xlu0 %652 }
 0x160   : > { %880 = vrot.lane.b32.xlu1 %v535_v21, %s1372_s27  ;;  %1265 = vmatmul.mubr.msk.bf16.vlgmr.msra.gmra.mrb[4].mxu1 %vm537_vm2, %v534_v14 }
 0x161   : > { %1276 = vmatprep.mubr.msk.bf16.mxu1 %vm1369_vm0, %v1368_v2  ;;  %v767_v28 = vpop.permute.xlu0 %766 }
 0x164   : > { %483 = vrot.lane.b32.xlu1 %v1439_v0, %s1373_s28 }
 0x165   : > { %v879_v31 = vpop.permute.xlu0 %878 }
 0x169   : > { %v486_v33 = vpop.permute.xlu0 %485 }
 0x1ca   : > { %v656_v25 = vpop.permute.xlu1 %655 }
 0x1cb   : > { %v661_v26 = vsel %vm537_vm2, %v656_v25, 0 }
 0x1cc   : > { %1275 = vmatpush3.bf16.xpose.msra.mxu1 %v661_v26 }
 0x1cd   : > { %1286 = vmatprep.subr.bf16.mxu1 %v1368_v2 }
 0x1ce   : > { %v769_v27 = vpop.permute.xlu1 %768 }
 0x1cf   : > { %v774_v30 = vsel %vm537_vm2, %v769_v27, 0 }
 0x1d2   : > { %v881_v29 = vpop.permute.xlu1 %880 }
 0x1d3   : > { %1277 = vmatmul.mubr.msk.bf16.vlgmr.msra.gmra.mrb[8].mxu1 %vm537_vm2, %v653_v24  ;;  %v886_v34 = vsel %vm537_vm2, %v881_v29, 0 }
 0x1d4   : > { %1287 = vmatpush3.bf16.xpose.msra.mxu1 %v774_v30  ;;  %1288 = vmatprep.mubr.msk.bf16.mxu1 %vm1369_vm0, %v1368_v2 }
 0x1d5   : > { %1298 = vmatprep.subr.bf16.mxu1 %v1368_v2 }
 0x1d6   : > { %v484_v32 = vpop.permute.xlu1 %483 }
 0x1d7   : > { %1255 = vmatpush3.bf16.msra.mxu0 %v484_v32 }
 0x1d8   : > { %1256 = vmatprep.subr.bf16.mxu0 %v1368_v2 }
 0x1db   : > { %1289 = vmatmul.mubr.msk.bf16.vlgmr.msra.gmra.mrb[12].mxu1 %vm537_vm2, %v767_v28  ;;  %1257 = vmatpush3.bf16.msra.mxu0 %v486_v33 }
 0x1dc   : > { %1299 = vmatpush3.bf16.xpose.msra.mxu1 %v886_v34  ;;  %1300 = vmatprep.mubr.msk.bf16.mxu1 %vm1369_vm0, %v1368_v2 }
 0x1dd   : > { %1268 = vmatprep.subr.bf16.mxu0 %v1368_v2  ;;  %1310 = vmatprep.subr.bf16.mxu1 %v1368_v2 }
 0x1de   : > { %1259 = vmatmul.mubr.msk.bf16.vlgmr.msra.gmra.mrb[4].mxu0 %vm387_vm1, %v363_v9 }
 0x1df   : > { %1270 = vmatprep.mubr.msk.bf16.mxu0 %vm1369_vm0, %v1368_v2 }
 0x1e3   : > { %1301 = vmatmul.mubr.msk.bf16.vlgmr.msra.gmra.mrb[16].mxu1 %vm537_vm2, %v879_v31 }
 0x1e4   : > { %1314 = vmatprep.mubr.msk.bf16.mxu1 %vm1369_vm0, %v1368_v2 }
 0x233   : > { %v578_v42 = vpop.f32.mrb[4].mxu1 }
 0x234   : > { %v584_v43 = vmul.f32 0.35355338, %v578_v42  ;;  %v1266_v44 = vpop.f32.mrb[5].mxu1 }
 0x235   : > { %v581_v45 = vpop.f32.mrb[6].mxu1 }
 0x236   : > { %v1267_v46 = vpop.f32.mrb[7].mxu1  ;;  %v591_v47 = vsel %vm590_vm4, -1e+09, %v584_v43 }
 0x237   : > { %v592_v48 = vsel %vm537_vm2, %v591_v47, -inf }
 0x238   : > { %593 = vmax.xlane.f32.xlu1 %v592_v48 }
 0x2a6   : > { %v697_v49 = vpop.f32.mrb[8].mxu1 }
 0x2a7   : > { %v703_v50 = vmul.f32 0.35355338, %v697_v49  ;;  %v1278_v51 = vpop.f32.mrb[9].mxu1 }
 0x2a8   : > { %v700_v52 = vpop.f32.mrb[10].mxu1 }
 0x2a9   : > { %v1279_v53 = vpop.f32.mrb[11].mxu1  ;;  %v704_v54 = vsel %vm590_vm4, -1e+09, %v703_v50 }
 0x2aa   : > { %v705_v55 = vsel %vm537_vm2, %v704_v54, -inf }
 0x2ab   : > { %706 = vmax.xlane.f32.xlu0 %v705_v55 }
 0x2ae   : > { %v810_v56 = vpop.f32.mrb[12].mxu1 }
 0x2af   : > { %v816_v57 = vmul.f32 0.35355338, %v810_v56  ;;  %v1290_v58 = vpop.f32.mrb[13].mxu1 }
 0x2b0   : > { %v813_v59 = vpop.f32.mrb[14].mxu1 }
 0x2b1   : > { %v1291_v60 = vpop.f32.mrb[15].mxu1  ;;  %v817_v61 = vsel %vm590_vm4, -1e+09, %v816_v57  ;;  %v526_v14 = vpop.f32.mrb[4].mxu0 }
 0x2b2   : > { %v818_v62 = vsel %vm537_vm2, %v817_v61, -inf  ;;  %v1260_v15 = vpop.f32.mrb[5].mxu0 }
 0x2b3   : > { %819 = vmax.xlane.f32.xlu0 %v818_v62  ;;  %v529_v16 = vpop.f32.mrb[6].mxu0  ;;  %v1339_v62 = vld [vmem:[%s1597_s5] sm:$0xff]  }
 0x2b4   : > { %v1261_v17 = vpop.f32.mrb[7].mxu0  ;;  %1311 = vmatpush3.bf16.msra.mxu1 %v1339_v62 }
 0x2b5   : > { %1312 = vmatprep.subr.bf16.mxu1 %v1368_v2 }
 0x2b6   : > { %v922_v63 = vpop.f32.mrb[16].mxu1 }
 0x2b7   : > { %v928_v0 = vmul.f32 0.35355338, %v922_v63  ;;  %v1302_v1 = vpop.f32.mrb[17].mxu1 }
 0x2b8   : > { %v925_v5 = vpop.f32.mrb[18].mxu1 }
 0x2b9   : > { %v1303_v6 = vpop.f32.mrb[19].mxu1  ;;  %v929_v7 = vsel %vm590_vm4, -1e+09, %v928_v0 }
 0x2ba   : > { %v930_v8 = vsel %vm537_vm2, %v929_v7, -inf  ;;  %v1340_v6 = vld [vmem:[%s1597_s5 + $0x8] sm:$0xff]  }
 0x2bb   : > { %931 = vmax.xlane.f32.xlu1 %v930_v8  ;;  %1313 = vmatpush3.bf16.msra.mxu1 %v1340_v6 }
 0x2c5   : > { %v594_v9 = vpop.xlane.xlu1 %593 }
 0x2c6   : > { %v595_v10 = vsub.f32 %v591_v47, %v594_v9 }
 0x2c8   : > { %v596_v11 = vmul.f32 1.442695, %v595_v10 }
 0x2c9   : > { %489 = vrot.lane.b32.xlu0 %v1451_v3, %s1373_s28  ;;  %s358_s28 = scalar_lea.vmem %s1601_s9, %s1465_s18 }
 0x2ca   : > { %1341 = vpow2.f32 %v596_v11 }
 0x2d4   : > { %v1342_v12 = vpop.eup %1341 }
 0x2d5   : > { %v598_v13 = vsel %vm537_vm2, %v1342_v12, 0.0 }
 0x2d6   : > { %599 = vadd.xlane.f32.xlu1 %v598_v13 }
 0x338   : > { %v707_v18 = vpop.xlane.xlu0 %706 }
 0x339   : > { %v708_v19 = vsub.f32 %v704_v54, %v707_v18 }
 0x33b   : > { %v709_v20 = vmul.f32 1.442695, %v708_v19 }
 0x33d   : > { %1343 = vpow2.f32 %v709_v20 }
 0x340   : > { %v820_v21 = vpop.xlane.xlu0 %819 }
 0x341   : > { %v821_v22 = vsub.f32 %v817_v61, %v820_v21  ;;  %v1202_v21 = vld [vmem:[%s1598_s6] ss:$0 sm:$0xff] }
 0x343   : > { %v822_v23 = vmul.f32 1.442695, %v821_v22 }
 0x344   : > { %v490_v24 = vpop.permute.xlu0 %489 }
 0x345   : > { %1345 = vpow2.f32 %v822_v23  ;;  %v527_v25 = vadd.f32 %v526_v14, %v490_v24 }
 0x347   : > { %v1344_v3 = vpop.eup %1343  ;;  %v536_v26 = vpack.c.bf16 %v527_v25, %v527_v25 }
 0x348   : > { %v932_v27 = vpop.xlane.xlu1 %931  ;;  %v711_v28 = vsel %vm537_vm2, %v1344_v3, 0.0 }
 0x349   : > { %v933_v29 = vsub.f32 %v929_v7, %v932_v27  ;;  %712 = vadd.xlane.f32.xlu1 %v711_v28  ;;  %v609_v30 = vsel %vm607_vm5, %v536_v26, 0  ;;  %830 = vrot.lane.b32.xlu0 %v536_v26, %s1371_s26 }
 0x34a   : > { %1269 = vmatpush3.bf16.msra.mxu0 %v609_v30 }
 0x34b   : > { %v934_v31 = vmul.f32 1.442695, %v933_v29  ;;  %1280 = vmatprep.subr.bf16.mxu0 %v1368_v2 }
 0x34d   : > { %1347 = vpow2.f32 %v934_v31  ;;  %942 = vrot.lane.b32.xlu0 %v536_v26, %s1372_s27 }
 0x34f   : > { %v1346_v32 = vpop.eup %1345 }
 0x350   : > { %v824_v33 = vsel %vm537_vm2, %v1346_v32, 0.0 }
 0x351   : > { %825 = vadd.xlane.f32.xlu1 %v824_v33 }
 0x357   : > { %v1348_v34 = vpop.eup %1347 }
 0x358   : > { %v936_v35 = vsel %vm537_vm2, %v1348_v34, 0.0 }
 0x359   : > { %937 = vadd.xlane.f32.xlu1 %v936_v35 }
 0x363   : > { %v600_v36 = vpop.xlane.xlu1 %599 }
 0x364   : > { %1349 = vrcp.f32 %v600_v36 }
 0x36a   : > { %718 = vrot.lane.b32.xlu1 %v536_v26, %s1370_s25 }
 0x36e   : > { %v1350_v37 = vpop.eup %1349 }
 0x36f   : > { %v602_v38 = vmul.f32 %v1350_v37, %v1342_v12 }
 0x371   : > { %v603_v39 = vpack.c.bf16 %v602_v38, %v602_v38  ;;  %v1207_v38 = vld [vmem:[%s1600_s8] ss:$0 sm:$0xff] }
 0x373   : > { %1271 = vmatmul.mubr.msk.bf16.vlgmr.msra.gmra.mrb[8].mxu0 %vm537_vm2, %v603_v39 }
 0x374   : > { %1282 = vmatprep.mubr.msk.bf16.mxu0 %vm1369_vm0, %v1368_v2 }
 0x3bb   : > { %v831_v49 = vpop.permute.xlu0 %830 }
 0x3bc   : > { %v836_v50 = vsel %vm607_vm5, %v831_v49, 0 }
 0x3bf   : > { %v943_v52 = vpop.permute.xlu0 %942 }
 0x3c0   : > { %v948_v55 = vsel %vm607_vm5, %v943_v52, 0 }
 0x3d6   : > { %v713_v40 = vpop.xlane.xlu1 %712 }
 0x3d7   : > { %1351 = vrcp.f32 %v713_v40 }
 0x3de   : > { %v826_v41 = vpop.xlane.xlu1 %825 }
 0x3df   : > { %1353 = vrcp.f32 %v826_v41 }
 0x3e1   : > { %v1352_v42 = vpop.eup %1351 }
 0x3e2   : > { %v715_v44 = vmul.f32 %v1352_v42, %v1344_v3 }
 0x3e4   : > { %v716_v47 = vpack.c.bf16 %v715_v44, %v715_v44 }
 0x3e6   : > { %v938_v43 = vpop.xlane.xlu1 %937 }
 0x3e7   : > { %1355 = vrcp.f32 %v938_v43 }
 0x3e9   : > { %v1354_v48 = vpop.eup %1353 }
 0x3ea   : > { %v719_v45 = vpop.permute.xlu1 %718  ;;  %v828_v51 = vmul.f32 %v1354_v48, %v1346_v32 }
 0x3eb   : > { %v724_v46 = vsel %vm607_vm5, %v719_v45, 0 }
 0x3ec   : > { %1281 = vmatpush3.bf16.msra.mxu0 %v724_v46  ;;  %v829_v53 = vpack.c.bf16 %v828_v51, %v828_v51 }
 0x3ed   : > { %1292 = vmatprep.subr.bf16.mxu0 %v1368_v2 }
 0x3ef   : > { %1283 = vmatmul.mubr.msk.bf16.vlgmr.msra.gmra.mrb[12].mxu0 %vm537_vm2, %v716_v47 }
 0x3f0   : > { %1293 = vmatpush3.bf16.msra.mxu0 %v836_v50  ;;  %1294 = vmatprep.mubr.msk.bf16.mxu0 %vm1369_vm0, %v1368_v2 }
 0x3f1   : > { %1304 = vmatprep.subr.bf16.mxu0 %v1368_v2  ;;  %v1356_v54 = vpop.eup %1355 }
 0x3f2   : > { %v940_v56 = vmul.f32 %v1356_v54, %v1348_v34 }
 0x3f4   : > { %v941_v57 = vpack.c.bf16 %v940_v56, %v940_v56 }
 0x3f7   : > { %1295 = vmatmul.mubr.msk.bf16.vlgmr.msra.gmra.mrb[16].mxu0 %vm537_vm2, %v829_v53 }
 0x3f8   : > { %1305 = vmatpush3.bf16.msra.mxu0 %v948_v55  ;;  %1306 = vmatprep.mubr.msk.bf16.mxu0 %vm1369_vm0, %v1368_v2 }
 0x3ff   : > { %1307 = vmatmul.mubr.msk.bf16.vlgmr.msra.gmra.mrb[20].mxu0 %vm537_vm2, %v941_v57 }
 0x446   : > { %v645_v58 = vpop.f32.mrb[8].mxu0 }
 0x447   : > { %v1272_v59 = vpop.f32.mrb[9].mxu0 }
 0x448   : > { %v648_v60 = vpop.f32.mrb[10].mxu0 }
 0x449   : > { %v1273_v61 = vpop.f32.mrb[11].mxu0 }
 0x4c2   : > { %v760_v63 = vpop.f32.mrb[12].mxu0 }
 0x4c3   : > { %991 = vrot.lane.b32.xlu0 %v760_v63, %s1375_s14  ;;  %v1284_v0 = vpop.f32.mrb[13].mxu0 }
 0x4c4   : > { %v763_v1 = vpop.f32.mrb[14].mxu0 }
 0x4c5   : > { %v1285_v5 = vpop.f32.mrb[15].mxu0 }
 0x4ca   : > { %v872_v7 = vpop.f32.mrb[16].mxu0 }
 0x4cb   : > { %995 = vrot.lane.b32.xlu0 %v872_v7, %s1376_s17  ;;  %v1296_v8 = vpop.f32.mrb[17].mxu0 }
 0x4cc   : > { %v875_v9 = vpop.f32.mrb[18].mxu0 }
 0x4cd   : > { %v1297_v10 = vpop.f32.mrb[19].mxu0 }
 0x4d2   : > { %v984_v11 = vpop.f32.mrb[20].mxu0 }
 0x4d3   : > { %999 = vrot.lane.b32.xlu1 %v984_v11, %s1377_s19  ;;  %v1308_v2 = vpop.f32.mrb[21].mxu0 }
 0x4d4   : > { %v987_v12 = vpop.f32.mrb[22].mxu0 }
 0x4d5   : > { %v1309_v13 = vpop.f32.mrb[23].mxu0 }
 0x535   : > { %v992_v14 = vpop.permute.xlu0 %991 }
 0x536   : > { %v1002_v16 = vsel %vm537_vm2, %v645_v58, %v992_v14 }
 0x53d   : > { %v996_v15 = vpop.permute.xlu0 %995 }
 0x53e   : > { %v1004_v17 = vsel %vm1003_vm6, %v1002_v16, %v996_v15 }
 0x545   : > { %v1000_v18 = vpop.permute.xlu1 %999 }
 0x546   : > { %v1006_v19 = vsel %vm1005_vm7, %v1004_v17, %v1000_v18 }
 0x547   : > { %v1007_v20 = vpack.c.bf16 %v1006_v19, %v1006_v19 }
 0x549   : > { %1315 = vmatmul.mubr.msk.bf16.vlgmr.msra.gmra.mrb[20].mxu1 %vm387_vm1, %v1007_v20 }
 0x61c   : > { %v1068_v22 = vpop.f32.mrb[20].mxu1 }
 0x61d   : > { %v1069_v23 = vadd.f32 %v1202_v21, %v1068_v22  ;;  %v1316_v24 = vpop.f32.mrb[21].mxu1 }
 0x61e   : > { %v1071_v25 = vpop.f32.mrb[22].mxu1 }
 0x61f   : > { %v1317_v3 = vpop.f32.mrb[23].mxu1  ;;  %v1074_v26 = vadd.f32 %v1069_v23, %v1472_v4  ;;  %v1206_v4 = vld [vmem:[%s1599_s7] ss:$0 sm:$0xff] }
 0x621   : > { %v1075_v27 = vsel %vm387_vm1, %v1074_v26, 0.0 }
 0x622   : > { %1076 = vadd.xlane.f32.xlu0 %v1075_v27 }
 0x6af   : > { %v1077_v28 = vpop.xlane.xlu0 %1076 }
 0x6b0   : > { %v1079_v29 = vmul.f32 0.03125, %v1077_v28 }
 0x6b2   : > { %v1080_v30 = vsub.f32 %v1074_v26, %v1079_v29 }
 0x6b4   : > { %v1081_v31 = vmul.f32 %v1080_v30, %v1080_v30 }
 0x6b6   : > { %v1082_v32 = vsel %vm387_vm1, %v1081_v31, 0.0 }
 0x6b7   : > { %1083 = vadd.xlane.f32.xlu1 %v1082_v32 }
 0x744   : > { %v1084_v33 = vpop.xlane.xlu1 %1083 }
 0x745   : > { %v1085_v34 = vmul.f32 0.03125, %v1084_v33 }
 0x747   : > { %v1086_v35 = vadd.f32 1e-05, %v1085_v34 }
 0x749   : > { %1357 = vrsqrt.f32 %v1086_v35 }
 0x753   : > { %v1358_v36 = vpop.eup %1357 }
 0x754   : > { %v1088_v37 = vmul.f32 %v1358_v36, %v1080_v30 }
 0x756   : > { %v1096_v39 = vmul.f32 %v1206_v4, %v1088_v37 }
 0x758   : > { %v1104_v40 = vadd.f32 %v1207_v38, %v1096_v39 }
 0x75a   : > { %1105 = vst.msk [vmem:[%s358_s28] sm:$0xff] %vm387_vm1, %v1104_v40 }
 0x75b PF: > { %s19_s30 = sadd.s32 1, %s1365_s30  }
 0x75c   : > { %p16_p4 = scmp.ge.s32.totalorder %s19_s30, 4  }
 0x75e   :  { %18 = sbr.rel (!%p16_p4) target bundleno = 1 (0x1), region = 92 }

// kernel: transformer_forward.11
= control target key start
LH: loop header
LB: loop body
LE: loop exit
PB: predicated region body
PF: predicated region fallthrough
CT: control target
= control target key end

     0   :  { %s1312_s29 = smov 0   ;;  %s1449_s0 = inlined_call_operand.vmem [shape: f32[2,8,32], index: 0, kind: input, shape index: {}, may-alias: {0,1}]   ;;  %s1450_s1 = inlined_call_operand.vmem [shape: f32[2,8,32], index: 1, kind: input, shape index: {}, may-alias: {0,1}]   ;;  %s1451_s2 = inlined_call_operand.vmem [shape: f32[2,1,8], index: 2, kind: input, shape index: {}]   ;;  %s1452_s3 = inlined_call_operand.vmem [shape: bf16[32,96], index: 3, kind: input, shape index: {}]   ;;  %s1453_s4 = inlined_call_operand.vmem [shape: f32[1,96], index: 4, kind: input, shape index: {}]   ;;  %s1454_s5 = inlined_call_operand.vmem [shape: bf16[32,32], index: 5, kind: input, shape index: {}]   ;;  %s1455_s6 = inlined_call_operand.vmem [shape: f32[1,32], index: 6, kind: input, shape index: {}]   ;;  %s1456_s7 = inlined_call_operand.vmem [shape: f32[1,32], index: 7, kind: input, shape index: {}]   ;;  %s1457_s8 = inlined_call_operand.vmem [shape: f32[1,32], index: 8, kind: input, shape index: {}]   ;;  %s1458_s9 = inlined_call_operand.vmem [shape: f32[2,8,32], index: 9, kind: output, shape index: {}]  }
   0x1 LB: > { %s1077_s30 = sadd.s32 4294967295, %s1243_s29   ;;  %p1081_p0 = scmp.ge.s32.totalorder %s1243_s29, 1  ;;  %s1243_s29 = sphi %s1312_s29, %s19_s29  }
   0x2   : > { %p303_p1 = scmp.lt.s32.totalorder %s1243_s29, 3 }
   0x4   : > { %p304_p2 = pnand %p1081_p0, %p303_p1 }
   0x5   : > { %v1215_v0 = vld [vmem:[%s1452_s3] sm:$0xff] (!%p304_p2)   ;;  %v1245_v1 = vmov (!%p304_p2), 0.0   ;;  %v1216_v2 = vld [vmem:[%s1452_s3 + $0x8] sm:$0xff] (!%p304_p2)   ;;  %vm1246_vm0 = vmmov (!%p304_p2), 0   ;;  %p344_p3 = scmp.lt.s32.totalorder (!%p304_p2), %s1077_s30, 1  ;;  %vm385_vm1 = vcmask (!%p304_p2), 261120   ;;  %v484_v23 = vlaneseq (!%p304_p2) }
   0x6   : > { %307 = sbr.rel (%p304_p2) target bundleno = 1811 (0x713), region = 56  ;;  %1126 = vmatprep.subr.bf16.mxu0 (!%p304_p2), %v1245_v1  ;;  %1134 = vmatprep.subr.bf16.mxu1 (!%p304_p2), %v1245_v1  ;;  %v1084_v5 = vld [vmem:[%s1453_s4] ss:$0 sm:$0xff] (!%p304_p2)  ;;  %s1247_s20 = smov (!%p304_p2), 120   ;;  %vm435_vm2 = vcmask (!%p304_p2), 64512   ;;  %v1254_v27 = vmov (!%p304_p2), 0  }
   0x7   : > { %1127 = vmatpush3.bf16.msra.mxu0 (!%p304_p2), %v1215_v0  ;;  %1130 = vmatprep.mubr.msk.bf16.mxu0 (!%p304_p2), %vm1246_vm0, %v1245_v1  ;;  %s1248_s21 = smov (!%p304_p2), 96   ;;  %s1249_s22 = smov (!%p304_p2), 80   ;;  %v485_v25 = vshrl.u32 (!%p304_p2), %v484_v23, 7  ;;  %vm507_vm5 = vcmask (!%p304_p2), 1043456   ;;  %vm900_vm6 = vcmask (!%p304_p2), 130048   ;;  %vm902_vm7 = vcmask (!%p304_p2), 195584  }
   0x8   : > { %1128 = vmatprep.subr.bf16.mxu0 (!%p304_p2), %v1245_v1  ;;  %1136 = vmatprep.mubr.msk.bf16.mxu1 (!%p304_p2), %vm1246_vm0, %v1245_v1  ;;  %s1250_s23 = smov (!%p304_p2), 88   ;;  %s1251_s24 = smov (!%p304_p2), 72  }
   0x9   : > { %s1252_s25 = smov (!%p304_p2), 112   ;;  %s1253_s26 = smov (!%p304_p2), 104   ;;  %v486_v26 = vsub.s32 (!%p304_p2), 0, %v485_v25 }
   0xa   : > { %s1255_s10 = smov (!%p304_p2), 56   ;;  %s1256_s11 = smov (!%p304_p2), 64  }
   0xb   : > { %1129 = vmatpush3.bf16.msra.mxu0 (!%p304_p2), %v1216_v2  ;;  %s1257_s12 = smov (!%p304_p2), 40   ;;  %s1258_s13 = smov (!%p304_p2), 48  }
   0xc   : > { %1140 = vmatprep.subr.bf16.mxu0 (!%p304_p2), %v1245_v1  ;;  %s1259_s15 = smov (!%p304_p2), 8  }
   0xd   : > { %s1460_s30 = smov (!%p344_p3, %s1077_s30), 1 }
   0xe   : > { %s1082_s14 = sshll.u32 %s1460_s30, 3  ;;  %s354_s28 = scalar_lea.vmem %s1451_s2, %s1460_s30 }
   0xf   : > { %s347_s17 = scalar_lea.vmem %s1449_s0, %s1082_s14  ;;  %v429_v24 = vld [vmem:[%s354_s28] sm:$0x1] }
  0x10   : > { %v1342_v3 = vld [vmem:[%s347_s17] sm:$0xff]  ;;  %vm430_vm3 = vcmp.gt.f32.partialorder %v429_v24, 0.5 }
  0x11   : > { %v361_v4 = vpack.c.bf16 %v1342_v3, %v1342_v3  ;;  %v483_v28 = vsel %vm430_vm3, 1, %v1254_v27 }
  0x12   : > { %v487_v29 = vrot.slane %v483_v28, %v486_v26 }
  0x13   : > { %1131 = vmatmul.mubr.msk.bf16.vlgmr.msra.gmra.mrb[0].mxu0 %vm385_vm1, %v361_v4 }
  0x14   : > { %1142 = vmatprep.mubr.msk.bf16.mxu0 %vm1246_vm0, %v1245_v1  ;;  %vm488_vm4 = vcmp.eq.s32.totalorder %v487_v29, 1 }
  0xe6   : > { %v423_v6 = vpop.f32.mrb[0].mxu0 }
  0xe7   : > { %v424_v7 = vadd.f32 %v1084_v5, %v423_v6  ;;  %v1132_v8 = vpop.f32.mrb[1].mxu0 }
  0xe8   : > { %v426_v9 = vpop.f32.mrb[2].mxu0 }
  0xe9   : > { %v1352_v10 = vpack.c.bf16 %v424_v7, %v424_v7  ;;  %v1133_v11 = vpop.f32.mrb[3].mxu0 }
  0xeb   : > { %551 = vrot.lane.b32.xlu1 %v1352_v10, %s1247_s20  ;;  %433 = vrot.lane.b32.xlu0 %v1352_v10, %s1248_s21  ;;  %s1260_s20 = smov 16   ;;  %s1261_s21 = smov 24  }
  0xef   : > { %665 = vrot.lane.b32.xlu1 %v1352_v10, %s1249_s22  ;;  %553 = vrot.lane.b32.xlu0 %v1352_v10, %s1250_s23 }
  0xf3   : > { %777 = vrot.lane.b32.xlu1 %v1352_v10, %s1251_s24  ;;  %663 = vrot.lane.b32.xlu0 %v1352_v10, %s1252_s25 }
  0xf7   : > { %775 = vrot.lane.b32.xlu0 %v1352_v10, %s1253_s26 }
 0x15d   : > { %v434_v12 = vpop.permute.xlu0 %433  ;;  %v552_v15 = vpop.permute.xlu1 %551 }
 0x15e   : > { %v440_v13 = vsel %vm435_vm2, %v434_v12, 0 }
 0x15f   : > { %1135 = vmatpush3.bf16.xpose.msra.mxu1 %v440_v13 }
 0x160   : > { %1146 = vmatprep.subr.bf16.mxu1 %v1245_v1 }
 0x161   : > { %v554_v14 = vpop.permute.xlu0 %553  ;;  %v666_v17 = vpop.permute.xlu1 %665 }
 0x162   : > { %v559_v16 = vsel %vm435_vm2, %v554_v14, 0  ;;  %v671_v18 = vsel %vm435_vm2, %v666_v17, 0 }
 0x165   : > { %v778_v19 = vpop.permute.xlu1 %777  ;;  %v664_v20 = vpop.permute.xlu0 %663 }
 0x166   : > { %1137 = vmatmul.mubr.msk.bf16.vlgmr.msra.gmra.mrb[0].mxu1 %vm435_vm2, %v1352_v10  ;;  %v783_v21 = vsel %vm435_vm2, %v778_v19, 0 }
 0x167   : > { %1147 = vmatpush3.bf16.xpose.msra.mxu1 %v559_v16  ;;  %1148 = vmatprep.mubr.msk.bf16.mxu1 %vm1246_vm0, %v1245_v1 }
 0x168   : > { %1158 = vmatprep.subr.bf16.mxu1 %v1245_v1 }
 0x169   : > { %v776_v22 = vpop.permute.xlu0 %775 }
 0x16e   : > { %1149 = vmatmul.mubr.msk.bf16.vlgmr.msra.gmra.mrb[4].mxu1 %vm435_vm2, %v552_v15 }
 0x16f   : > { %1159 = vmatpush3.bf16.xpose.msra.mxu1 %v671_v18  ;;  %1160 = vmatprep.mubr.msk.bf16.mxu1 %vm1246_vm0, %v1245_v1 }
 0x170   : > { %1170 = vmatprep.subr.bf16.mxu1 %v1245_v1 }
 0x176   : > { %1161 = vmatmul.mubr.msk.bf16.vlgmr.msra.gmra.mrb[8].mxu1 %vm435_vm2, %v664_v20 }
 0x177   : > { %1171 = vmatpush3.bf16.xpose.msra.mxu1 %v783_v21  ;;  %1172 = vmatprep.mubr.msk.bf16.mxu1 %vm1246_vm0, %v1245_v1 }
 0x178   : > { %1182 = vmatprep.subr.bf16.mxu1 %v1245_v1 }
 0x17e   : > { %1173 = vmatmul.mubr.msk.bf16.vlgmr.msra.gmra.mrb[12].mxu1 %vm435_vm2, %v776_v22 }
 0x17f   : > { %1186 = vmatprep.mubr.msk.bf16.mxu1 %vm1246_vm0, %v1245_v1 }
 0x239   : > { %v476_v30 = vpop.f32.mrb[0].mxu1 }
 0x23a   : > { %v482_v31 = vmul.f32 0.35355338, %v476_v30  ;;  %v1138_v32 = vpop.f32.mrb[1].mxu1 }
 0x23b   : > { %v479_v33 = vpop.f32.mrb[2].mxu1 }
 0x23c   : > { %v1139_v34 = vpop.f32.mrb[3].mxu1  ;;  %v489_v35 = vsel %vm488_vm4, -1e+09, %v482_v31 }
 0x23d   : > { %v490_v36 = vsel %vm435_vm2, %v489_v35, -inf }
 0x23e   : > { %491 = vmax.xlane.f32.xlu1 %v490_v36 }
 0x241   : > { %v595_v37 = vpop.f32.mrb[4].mxu1 }
 0x242   : > { %v601_v38 = vmul.f32 0.35355338, %v595_v37  ;;  %v1150_v39 = vpop.f32.mrb[5].mxu1 }
 0x243   : > { %v598_v40 = vpop.f32.mrb[6].mxu1 }
 0x244   : > { %v1151_v41 = vpop.f32.mrb[7].mxu1  ;;  %v602_v42 = vsel %vm488_vm4, -1e+09, %v601_v38 }
 0x245   : > { %v603_v43 = vsel %vm435_vm2, %v602_v42, -inf }
 0x246   : > { %604 = vmax.xlane.f32.xlu0 %v603_v43 }
 0x249   : > { %v707_v44 = vpop.f32.mrb[8].mxu1 }
 0x24a   : > { %v713_v45 = vmul.f32 0.35355338, %v707_v44  ;;  %v1162_v46 = vpop.f32.mrb[9].mxu1 }
 0x24b   : > { %v710_v47 = vpop.f32.mrb[10].mxu1 }
 0x24c   : > { %v1163_v48 = vpop.f32.mrb[11].mxu1  ;;  %v714_v49 = vsel %vm488_vm4, -1e+09, %v713_v45 }
 0x24d   : > { %v715_v50 = vsel %vm435_vm2, %v714_v49, -inf  ;;  %v1217_v48 = vld [vmem:[%s1454_s5] sm:$0xff]  }
 0x24e   : > { %716 = vmax.xlane.f32.xlu0 %v715_v50  ;;  %1183 = vmatpush3.bf16.msra.mxu1 %v1217_v48 }
 0x24f   : > { %1184 = vmatprep.subr.bf16.mxu1 %v1245_v1 }
 0x251   : > { %v819_v51 = vpop.f32.mrb[12].mxu1 }
 0x252   : > { %v825_v52 = vmul.f32 0.35355338, %v819_v51  ;;  %v1174_v53 = vpop.f32.mrb[13].mxu1 }
 0x253   : > { %v822_v54 = vpop.f32.mrb[14].mxu1 }
 0x254   : > { %v1175_v55 = vpop.f32.mrb[15].mxu1  ;;  %v826_v56 = vsel %vm488_vm4, -1e+09, %v825_v52 }
 0x255   : > { %v827_v57 = vsel %vm435_vm2, %v826_v56, -inf }
 0x256   : > { %828 = vmax.xlane.f32.xlu1 %v827_v57 }
 0x2cb   : > { %v492_v58 = vpop.xlane.xlu1 %491 }
 0x2cc   : > { %v493_v59 = vsub.f32 %v489_v35, %v492_v58 }
 0x2ce   : > { %v494_v60 = vmul.f32 1.442695, %v493_v59 }
 0x2d0   : > { %1219 = vpow2.f32 %v494_v60 }
 0x2d3   : > { %v605_v61 = vpop.xlane.xlu0 %604 }
 0x2d4   : > { %v606_v62 = vsub.f32 %v602_v42, %v605_v61 }
 0x2d6   : > { %v607_v63 = vmul.f32 1.442695, %v606_v62 }
 0x2d8   : > { %1221 = vpow2.f32 %v607_v63 }
 0x2da   : > { %v1220_v0 = vpop.eup %1219 }
 0x2db   : > { %v717_v2 = vpop.xlane.xlu0 %716  ;;  %v496_v4 = vsel %vm435_vm2, %v1220_v0, 0.0 }
 0x2dc   : > { %v718_v5 = vsub.f32 %v714_v49, %v717_v2  ;;  %497 = vadd.xlane.f32.xlu0 %v496_v4  ;;  %v1218_v49 = vld [vmem:[%s1454_s5 + $0x8] sm:$0xff]  }
 0x2dd   : > { %1185 = vmatpush3.bf16.msra.mxu1 %v1218_v49 }
 0x2de   : > { %v719_v6 = vmul.f32 1.442695, %v718_v5 }
 0x2e0   : > { %1223 = vpow2.f32 %v719_v6 }
 0x2e2   : > { %v1222_v7 = vpop.eup %1221 }
 0x2e3   : > { %v609_v8 = vsel %vm435_vm2, %v1222_v7, 0.0  ;;  %v829_v12 = vpop.xlane.xlu1 %828 }
 0x2e4   : > { %610 = vadd.xlane.f32.xlu1 %v609_v8  ;;  %v830_v13 = vsub.f32 %v826_v56, %v829_v12 }
 0x2e6   : > { %v831_v14 = vmul.f32 1.442695, %v830_v13 }
 0x2e8   : > { %1225 = vpow2.f32 %v831_v14 }
 0x2ea   : > { %v1224_v9 = vpop.eup %1223 }
 0x2eb   : > { %v721_v11 = vsel %vm435_vm2, %v1224_v9, 0.0 }
 0x2ec   : > { %722 = vadd.xlane.f32.xlu0 %v721_v11 }
 0x2f2   : > { %v1226_v15 = vpop.eup %1225 }
 0x2f3   : > { %v833_v16 = vsel %vm435_vm2, %v1226_v15, 0.0 }
 0x2f5   : > { %615 = vrot.lane.b32.xlu1 %v1352_v10, %s1255_s10  ;;  %s358_s10 = scalar_lea.vmem %s1458_s9, %s1082_s14 }
 0x302   : > { %502 = vrot.lane.b32.xlu0 %v1352_v10, %s1256_s11 }
 0x306   : > { %839 = vrot.lane.b32.xlu0 %v1352_v10, %s1257_s12 }
 0x319   : > { %834 = vadd.xlane.f32.xlu1 %v833_v16 }
 0x32a   : > { %727 = vrot.lane.b32.xlu1 %v1352_v10, %s1258_s13 }
 0x369   : > { %v498_v17 = vpop.xlane.xlu0 %497 }
 0x36a   : > { %1227 = vrcp.f32 %v498_v17 }
 0x371   : > { %v611_v18 = vpop.xlane.xlu1 %610 }
 0x372   : > { %1229 = vrcp.f32 %v611_v18 }
 0x374   : > { %v1228_v19 = vpop.eup %1227 }
 0x375   : > { %v500_v21 = vmul.f32 %v1228_v19, %v1220_v0  ;;  %v616_v24 = vpop.permute.xlu1 %615  ;;  %v1096_v0 = vld [vmem:[%s1455_s6] ss:$0 sm:$0xff] }
 0x376   : > { %v621_v27 = vsel %vm507_vm5, %v616_v24, 0 }
 0x377   : > { %v501_v25 = vpack.c.bf16 %v500_v21, %v500_v21  ;;  %v1101_v21 = vld [vmem:[%s1457_s8] ss:$0 sm:$0xff] }
 0x379   : > { %v723_v20 = vpop.xlane.xlu0 %722 }
 0x37a   : > { %1231 = vrcp.f32 %v723_v20 }
 0x37c   : > { %v1230_v26 = vpop.eup %1229 }
 0x37d   : > { %v503_v22 = vpop.permute.xlu0 %502  ;;  %v613_v10 = vmul.f32 %v1230_v26, %v1222_v7 }
 0x37e   : > { %v509_v23 = vsel %vm507_vm5, %v503_v22, 0 }
 0x37f   : > { %1141 = vmatpush3.bf16.msra.mxu0 %v509_v23  ;;  %v614_v28 = vpack.c.bf16 %v613_v10, %v613_v10 }
 0x380   : > { %1152 = vmatprep.subr.bf16.mxu0 %v1245_v1 }
 0x381   : > { %v840_v34 = vpop.permute.xlu0 %839 }
 0x382   : > { %1143 = vmatmul.mubr.msk.bf16.vlgmr.msra.gmra.mrb[4].mxu0 %vm435_vm2, %v501_v25  ;;  %v845_v36 = vsel %vm507_vm5, %v840_v34, 0 }
 0x383   : > { %1153 = vmatpush3.bf16.msra.mxu0 %v621_v27  ;;  %1154 = vmatprep.mubr.msk.bf16.mxu0 %vm1246_vm0, %v1245_v1 }
 0x384   : > { %1164 = vmatprep.subr.bf16.mxu0 %v1245_v1  ;;  %v1232_v29 = vpop.eup %1231 }
 0x385   : > { %v725_v31 = vmul.f32 %v1232_v29, %v1224_v9 }
 0x387   : > { %v726_v35 = vpack.c.bf16 %v725_v31, %v725_v31 }
 0x38a   : > { %1155 = vmatmul.mubr.msk.bf16.vlgmr.msra.gmra.mrb[8].mxu0 %vm435_vm2, %v614_v28 }
 0x38b   : > { %1166 = vmatprep.mubr.msk.bf16.mxu0 %vm1246_vm0, %v1245_v1 }
 0x3a6   : > { %v835_v30 = vpop.xlane.xlu1 %834 }
 0x3a7   : > { %1233 = vrcp.f32 %v835_v30 }
 0x3aa   : > { %v728_v32 = vpop.permute.xlu1 %727 }
 0x3ab   : > { %v733_v33 = vsel %vm507_vm5, %v728_v32, 0 }
 0x3ac   : > { %1165 = vmatpush3.bf16.msra.mxu0 %v733_v33 }
 0x3ad   : > { %1176 = vmatprep.subr.bf16.mxu0 %v1245_v1 }
 0x3af   : > { %1167 = vmatmul.mubr.msk.bf16.vlgmr.msra.gmra.mrb[12].mxu0 %vm435_vm2, %v726_v35 }
 0x3b0   : > { %1177 = vmatpush3.bf16.msra.mxu0 %v845_v36  ;;  %1178 = vmatprep.mubr.msk.bf16.mxu0 %vm1246_vm0, %v1245_v1 }
 0x3b1   : > { %v1234_v37 = vpop.eup %1233 }
 0x3b2   : > { %v837_v38 = vmul.f32 %v1234_v37, %v1226_v15 }
 0x3b4   : > { %v838_v39 = vpack.c.bf16 %v837_v38, %v837_v38 }
 0x3b7   : > { %1179 = vmatmul.mubr.msk.bf16.vlgmr.msra.gmra.mrb[16].mxu0 %vm435_vm2, %v838_v39 }
 0x455   : > { %v545_v40 = vpop.f32.mrb[4].mxu0 }
 0x456   : > { %v1144_v41 = vpop.f32.mrb[5].mxu0 }
 0x457   : > { %v548_v42 = vpop.f32.mrb[6].mxu0 }
 0x458   : > { %v1145_v43 = vpop.f32.mrb[7].mxu0 }
 0x45d   : > { %v657_v44 = vpop.f32.mrb[8].mxu0 }
 0x45e   : > { %888 = vrot.lane.b32.xlu1 %v657_v44, %s1259_s15  ;;  %v1156_v45 = vpop.f32.mrb[9].mxu0 }
 0x45f   : > { %v660_v46 = vpop.f32.mrb[10].mxu0 }
 0x460   : > { %v1157_v47 = vpop.f32.mrb[11].mxu0 }
 0x482   : > { %v769_v50 = vpop.f32.mrb[12].mxu0 }
 0x483   : > { %892 = vrot.lane.b32.xlu0 %v769_v50, %s1260_s20  ;;  %v1168_v51 = vpop.f32.mrb[13].mxu0 }
 0x484   : > { %v772_v52 = vpop.f32.mrb[14].mxu0 }
 0x485   : > { %v1169_v53 = vpop.f32.mrb[15].mxu0 }
 0x48a   : > { %v881_v54 = vpop.f32.mrb[16].mxu0 }
 0x48b   : > { %896 = vrot.lane.b32.xlu1 %v881_v54, %s1261_s21  ;;  %v1180_v55 = vpop.f32.mrb[17].mxu0 }
 0x48c   : > { %v884_v56 = vpop.f32.mrb[18].mxu0 }
 0x48d   : > { %v1181_v57 = vpop.f32.mrb[19].mxu0 }
 0x4d0   : > { %v889_v58 = vpop.permute.xlu1 %888 }
 0x4d1   : > { %v899_v59 = vsel %vm435_vm2, %v545_v40, %v889_v58 }
 0x4f5   : > { %v893_v1 = vpop.permute.xlu0 %892 }
 0x4f6   : > { %v901_v60 = vsel %vm900_vm6, %v899_v59, %v893_v1 }
 0x4fd   : > { %v897_v61 = vpop.permute.xlu1 %896 }
 0x4fe   : > { %v903_v62 = vsel %vm902_vm7, %v901_v60, %v897_v61 }
 0x4ff   : > { %v904_v63 = vpack.c.bf16 %v903_v62, %v903_v62 }
 0x501   : > { %1187 = vmatmul.mubr.msk.bf16.vlgmr.msra.gmra.mrb[16].mxu1 %vm385_vm1, %v904_v63 }
 0x5d4   : > { %v965_v2 = vpop.f32.mrb[16].mxu1 }
 0x5d5   : > { %v966_v4 = vadd.f32 %v1096_v0, %v965_v2  ;;  %v1188_v5 = vpop.f32.mrb[17].mxu1 }
 0x5d6   : > { %v968_v6 = vpop.f32.mrb[18].mxu1 }
 0x5d7   : > { %v1189_v7 = vpop.f32.mrb[19].mxu1  ;;  %v971_v8 = vadd.f32 %v966_v4, %v1342_v3  ;;  %v1100_v3 = vld [vmem:[%s1456_s7] ss:$0 sm:$0xff] }
 0x5d9   : > { %v972_v9 = vsel %vm385_vm1, %v971_v8, 0.0 }
 0x5da   : > { %973 = vadd.xlane.f32.xlu0 %v972_v9 }
 0x667   : > { %v974_v11 = vpop.xlane.xlu0 %973 }
 0x668   : > { %v976_v12 = vmul.f32 0.03125, %v974_v11 }
 0x66a   : > { %v977_v13 = vsub.f32 %v971_v8, %v976_v12 }
 0x66c   : > { %v978_v14 = vmul.f32 %v977_v13, %v977_v13 }
 0x66e   : > { %v979_v15 = vsel %vm385_vm1, %v978_v14, 0.0 }
 0x66f   : > { %980 = vadd.xlane.f32.xlu1 %v979_v15 }
 0x6fc   : > { %v981_v16 = vpop.xlane.xlu1 %980 }
 0x6fd   : > { %v982_v17 = vmul.f32 0.03125, %v981_v16 }
 0x6ff   : > { %v983_v18 = vadd.f32 1e-05, %v982_v17 }
 0x701   : > { %1235 = vrsqrt.f32 %v983_v18 }
 0x70b   : > { %v1236_v19 = vpop.eup %1235 }
 0x70c   : > { %v985_v20 = vmul.f32 %v1236_v19, %v977_v13 }
 0x70e   : > { %v993_v22 = vmul.f32 %v1100_v3, %v985_v20 }
 0x710   : > { %v1001_v23 = vadd.f32 %v1101_v21, %v993_v22 }
 0x712   : > { %1002 = vst.msk [vmem:[%s358_s10] sm:$0xff] %vm385_vm1, %v1001_v23 }
 0x713 PF: > { %s19_s29 = sadd.s32 1, %s1243_s29  }
 0x714   : > { %p16_p4 = scmp.ge.s32.totalorder %s19_s29, 4  }
 0x716   :  { %18 = sbr.rel (!%p16_p4) target bundleno = 1 (0x1), region = 92 }

// kernel: transformer_forward.21
= control target key start
LH: loop header
LB: loop body
LE: loop exit
PB: predicated region body
PF: predicated region fallthrough
CT: control target
= control target key end

     0   :  { %v111_v0 = vmov 0.0   ;;  %vm112_vm0 = vmmov 0   ;;  %vm41_vm1 = vcmask 261120   ;;  %s154_s1 = inlined_call_operand.vmem [shape: bf16[32,128], index: 1, kind: input, shape index: {}]   ;;  %s155_s0 = inlined_call_operand.vmem [shape: f32[16,32], index: 0, kind: input, shape index: {}]   ;;  %s156_s2 = inlined_call_operand.vmem [shape: f32[1,128], index: 2, kind: input, shape index: {}]   ;;  %s157_s3 = inlined_call_operand.vmem [shape: f32[16,128], index: 3, kind: output, shape index: {}]  }
   0x1   :  { %99 = vmatprep.subr.bf16.mxu0 %v111_v0  ;;  %v109_v1 = vld [vmem:[%s154_s1] sm:$0xff]   ;;  %103 = vmatprep.mubr.msk.bf16.mxu0 %vm112_vm0, %v111_v0  ;;  %v110_v2 = vld [vmem:[%s154_s1 + $0x8] sm:$0xff]  }
   0x2   :  { %100 = vmatpush3.bf16.msra.mxu0 %v109_v1  ;;  %v15_v3 = vld [vmem:[%s155_s0] sm:$0xff]  ;;  %v16_v4 = vld [vmem:[%s155_s0 + $0x8] sm:$0xff] }
   0x3   :  { %101 = vmatprep.subr.bf16.mxu0 %v111_v0  ;;  %v17_v5 = vpack.c.bf16 %v16_v4, %v15_v3  ;;  %v92_v6 = vld [vmem:[%s156_s2] ss:$0 sm:$0xff] }
   0x6   :  { %102 = vmatpush3.bf16.msra.mxu0 %v110_v2 }
   0x9   :  { %104 = vmatmul.mubr.msk.bf16.vlgmr.msra.gmra.mrb[0].mxu0 %vm41_vm1, %v17_v5 }
  0xdc   :  { %v79_v7 = vpop.f32.mrb[0].mxu0 }
  0xdd   :  { %v80_v8 = vadd.f32 %v92_v6, %v79_v7  ;;  %v105_v9 = vpop.f32.mrb[1].mxu0 }
  0xde   :  { %v82_v10 = vpop.f32.mrb[2].mxu0 }
  0xdf   :  { %86 = vst [vmem:[%s157_s3] sm:$0xff] %v80_v8  ;;  %v83_v11 = vadd.f32 %v92_v6, %v82_v10  ;;  %v106_v12 = vpop.f32.mrb[3].mxu0 }
  0xe1   :  { %87 = vst [vmem:[%s157_s3 + $0x8] sm:$0xff] %v83_v11 }

</bundles_post_ra>
